<compile_context>
chip_gen: v7x
topology: tpu7x:2x2x1
jax: 0.10.0
libtpu: 0.0.40
codegen_flags: <defaults>
</compile_context>

<pallas_src>
import numpy as np
import jax
import jax.numpy as jnp
from jax.experimental import pallas as pl
from jax.experimental.pallas import tpu as pltpu

_LANE = 128
_SIGMA = 0.6
_NFIELDS = 16


def _round_up(x, m):
    return (x + m - 1) // m * m


def _gaussian_filter_1d():
    """Normalized 1-D Gaussian; outer product == e2cnn's normalized 2-D blur."""
    fs = 2 * int(round(4 * _SIGMA)) + 1          # = 5 taps
    mean = (fs - 1) / 2.0
    g = np.arange(fs, dtype=np.float64) - mean
    f = np.exp(-(g ** 2) / (2.0 * _SIGMA ** 2))
    f = f / f.sum()
    return [float(v) for v in f]


def _blur_pool_matrix(Hm, Wm, wstride, mrows, Hop, pad_out, fvec):
    """(out_rows, mrows) matrix turning the flat dense-max-pool map into the
    blurred, stride-2-decimated output, optionally embedded in a zero-pad ring
    (pad_out) so the result is directly the next conv's padded flat input."""
    FS = len(fvec)
    PADB = FS // 2
    assert Wm <= wstride - 1                      # pool never crosses flat rows
    assert (Hm - 1) * wstride + (Wm - 1) < mrows  # every used row exists
    Wout = Hop + 2 * pad_out
    A = np.zeros((Wout * Wout, mrows), np.float32)
    for oh in range(Hop):
        for ow in range(Hop):
            orow = (oh + pad_out) * Wout + (ow + pad_out)
            for i in range(FS):
                h = 2 * oh + i - PADB
                if not (0 <= h < Hm):
                    continue
                for j in range(FS):
                    w = 2 * ow + j - PADB
                    if not (0 <= w < Wm):
                        continue
                    A[orow, h * wstride + w] += fvec[i] * fvec[j]
    return A


# --------------------------------------------------------------------------
# Fused kernel: conv1 -> pool1 -> conv2 -> pool2 -> gpool -> fc  (one image)
# --------------------------------------------------------------------------

def _make_fused_kernel(k, S1, Wp2, Mw2, P2, nfields, G):
    Ho1 = Wo1 = S1
    L1 = (Ho1 - 1) * Wo1
    L2 = Mw2 - Wp2

    def kernel(p_ref, w1_ref, a1_ref, w2_ref, a2_ref, wf_ref, b_ref,
               o_ref, x2_ref):
        # ---- conv1 (im2col matmul on the MXU) + ReLU ------------------------
        y1 = jnp.dot(p_ref[0], w1_ref[...], preferred_element_type=jnp.float32)
        y1 = jnp.maximum(y1, 0.0)                               # (S1*S1, C1p)

        # ---- pool1: 2x2/s1 max (flat) then blur+stride2+pad as ONE matmul ---
        q1 = jnp.maximum(y1[0:L1, :], y1[Wo1:Ho1 * Wo1, :])
        m1 = jnp.maximum(q1[0:L1 - 1, :], q1[1:L1, :])          # (L1-1, C1p)
        x2 = jnp.dot(a1_ref[...], m1.astype(jnp.bfloat16),
                     preferred_element_type=jnp.float32)        # (Wp2*Wp2, C1p)
        x2_ref[...] = x2.astype(jnp.bfloat16)                   # one dense store

        # ---- conv2: k*k per-tap bf16 MXU matmuls, f32 accumulation ----------
        acc = jnp.dot(x2_ref[0:Mw2, :], w2_ref[0],
                      preferred_element_type=jnp.float32)
        for t in range(1, k * k):
            r0 = (t // k) * Wp2 + (t % k)
            acc = acc + jnp.dot(x2_ref[r0:r0 + Mw2, :], w2_ref[t],
                                preferred_element_type=jnp.float32)
        y2 = jnp.maximum(acc, 0.0)                              # (Mw2, C2p)

        # ---- pool2: same fused max-pool + blur matrix ------------------------
        q2 = jnp.maximum(y2[0:L2, :], y2[Wp2:Mw2, :])
        m2 = jnp.maximum(q2[0:L2 - 1, :], q2[1:L2, :])          # (L2-1, C2p)
        pooled = jnp.dot(a2_ref[...], m2.astype(jnp.bfloat16),
                         preferred_element_type=jnp.float32)    # (P2*P2, C2p)

        # ---- GroupPooling (channels pre-permuted to group-major g*16+field) -
        gp = pooled[:, 0:nfields]
        for g in range(1, G):
            gp = jnp.maximum(gp, pooled[:, g * nfields:(g + 1) * nfields])
        gp = gp.astype(jnp.bfloat16)                            # (P2*P2, 16)

        # ---- flatten + Linear: sum_p (1,16)@(16,2048), f32 bias/accum --------
        out = b_ref[...]                                        # (1, 2048)
        for p in range(P2 * P2):
            out = out + jnp.dot(gp[p:p + 1, :], wf_ref[p],
                                preferred_element_type=jnp.float32)
        o_ref[0] = out                                          # dense 2048 lanes

    return kernel


# --------------------------------------------------------------------------
# Parameters
# --------------------------------------------------------------------------

def init_params(key, imsize, kernel_size, N):
    k = kernel_size
    G = 2 * N                                      # |D_N| regular repr size
    nfields = _NFIELDS
    C1, C2 = 6 * G, nfields * G
    C1p, C2p = _round_up(C1, _LANE), _round_up(C2, _LANE)
    z = 0.5 * (imsize - 2)
    z = int(0.5 * (z - 2))
    k1, k2, k3, k4 = jax.random.split(key, 4)

    w1 = jax.random.normal(k1, (C1, 1, k, k), jnp.float32) * 0.1
    w2 = jax.random.normal(k2, (C2, C1, k, k), jnp.float32) / np.sqrt(C1 * k * k)
    wf = jax.random.normal(k3, (2048, nfields * z * z), jnp.float32) / np.sqrt(nfields * z * z)
    bf = jax.random.normal(k4, (2048,), jnp.float32) * 0.01

    # conv1 as an im2col matmul weight (k*k, C1p): Cout zero-padded to 128 lanes.
    w1_mat = jnp.transpose(w1[:, 0, :, :], (1, 2, 0)).reshape(k * k, C1)
    w1_mat = jnp.pad(w1_mat, ((0, 0), (0, C1p - C1))).astype(jnp.bfloat16)

    # conv2 as per-tap (Cin, Cout) matrices; output channels permuted from
    # e2cnn's field-major order (c = field*G + g) to group-major (c = g*16 + f)
    # so the in-kernel group max uses contiguous lane slices.
    w2_taps = jnp.transpose(w2, (2, 3, 1, 0)).reshape(k * k, C1, nfields, G)
    w2_taps = jnp.transpose(w2_taps, (0, 1, 3, 2)).reshape(k * k, C1, C2)
    w2_taps = jnp.pad(w2_taps, ((0, 0), (0, C1p - C1), (0, C2p - C2)))
    w2_taps = w2_taps.astype(jnp.bfloat16)

    # FC weight as (z*z, 16, 2048): PyTorch flattens (field, h, w); the kernel
    # consumes (p = h*z + w, field), so reorder rows accordingly.
    wf3 = wf.T.reshape(nfields, z * z, 2048).transpose(1, 0, 2).astype(jnp.bfloat16)
    bf_k = bf.reshape(1, 2048)

    return {"w1_mat": w1_mat, "w2_taps": w2_taps, "wf3": wf3, "bfc": bf_k}, z


# --------------------------------------------------------------------------
# Forward
# --------------------------------------------------------------------------

def dsteerable_lenet_forward(params, x_nchw, imsize, kernel_size, N):
    k = kernel_size
    G = 2 * N
    nfields = _NFIELDS
    C1, C2 = 6 * G, nfields * G
    C1p, C2p = _round_up(C1, _LANE), _round_up(C2, _LANE)
    B = x_nchw.shape[0]

    fvec = _gaussian_filter_1d()
    FS = len(fvec)
    PADB = FS // 2

    # Static geometry.
    S1 = imsize + 2 - k + 1                        # conv1 output spatial
    Hm1 = S1 - 1                                   # dense 2x2/s1 pool output
    P1 = (Hm1 + 2 * PADB - FS) // 2 + 1            # antialiased pool1 output
    Wp2 = P1 + 2                                   # conv2 padded input spatial
    S2 = Wp2 - k + 1                               # conv2 output spatial
    Hm2 = S2 - 1
    P2 = (Hm2 + 2 * PADB - FS) // 2 + 1            # antialiased pool2 output (== z)
    Mw2 = (S2 - 1) * Wp2 + S2                      # conv2 flat-wide row count
    m1_rows = S1 * S1 - S1 - 1                     # rows of stage-1 dense max map
    m2_rows = Mw2 - Wp2 - 1                        # rows of stage-2 dense max map

    z = int(0.5 * (0.5 * (imsize - 2) - 2))
    assert P2 == z, (P2, z)
    # Flat 2x2/s1 max pool never reads a garbage "gap" column / past the end.
    assert Hm1 <= S1 - 1
    assert Hm2 <= S2 - 1 and (Hm2 - 1) * Wp2 + Hm2 <= Mw2 - 1

    # Fused "max-pool -> Gaussian blur (stride 2)" matrices; A1 also embeds the
    # conv2 pad=1 zero ring so its output IS the flat, padded conv2 input.
    a1 = jnp.asarray(_blur_pool_matrix(Hm1, Hm1, S1, m1_rows, P1, 1, fvec),
                     jnp.bfloat16)                 # (Wp2*Wp2, m1_rows)
    a2 = jnp.asarray(_blur_pool_matrix(Hm2, Hm2, Wp2, m2_rows, P2, 0, fvec),
                     jnp.bfloat16)                 # (P2*P2, m2_rows)

    # conv1 im2col patches (trivial input repr, Cin == 1); tiny, built in XLA.
    x2d = x_nchw[:, 0, :, :].astype(jnp.float32)
    xp = jnp.pad(x2d, ((0, 0), (1, 1), (1, 1)))
    cols = [xp[:, i:i + S1, j:j + S1] for i in range(k) for j in range(k)]
    patches = jnp.stack(cols, axis=-1).reshape(B, S1 * S1, k * k)
    patches = patches.astype(jnp.bfloat16)

    kernel = _make_fused_kernel(k, S1, Wp2, Mw2, P2, nfields, G)
    out3 = pl.pallas_call(
        kernel,
        out_shape=jax.ShapeDtypeStruct((B, 1, 2048), jnp.float32),
        grid=(B,),
        in_specs=[
            pl.BlockSpec((1, S1 * S1, k * k), lambda b: (b, 0, 0)),       # patches
            pl.BlockSpec((k * k, C1p), lambda b: (0, 0)),                 # conv1 w
            pl.BlockSpec((Wp2 * Wp2, m1_rows), lambda b: (0, 0)),         # pool1 matrix
            pl.BlockSpec((k * k, C1p, C2p), lambda b: (0, 0, 0)),         # conv2 taps
            pl.BlockSpec((P2 * P2, m2_rows), lambda b: (0, 0)),           # pool2 matrix
            pl.BlockSpec((P2 * P2, nfields, 2048), lambda b: (0, 0, 0)),  # fc w
            pl.BlockSpec((1, 2048), lambda b: (0, 0)),                    # fc bias
        ],
        out_specs=pl.BlockSpec((1, 1, 2048), lambda b: (b, 0, 0)),
        scratch_shapes=[pltpu.VMEM((Wp2 * Wp2, C1p), jnp.bfloat16)],
        compiler_params=pltpu.CompilerParams(
            dimension_semantics=("parallel",),
            vmem_limit_bytes=32 * 1024 * 1024),
    )(patches, params["w1_mat"], a1, params["w2_taps"], a2,
      params["wf3"], params["bfc"])
    return out3.reshape(B, 2048)


# --------------------------------------------------------------------------
# Demo
# --------------------------------------------------------------------------

if __name__ == "__main__":
    # Small config: imsize=16, N=4 (D_4 group, |D_4| = 8), batch=2.
    IMSIZE, KSIZE, N, B = 16, 5, 4, 2

    key = jax.random.PRNGKey(0)
    kp, kx = jax.random.split(key)
    params, z = init_params(kp, IMSIZE, KSIZE, N)
    x = jax.random.normal(kx, (B, 1, IMSIZE, IMSIZE), jnp.float32)  # NCHW, trivial repr

    fwd = jax.jit(lambda p, xx: dsteerable_lenet_forward(p, xx, IMSIZE, KSIZE, N))
    out = jax.block_until_ready(fwd(params, x))

    assert out.shape == (B, 2048), out.shape
    assert out.dtype == jnp.float32
    assert bool(jnp.all(jnp.isfinite(out)))
    print("KERNEL_OK")
</pallas_src>

<mosaic_0001>
module attributes {stable_mosaic.version = 11 : i64} {
  func.func @kernel(%arg0: i32, %arg1: memref<1x196x25xbf16, #tpu.memory_space<vmem>>, %arg2: memref<25x128xbf16, #tpu.memory_space<vmem>>, %arg3: memref<81x181xbf16, #tpu.memory_space<vmem>>, %arg4: memref<25x128x128xbf16, #tpu.memory_space<vmem>>, %arg5: memref<4x31xbf16, #tpu.memory_space<vmem>>, %arg6: memref<4x16x2048xbf16, #tpu.memory_space<vmem>>, %arg7: memref<1x2048xf32, #tpu.memory_space<vmem>>, %arg8: memref<1x1x2048xf32, #tpu.memory_space<vmem>>, %arg9: memref<81x128xbf16, #tpu.memory_space<vmem>>) attributes {dimension_semantics = [#tpu.dimension_semantics<parallel>], iteration_bounds = array<i64: 2>, scalar_prefetch = 0 : i64, scratch_operands = 1 : i64, tpu.core_type = #tpu.core_type<tc>, window_params = [{transform_indices = @transform_0, window_bounds = array<i64: 1, 196, 25>}, {pipeline_mode = #tpu.pipeline_mode<synchronous>, transform_indices = @transform_1, window_bounds = array<i64: 25, 128>}, {pipeline_mode = #tpu.pipeline_mode<synchronous>, transform_indices = @transform_2, window_bounds = array<i64: 81, 181>}, {pipeline_mode = #tpu.pipeline_mode<synchronous>, transform_indices = @transform_3, window_bounds = array<i64: 25, 128, 128>}, {pipeline_mode = #tpu.pipeline_mode<synchronous>, transform_indices = @transform_4, window_bounds = array<i64: 4, 31>}, {pipeline_mode = #tpu.pipeline_mode<synchronous>, transform_indices = @transform_5, window_bounds = array<i64: 4, 16, 2048>}, {pipeline_mode = #tpu.pipeline_mode<synchronous>, transform_indices = @transform_6, window_bounds = array<i64: 1, 2048>}, {transform_indices = @transform_7, window_bounds = array<i64: 1, 1, 2048>}]} {
    %c0 = arith.constant 0 : index
    %c0_0 = arith.constant 0 : index
    %c0_1 = arith.constant 0 : index
    %0 = vector.load %arg1[%c0, %c0_0, %c0_1] : memref<1x196x25xbf16, #tpu.memory_space<vmem>>, vector<1x196x25xbf16>
    %1 = vector.shape_cast %0 : vector<1x196x25xbf16> to vector<196x25xbf16>
    %c0_2 = arith.constant 0 : index
    %c0_3 = arith.constant 0 : index
    %2 = vector.load %arg2[%c0_2, %c0_3] : memref<25x128xbf16, #tpu.memory_space<vmem>>, vector<25x128xbf16>
    %cst = arith.constant dense<0.000000e+00> : vector<196x128xf32>
    %3 = tpu.matmul %1, %2, %cst {dimension_numbers = #tpu.dot_dimension_numbers<[1], [0], [0], [1], [0, 0, 1, 1], [], []>} : vector<196x25xbf16>, vector<25x128xbf16>, vector<196x128xf32> -> vector<196x128xf32>
    %cst_4 = arith.constant 0.000000e+00 : f32
    %4 = vector.broadcast %cst_4 : f32 to vector<196x128xf32>
    %5 = arith.maximumf %3, %4 : vector<196x128xf32>
    %6 = vector.extract_strided_slice %5 {offsets = [0, 0], sizes = [182, 128], strides = [1, 1]} : vector<196x128xf32> to vector<182x128xf32>
    %7 = vector.extract_strided_slice %5 {offsets = [14, 0], sizes = [182, 128], strides = [1, 1]} : vector<196x128xf32> to vector<182x128xf32>
    %8 = arith.maximumf %6, %7 : vector<182x128xf32>
    %9 = vector.extract_strided_slice %8 {offsets = [0, 0], sizes = [181, 128], strides = [1, 1]} : vector<182x128xf32> to vector<181x128xf32>
    %10 = vector.extract_strided_slice %8 {offsets = [1, 0], sizes = [181, 128], strides = [1, 1]} : vector<182x128xf32> to vector<181x128xf32>
    %11 = arith.maximumf %9, %10 : vector<181x128xf32>
    %c0_5 = arith.constant 0 : index
    %c0_6 = arith.constant 0 : index
    %12 = vector.load %arg3[%c0_5, %c0_6] : memref<81x181xbf16, #tpu.memory_space<vmem>>, vector<81x181xbf16>
    %13 = arith.truncf %11 : vector<181x128xf32> to vector<181x128xbf16>
    %cst_7 = arith.constant dense<0.000000e+00> : vector<81x128xf32>
    %14 = tpu.matmul %12, %13, %cst_7 {dimension_numbers = #tpu.dot_dimension_numbers<[1], [0], [0], [1], [0, 0, 1, 1], [], []>} : vector<81x181xbf16>, vector<181x128xbf16>, vector<81x128xf32> -> vector<81x128xf32>
    %15 = arith.truncf %14 : vector<81x128xf32> to vector<81x128xbf16>
    %c0_8 = arith.constant 0 : index
    %c0_9 = arith.constant 0 : index
    %16 = vector.load %arg9[%c0_8, %c0_9] : memref<81x128xbf16, #tpu.memory_space<vmem>>, vector<81x128xbf16>
    tpu.vector_store %arg9[%c0_8, %c0_9], %15 {strides = array<i32>} : memref<81x128xbf16, #tpu.memory_space<vmem>>, vector<81x128xbf16>,
    %c0_10 = arith.constant 0 : index
    %c0_11 = arith.constant 0 : index
    %17 = vector.load %arg9[%c0_10, %c0_11] : memref<81x128xbf16, #tpu.memory_space<vmem>>, vector<41x128xbf16>
    %c0_12 = arith.constant 0 : index
    %c0_13 = arith.constant 0 : index
    %c0_14 = arith.constant 0 : index
    %18 = vector.load %arg4[%c0_12, %c0_13, %c0_14] : memref<25x128x128xbf16, #tpu.memory_space<vmem>>, vector<1x128x128xbf16>
    %19 = vector.shape_cast %18 : vector<1x128x128xbf16> to vector<128x128xbf16>
    %cst_15 = arith.constant dense<0.000000e+00> : vector<41x128xf32>
    %20 = tpu.matmul %17, %19, %cst_15 {dimension_numbers = #tpu.dot_dimension_numbers<[1], [0], [0], [1], [0, 0, 1, 1], [], []>} : vector<41x128xbf16>, vector<128x128xbf16>, vector<41x128xf32> -> vector<41x128xf32>
    %c1 = arith.constant 1 : index
    %c0_16 = arith.constant 0 : index
    %21 = vector.load %arg9[%c1, %c0_16] : memref<81x128xbf16, #tpu.memory_space<vmem>>, vector<41x128xbf16>
    %c1_17 = arith.constant 1 : index
    %c0_18 = arith.constant 0 : index
    %c0_19 = arith.constant 0 : index
    %22 = vector.load %arg4[%c1_17, %c0_18, %c0_19] : memref<25x128x128xbf16, #tpu.memory_space<vmem>>, vector<1x128x128xbf16>
    %23 = vector.shape_cast %22 : vector<1x128x128xbf16> to vector<128x128xbf16>
    %cst_20 = arith.constant dense<0.000000e+00> : vector<41x128xf32>
    %24 = tpu.matmul %21, %23, %cst_20 {dimension_numbers = #tpu.dot_dimension_numbers<[1], [0], [0], [1], [0, 0, 1, 1], [], []>} : vector<41x128xbf16>, vector<128x128xbf16>, vector<41x128xf32> -> vector<41x128xf32>
    %25 = arith.addf %20, %24 : vector<41x128xf32>
    %c2 = arith.constant 2 : index
    %c0_21 = arith.constant 0 : index
    %26 = vector.load %arg9[%c2, %c0_21] : memref<81x128xbf16, #tpu.memory_space<vmem>>, vector<41x128xbf16>
    %c2_22 = arith.constant 2 : index
    %c0_23 = arith.constant 0 : index
    %c0_24 = arith.constant 0 : index
    %27 = vector.load %arg4[%c2_22, %c0_23, %c0_24] : memref<25x128x128xbf16, #tpu.memory_space<vmem>>, vector<1x128x128xbf16>
    %28 = vector.shape_cast %27 : vector<1x128x128xbf16> to vector<128x128xbf16>
    %cst_25 = arith.constant dense<0.000000e+00> : vector<41x128xf32>
    %29 = tpu.matmul %26, %28, %cst_25 {dimension_numbers = #tpu.dot_dimension_numbers<[1], [0], [0], [1], [0, 0, 1, 1], [], []>} : vector<41x128xbf16>, vector<128x128xbf16>, vector<41x128xf32> -> vector<41x128xf32>
    %30 = arith.addf %25, %29 : vector<41x128xf32>
    %c3 = arith.constant 3 : index
    %c0_26 = arith.constant 0 : index
    %31 = vector.load %arg9[%c3, %c0_26] : memref<81x128xbf16, #tpu.memory_space<vmem>>, vector<41x128xbf16>
    %c3_27 = arith.constant 3 : index
    %c0_28 = arith.constant 0 : index
    %c0_29 = arith.constant 0 : index
    %32 = vector.load %arg4[%c3_27, %c0_28, %c0_29] : memref<25x128x128xbf16, #tpu.memory_space<vmem>>, vector<1x128x128xbf16>
    %33 = vector.shape_cast %32 : vector<1x128x128xbf16> to vector<128x128xbf16>
    %cst_30 = arith.constant dense<0.000000e+00> : vector<41x128xf32>
    %34 = tpu.matmul %31, %33, %cst_30 {dimension_numbers = #tpu.dot_dimension_numbers<[1], [0], [0], [1], [0, 0, 1, 1], [], []>} : vector<41x128xbf16>, vector<128x128xbf16>, vector<41x128xf32> -> vector<41x128xf32>
    %35 = arith.addf %30, %34 : vector<41x128xf32>
    %c4 = arith.constant 4 : index
    %c0_31 = arith.constant 0 : index
    %36 = vector.load %arg9[%c4, %c0_31] : memref<81x128xbf16, #tpu.memory_space<vmem>>, vector<41x128xbf16>
    %c4_32 = arith.constant 4 : index
    %c0_33 = arith.constant 0 : index
    %c0_34 = arith.constant 0 : index
    %37 = vector.load %arg4[%c4_32, %c0_33, %c0_34] : memref<25x128x128xbf16, #tpu.memory_space<vmem>>, vector<1x128x128xbf16>
    %38 = vector.shape_cast %37 : vector<1x128x128xbf16> to vector<128x128xbf16>
    %cst_35 = arith.constant dense<0.000000e+00> : vector<41x128xf32>
    %39 = tpu.matmul %36, %38, %cst_35 {dimension_numbers = #tpu.dot_dimension_numbers<[1], [0], [0], [1], [0, 0, 1, 1], [], []>} : vector<41x128xbf16>, vector<128x128xbf16>, vector<41x128xf32> -> vector<41x128xf32>
    %40 = arith.addf %35, %39 : vector<41x128xf32>
    %c9 = arith.constant 9 : index
    %c0_36 = arith.constant 0 : index
    %41 = vector.load %arg9[%c9, %c0_36] : memref<81x128xbf16, #tpu.memory_space<vmem>>, vector<41x128xbf16>
    %c5 = arith.constant 5 : index
    %c0_37 = arith.constant 0 : index
    %c0_38 = arith.constant 0 : index
    %42 = vector.load %arg4[%c5, %c0_37, %c0_38] : memref<25x128x128xbf16, #tpu.memory_space<vmem>>, vector<1x128x128xbf16>
    %43 = vector.shape_cast %42 : vector<1x128x128xbf16> to vector<128x128xbf16>
    %cst_39 = arith.constant dense<0.000000e+00> : vector<41x128xf32>
    %44 = tpu.matmul %41, %43, %cst_39 {dimension_numbers = #tpu.dot_dimension_numbers<[1], [0], [0], [1], [0, 0, 1, 1], [], []>} : vector<41x128xbf16>, vector<128x128xbf16>, vector<41x128xf32> -> vector<41x128xf32>
    %45 = arith.addf %40, %44 : vector<41x128xf32>
    %c10 = arith.constant 10 : index
    %c0_40 = arith.constant 0 : index
    %46 = vector.load %arg9[%c10, %c0_40] : memref<81x128xbf16, #tpu.memory_space<vmem>>, vector<41x128xbf16>
    %c6 = arith.constant 6 : index
    %c0_41 = arith.constant 0 : index
    %c0_42 = arith.constant 0 : index
    %47 = vector.load %arg4[%c6, %c0_41, %c0_42] : memref<25x128x128xbf16, #tpu.memory_space<vmem>>, vector<1x128x128xbf16>
    %48 = vector.shape_cast %47 : vector<1x128x128xbf16> to vector<128x128xbf16>
    %cst_43 = arith.constant dense<0.000000e+00> : vector<41x128xf32>
    %49 = tpu.matmul %46, %48, %cst_43 {dimension_numbers = #tpu.dot_dimension_numbers<[1], [0], [0], [1], [0, 0, 1, 1], [], []>} : vector<41x128xbf16>, vector<128x128xbf16>, vector<41x128xf32> -> vector<41x128xf32>
    %50 = arith.addf %45, %49 : vector<41x128xf32>
    %c11 = arith.constant 11 : index
    %c0_44 = arith.constant 0 : index
    %51 = vector.load %arg9[%c11, %c0_44] : memref<81x128xbf16, #tpu.memory_space<vmem>>, vector<41x128xbf16>
    %c7 = arith.constant 7 : index
    %c0_45 = arith.constant 0 : index
    %c0_46 = arith.constant 0 : index
    %52 = vector.load %arg4[%c7, %c0_45, %c0_46] : memref<25x128x128xbf16, #tpu.memory_space<vmem>>, vector<1x128x128xbf16>
    %53 = vector.shape_cast %52 : vector<1x128x128xbf16> to vector<128x128xbf16>
    %cst_47 = arith.constant dense<0.000000e+00> : vector<41x128xf32>
    %54 = tpu.matmul %51, %53, %cst_47 {dimension_numbers = #tpu.dot_dimension_numbers<[1], [0], [0], [1], [0, 0, 1, 1], [], []>} : vector<41x128xbf16>, vector<128x128xbf16>, vector<41x128xf32> -> vector<41x128xf32>
    %55 = arith.addf %50, %54 : vector<41x128xf32>
    %c12 = arith.constant 12 : index
    %c0_48 = arith.constant 0 : index
    %56 = vector.load %arg9[%c12, %c0_48] : memref<81x128xbf16, #tpu.memory_space<vmem>>, vector<41x128xbf16>
    %c8 = arith.constant 8 : index
    %c0_49 = arith.constant 0 : index
    %c0_50 = arith.constant 0 : index
    %57 = vector.load %arg4[%c8, %c0_49, %c0_50] : memref<25x128x128xbf16, #tpu.memory_space<vmem>>, vector<1x128x128xbf16>
    %58 = vector.shape_cast %57 : vector<1x128x128xbf16> to vector<128x128xbf16>
    %cst_51 = arith.constant dense<0.000000e+00> : vector<41x128xf32>
    %59 = tpu.matmul %56, %58, %cst_51 {dimension_numbers = #tpu.dot_dimension_numbers<[1], [0], [0], [1], [0, 0, 1, 1], [], []>} : vector<41x128xbf16>, vector<128x128xbf16>, vector<41x128xf32> -> vector<41x128xf32>
    %60 = arith.addf %55, %59 : vector<41x128xf32>
    %c13 = arith.constant 13 : index
    %c0_52 = arith.constant 0 : index
    %61 = vector.load %arg9[%c13, %c0_52] : memref<81x128xbf16, #tpu.memory_space<vmem>>, vector<41x128xbf16>
    %c9_53 = arith.constant 9 : index
    %c0_54 = arith.constant 0 : index
    %c0_55 = arith.constant 0 : index
    %62 = vector.load %arg4[%c9_53, %c0_54, %c0_55] : memref<25x128x128xbf16, #tpu.memory_space<vmem>>, vector<1x128x128xbf16>
    %63 = vector.shape_cast %62 : vector<1x128x128xbf16> to vector<128x128xbf16>
    %cst_56 = arith.constant dense<0.000000e+00> : vector<41x128xf32>
    %64 = tpu.matmul %61, %63, %cst_56 {dimension_numbers = #tpu.dot_dimension_numbers<[1], [0], [0], [1], [0, 0, 1, 1], [], []>} : vector<41x128xbf16>, vector<128x128xbf16>, vector<41x128xf32> -> vector<41x128xf32>
    %65 = arith.addf %60, %64 : vector<41x128xf32>
    %c18 = arith.constant 18 : index
    %c0_57 = arith.constant 0 : index
    %66 = vector.load %arg9[%c18, %c0_57] : memref<81x128xbf16, #tpu.memory_space<vmem>>, vector<41x128xbf16>
    %c10_58 = arith.constant 10 : index
    %c0_59 = arith.constant 0 : index
    %c0_60 = arith.constant 0 : index
    %67 = vector.load %arg4[%c10_58, %c0_59, %c0_60] : memref<25x128x128xbf16, #tpu.memory_space<vmem>>, vector<1x128x128xbf16>
    %68 = vector.shape_cast %67 : vector<1x128x128xbf16> to vector<128x128xbf16>
    %cst_61 = arith.constant dense<0.000000e+00> : vector<41x128xf32>
    %69 = tpu.matmul %66, %68, %cst_61 {dimension_numbers = #tpu.dot_dimension_numbers<[1], [0], [0], [1], [0, 0, 1, 1], [], []>} : vector<41x128xbf16>, vector<128x128xbf16>, vector<41x128xf32> -> vector<41x128xf32>
    %70 = arith.addf %65, %69 : vector<41x128xf32>
    %c19 = arith.constant 19 : index
    %c0_62 = arith.constant 0 : index
    %71 = vector.load %arg9[%c19, %c0_62] : memref<81x128xbf16, #tpu.memory_space<vmem>>, vector<41x128xbf16>
    %c11_63 = arith.constant 11 : index
    %c0_64 = arith.constant 0 : index
    %c0_65 = arith.constant 0 : index
    %72 = vector.load %arg4[%c11_63, %c0_64, %c0_65] : memref<25x128x128xbf16, #tpu.memory_space<vmem>>, vector<1x128x128xbf16>
    %73 = vector.shape_cast %72 : vector<1x128x128xbf16> to vector<128x128xbf16>
    %cst_66 = arith.constant dense<0.000000e+00> : vector<41x128xf32>
    %74 = tpu.matmul %71, %73, %cst_66 {dimension_numbers = #tpu.dot_dimension_numbers<[1], [0], [0], [1], [0, 0, 1, 1], [], []>} : vector<41x128xbf16>, vector<128x128xbf16>, vector<41x128xf32> -> vector<41x128xf32>
    %75 = arith.addf %70, %74 : vector<41x128xf32>
    %c20 = arith.constant 20 : index
    %c0_67 = arith.constant 0 : index
    %76 = vector.load %arg9[%c20, %c0_67] : memref<81x128xbf16, #tpu.memory_space<vmem>>, vector<41x128xbf16>
    %c12_68 = arith.constant 12 : index
    %c0_69 = arith.constant 0 : index
    %c0_70 = arith.constant 0 : index
    %77 = vector.load %arg4[%c12_68, %c0_69, %c0_70] : memref<25x128x128xbf16, #tpu.memory_space<vmem>>, vector<1x128x128xbf16>
    %78 = vector.shape_cast %77 : vector<1x128x128xbf16> to vector<128x128xbf16>
    %cst_71 = arith.constant dense<0.000000e+00> : vector<41x128xf32>
    %79 = tpu.matmul %76, %78, %cst_71 {dimension_numbers = #tpu.dot_dimension_numbers<[1], [0], [0], [1], [0, 0, 1, 1], [], []>} : vector<41x128xbf16>, vector<128x128xbf16>, vector<41x128xf32> -> vector<41x128xf32>
    %80 = arith.addf %75, %79 : vector<41x128xf32>
    %c21 = arith.constant 21 : index
    %c0_72 = arith.constant 0 : index
    %81 = vector.load %arg9[%c21, %c0_72] : memref<81x128xbf16, #tpu.memory_space<vmem>>, vector<41x128xbf16>
    %c13_73 = arith.constant 13 : index
    %c0_74 = arith.constant 0 : index
    %c0_75 = arith.constant 0 : index
    %82 = vector.load %arg4[%c13_73, %c0_74, %c0_75] : memref<25x128x128xbf16, #tpu.memory_space<vmem>>, vector<1x128x128xbf16>
    %83 = vector.shape_cast %82 : vector<1x128x128xbf16> to vector<128x128xbf16>
    %cst_76 = arith.constant dense<0.000000e+00> : vector<41x128xf32>
    %84 = tpu.matmul %81, %83, %cst_76 {dimension_numbers = #tpu.dot_dimension_numbers<[1], [0], [0], [1], [0, 0, 1, 1], [], []>} : vector<41x128xbf16>, vector<128x128xbf16>, vector<41x128xf32> -> vector<41x128xf32>
    %85 = arith.addf %80, %84 : vector<41x128xf32>
    %c22 = arith.constant 22 : index
    %c0_77 = arith.constant 0 : index
    %86 = vector.load %arg9[%c22, %c0_77] : memref<81x128xbf16, #tpu.memory_space<vmem>>, vector<41x128xbf16>
    %c14 = arith.constant 14 : index
    %c0_78 = arith.constant 0 : index
    %c0_79 = arith.constant 0 : index
    %87 = vector.load %arg4[%c14, %c0_78, %c0_79] : memref<25x128x128xbf16, #tpu.memory_space<vmem>>, vector<1x128x128xbf16>
    %88 = vector.shape_cast %87 : vector<1x128x128xbf16> to vector<128x128xbf16>
    %cst_80 = arith.constant dense<0.000000e+00> : vector<41x128xf32>
    %89 = tpu.matmul %86, %88, %cst_80 {dimension_numbers = #tpu.dot_dimension_numbers<[1], [0], [0], [1], [0, 0, 1, 1], [], []>} : vector<41x128xbf16>, vector<128x128xbf16>, vector<41x128xf32> -> vector<41x128xf32>
    %90 = arith.addf %85, %89 : vector<41x128xf32>
    %c27 = arith.constant 27 : index
    %c0_81 = arith.constant 0 : index
    %91 = vector.load %arg9[%c27, %c0_81] : memref<81x128xbf16, #tpu.memory_space<vmem>>, vector<41x128xbf16>
    %c15 = arith.constant 15 : index
    %c0_82 = arith.constant 0 : index
    %c0_83 = arith.constant 0 : index
    %92 = vector.load %arg4[%c15, %c0_82, %c0_83] : memref<25x128x128xbf16, #tpu.memory_space<vmem>>, vector<1x128x128xbf16>
    %93 = vector.shape_cast %92 : vector<1x128x128xbf16> to vector<128x128xbf16>
    %cst_84 = arith.constant dense<0.000000e+00> : vector<41x128xf32>
    %94 = tpu.matmul %91, %93, %cst_84 {dimension_numbers = #tpu.dot_dimension_numbers<[1], [0], [0], [1], [0, 0, 1, 1], [], []>} : vector<41x128xbf16>, vector<128x128xbf16>, vector<41x128xf32> -> vector<41x128xf32>
    %95 = arith.addf %90, %94 : vector<41x128xf32>
    %c28 = arith.constant 28 : index
    %c0_85 = arith.constant 0 : index
    %96 = vector.load %arg9[%c28, %c0_85] : memref<81x128xbf16, #tpu.memory_space<vmem>>, vector<41x128xbf16>
    %c16 = arith.constant 16 : index
    %c0_86 = arith.constant 0 : index
    %c0_87 = arith.constant 0 : index
    %97 = vector.load %arg4[%c16, %c0_86, %c0_87] : memref<25x128x128xbf16, #tpu.memory_space<vmem>>, vector<1x128x128xbf16>
    %98 = vector.shape_cast %97 : vector<1x128x128xbf16> to vector<128x128xbf16>
    %cst_88 = arith.constant dense<0.000000e+00> : vector<41x128xf32>
    %99 = tpu.matmul %96, %98, %cst_88 {dimension_numbers = #tpu.dot_dimension_numbers<[1], [0], [0], [1], [0, 0, 1, 1], [], []>} : vector<41x128xbf16>, vector<128x128xbf16>, vector<41x128xf32> -> vector<41x128xf32>
    %100 = arith.addf %95, %99 : vector<41x128xf32>
    %c29 = arith.constant 29 : index
    %c0_89 = arith.constant 0 : index
    %101 = vector.load %arg9[%c29, %c0_89] : memref<81x128xbf16, #tpu.memory_space<vmem>>, vector<41x128xbf16>
    %c17 = arith.constant 17 : index
    %c0_90 = arith.constant 0 : index
    %c0_91 = arith.constant 0 : index
    %102 = vector.load %arg4[%c17, %c0_90, %c0_91] : memref<25x128x128xbf16, #tpu.memory_space<vmem>>, vector<1x128x128xbf16>
    %103 = vector.shape_cast %102 : vector<1x128x128xbf16> to vector<128x128xbf16>
    %cst_92 = arith.constant dense<0.000000e+00> : vector<41x128xf32>
    %104 = tpu.matmul %101, %103, %cst_92 {dimension_numbers = #tpu.dot_dimension_numbers<[1], [0], [0], [1], [0, 0, 1, 1], [], []>} : vector<41x128xbf16>, vector<128x128xbf16>, vector<41x128xf32> -> vector<41x128xf32>
    %105 = arith.addf %100, %104 : vector<41x128xf32>
    %c30 = arith.constant 30 : index
    %c0_93 = arith.constant 0 : index
    %106 = vector.load %arg9[%c30, %c0_93] : memref<81x128xbf16, #tpu.memory_space<vmem>>, vector<41x128xbf16>
    %c18_94 = arith.constant 18 : index
    %c0_95 = arith.constant 0 : index
    %c0_96 = arith.constant 0 : index
    %107 = vector.load %arg4[%c18_94, %c0_95, %c0_96] : memref<25x128x128xbf16, #tpu.memory_space<vmem>>, vector<1x128x128xbf16>
    %108 = vector.shape_cast %107 : vector<1x128x128xbf16> to vector<128x128xbf16>
    %cst_97 = arith.constant dense<0.000000e+00> : vector<41x128xf32>
    %109 = tpu.matmul %106, %108, %cst_97 {dimension_numbers = #tpu.dot_dimension_numbers<[1], [0], [0], [1], [0, 0, 1, 1], [], []>} : vector<41x128xbf16>, vector<128x128xbf16>, vector<41x128xf32> -> vector<41x128xf32>
    %110 = arith.addf %105, %109 : vector<41x128xf32>
    %c31 = arith.constant 31 : index
    %c0_98 = arith.constant 0 : index
    %111 = vector.load %arg9[%c31, %c0_98] : memref<81x128xbf16, #tpu.memory_space<vmem>>, vector<41x128xbf16>
    %c19_99 = arith.constant 19 : index
    %c0_100 = arith.constant 0 : index
    %c0_101 = arith.constant 0 : index
    %112 = vector.load %arg4[%c19_99, %c0_100, %c0_101] : memref<25x128x128xbf16, #tpu.memory_space<vmem>>, vector<1x128x128xbf16>
    %113 = vector.shape_cast %112 : vector<1x128x128xbf16> to vector<128x128xbf16>
    %cst_102 = arith.constant dense<0.000000e+00> : vector<41x128xf32>
    %114 = tpu.matmul %111, %113, %cst_102 {dimension_numbers = #tpu.dot_dimension_numbers<[1], [0], [0], [1], [0, 0, 1, 1], [], []>} : vector<41x128xbf16>, vector<128x128xbf16>, vector<41x128xf32> -> vector<41x128xf32>
    %115 = arith.addf %110, %114 : vector<41x128xf32>
    %c36 = arith.constant 36 : index
    %c0_103 = arith.constant 0 : index
    %116 = vector.load %arg9[%c36, %c0_103] : memref<81x128xbf16, #tpu.memory_space<vmem>>, vector<41x128xbf16>
    %c20_104 = arith.constant 20 : index
    %c0_105 = arith.constant 0 : index
    %c0_106 = arith.constant 0 : index
    %117 = vector.load %arg4[%c20_104, %c0_105, %c0_106] : memref<25x128x128xbf16, #tpu.memory_space<vmem>>, vector<1x128x128xbf16>
    %118 = vector.shape_cast %117 : vector<1x128x128xbf16> to vector<128x128xbf16>
    %cst_107 = arith.constant dense<0.000000e+00> : vector<41x128xf32>
    %119 = tpu.matmul %116, %118, %cst_107 {dimension_numbers = #tpu.dot_dimension_numbers<[1], [0], [0], [1], [0, 0, 1, 1], [], []>} : vector<41x128xbf16>, vector<128x128xbf16>, vector<41x128xf32> -> vector<41x128xf32>
    %120 = arith.addf %115, %119 : vector<41x128xf32>
    %c37 = arith.constant 37 : index
    %c0_108 = arith.constant 0 : index
    %121 = vector.load %arg9[%c37, %c0_108] : memref<81x128xbf16, #tpu.memory_space<vmem>>, vector<41x128xbf16>
    %c21_109 = arith.constant 21 : index
    %c0_110 = arith.constant 0 : index
    %c0_111 = arith.constant 0 : index
    %122 = vector.load %arg4[%c21_109, %c0_110, %c0_111] : memref<25x128x128xbf16, #tpu.memory_space<vmem>>, vector<1x128x128xbf16>
    %123 = vector.shape_cast %122 : vector<1x128x128xbf16> to vector<128x128xbf16>
    %cst_112 = arith.constant dense<0.000000e+00> : vector<41x128xf32>
    %124 = tpu.matmul %121, %123, %cst_112 {dimension_numbers = #tpu.dot_dimension_numbers<[1], [0], [0], [1], [0, 0, 1, 1], [], []>} : vector<41x128xbf16>, vector<128x128xbf16>, vector<41x128xf32> -> vector<41x128xf32>
    %125 = arith.addf %120, %124 : vector<41x128xf32>
    %c38 = arith.constant 38 : index
    %c0_113 = arith.constant 0 : index
    %126 = vector.load %arg9[%c38, %c0_113] : memref<81x128xbf16, #tpu.memory_space<vmem>>, vector<41x128xbf16>
    %c22_114 = arith.constant 22 : index
    %c0_115 = arith.constant 0 : index
    %c0_116 = arith.constant 0 : index
    %127 = vector.load %arg4[%c22_114, %c0_115, %c0_116] : memref<25x128x128xbf16, #tpu.memory_space<vmem>>, vector<1x128x128xbf16>
    %128 = vector.shape_cast %127 : vector<1x128x128xbf16> to vector<128x128xbf16>
    %cst_117 = arith.constant dense<0.000000e+00> : vector<41x128xf32>
    %129 = tpu.matmul %126, %128, %cst_117 {dimension_numbers = #tpu.dot_dimension_numbers<[1], [0], [0], [1], [0, 0, 1, 1], [], []>} : vector<41x128xbf16>, vector<128x128xbf16>, vector<41x128xf32> -> vector<41x128xf32>
    %130 = arith.addf %125, %129 : vector<41x128xf32>
    %c39 = arith.constant 39 : index
    %c0_118 = arith.constant 0 : index
    %131 = vector.load %arg9[%c39, %c0_118] : memref<81x128xbf16, #tpu.memory_space<vmem>>, vector<41x128xbf16>
    %c23 = arith.constant 23 : index
    %c0_119 = arith.constant 0 : index
    %c0_120 = arith.constant 0 : index
    %132 = vector.load %arg4[%c23, %c0_119, %c0_120] : memref<25x128x128xbf16, #tpu.memory_space<vmem>>, vector<1x128x128xbf16>
    %133 = vector.shape_cast %132 : vector<1x128x128xbf16> to vector<128x128xbf16>
    %cst_121 = arith.constant dense<0.000000e+00> : vector<41x128xf32>
    %134 = tpu.matmul %131, %133, %cst_121 {dimension_numbers = #tpu.dot_dimension_numbers<[1], [0], [0], [1], [0, 0, 1, 1], [], []>} : vector<41x128xbf16>, vector<128x128xbf16>, vector<41x128xf32> -> vector<41x128xf32>
    %135 = arith.addf %130, %134 : vector<41x128xf32>
    %c40 = arith.constant 40 : index
    %c0_122 = arith.constant 0 : index
    %136 = vector.load %arg9[%c40, %c0_122] : memref<81x128xbf16, #tpu.memory_space<vmem>>, vector<41x128xbf16>
    %c24 = arith.constant 24 : index
    %c0_123 = arith.constant 0 : index
    %c0_124 = arith.constant 0 : index
    %137 = vector.load %arg4[%c24, %c0_123, %c0_124] : memref<25x128x128xbf16, #tpu.memory_space<vmem>>, vector<1x128x128xbf16>
    %138 = vector.shape_cast %137 : vector<1x128x128xbf16> to vector<128x128xbf16>
    %cst_125 = arith.constant dense<0.000000e+00> : vector<41x128xf32>
    %139 = tpu.matmul %136, %138, %cst_125 {dimension_numbers = #tpu.dot_dimension_numbers<[1], [0], [0], [1], [0, 0, 1, 1], [], []>} : vector<41x128xbf16>, vector<128x128xbf16>, vector<41x128xf32> -> vector<41x128xf32>
    %140 = arith.addf %135, %139 : vector<41x128xf32>
    %cst_126 = arith.constant 0.000000e+00 : f32
    %141 = vector.broadcast %cst_126 : f32 to vector<41x128xf32>
    %142 = arith.maximumf %140, %141 : vector<41x128xf32>
    %143 = vector.extract_strided_slice %142 {offsets = [0, 0], sizes = [32, 128], strides = [1, 1]} : vector<41x128xf32> to vector<32x128xf32>
    %144 = vector.extract_strided_slice %142 {offsets = [9, 0], sizes = [32, 128], strides = [1, 1]} : vector<41x128xf32> to vector<32x128xf32>
    %145 = arith.maximumf %143, %144 : vector<32x128xf32>
    %146 = vector.extract_strided_slice %145 {offsets = [0, 0], sizes = [31, 128], strides = [1, 1]} : vector<32x128xf32> to vector<31x128xf32>
    %147 = vector.extract_strided_slice %145 {offsets = [1, 0], sizes = [31, 128], strides = [1, 1]} : vector<32x128xf32> to vector<31x128xf32>
    %148 = arith.maximumf %146, %147 : vector<31x128xf32>
    %c0_127 = arith.constant 0 : index
    %c0_128 = arith.constant 0 : index
    %149 = vector.load %arg5[%c0_127, %c0_128] : memref<4x31xbf16, #tpu.memory_space<vmem>>, vector<4x31xbf16>
    %150 = arith.truncf %148 : vector<31x128xf32> to vector<31x128xbf16>
    %cst_129 = arith.constant dense<0.000000e+00> : vector<4x128xf32>
    %151 = tpu.matmul %149, %150, %cst_129 {dimension_numbers = #tpu.dot_dimension_numbers<[1], [0], [0], [1], [0, 0, 1, 1], [], []>} : vector<4x31xbf16>, vector<31x128xbf16>, vector<4x128xf32> -> vector<4x128xf32>
    %152 = vector.extract_strided_slice %151 {offsets = [0, 0], sizes = [4, 16], strides = [1, 1]} : vector<4x128xf32> to vector<4x16xf32>
    %153 = vector.extract_strided_slice %151 {offsets = [0, 16], sizes = [4, 16], strides = [1, 1]} : vector<4x128xf32> to vector<4x16xf32>
    %154 = arith.maximumf %152, %153 : vector<4x16xf32>
    %155 = vector.extract_strided_slice %151 {offsets = [0, 32], sizes = [4, 16], strides = [1, 1]} : vector<4x128xf32> to vector<4x16xf32>
    %156 = arith.maximumf %154, %155 : vector<4x16xf32>
    %157 = vector.extract_strided_slice %151 {offsets = [0, 48], sizes = [4, 16], strides = [1, 1]} : vector<4x128xf32> to vector<4x16xf32>
    %158 = arith.maximumf %156, %157 : vector<4x16xf32>
    %159 = vector.extract_strided_slice %151 {offsets = [0, 64], sizes = [4, 16], strides = [1, 1]} : vector<4x128xf32> to vector<4x16xf32>
    %160 = arith.maximumf %158, %159 : vector<4x16xf32>
    %161 = vector.extract_strided_slice %151 {offsets = [0, 80], sizes = [4, 16], strides = [1, 1]} : vector<4x128xf32> to vector<4x16xf32>
    %162 = arith.maximumf %160, %161 : vector<4x16xf32>
    %163 = vector.extract_strided_slice %151 {offsets = [0, 96], sizes = [4, 16], strides = [1, 1]} : vector<4x128xf32> to vector<4x16xf32>
    %164 = arith.maximumf %162, %163 : vector<4x16xf32>
    %165 = vector.extract_strided_slice %151 {offsets = [0, 112], sizes = [4, 16], strides = [1, 1]} : vector<4x128xf32> to vector<4x16xf32>
    %166 = arith.maximumf %164, %165 : vector<4x16xf32>
    %167 = arith.truncf %166 : vector<4x16xf32> to vector<4x16xbf16>
    %c0_130 = arith.constant 0 : index
    %c0_131 = arith.constant 0 : index
    %168 = vector.load %arg7[%c0_130, %c0_131] : memref<1x2048xf32, #tpu.memory_space<vmem>>, vector<1x2048xf32>
    %169 = vector.extract_strided_slice %167 {offsets = [0, 0], sizes = [1, 16], strides = [1, 1]} : vector<4x16xbf16> to vector<1x16xbf16>
    %c0_132 = arith.constant 0 : index
    %c0_133 = arith.constant 0 : index
    %c0_134 = arith.constant 0 : index
    %170 = vector.load %arg6[%c0_132, %c0_133, %c0_134] : memref<4x16x2048xbf16, #tpu.memory_space<vmem>>, vector<1x16x2048xbf16>
    %171 = vector.shape_cast %170 : vector<1x16x2048xbf16> to vector<16x2048xbf16>
    %cst_135 = arith.constant dense<0.000000e+00> : vector<1x2048xf32>
    %172 = tpu.matmul %169, %171, %cst_135 {dimension_numbers = #tpu.dot_dimension_numbers<[1], [0], [0], [1], [0, 0, 1, 1], [], []>} : vector<1x16xbf16>, vector<16x2048xbf16>, vector<1x2048xf32> -> vector<1x2048xf32>
    %173 = arith.addf %168, %172 : vector<1x2048xf32>
    %174 = vector.extract_strided_slice %167 {offsets = [1, 0], sizes = [1, 16], strides = [1, 1]} : vector<4x16xbf16> to vector<1x16xbf16>
    %c1_136 = arith.constant 1 : index
    %c0_137 = arith.constant 0 : index
    %c0_138 = arith.constant 0 : index
    %175 = vector.load %arg6[%c1_136, %c0_137, %c0_138] : memref<4x16x2048xbf16, #tpu.memory_space<vmem>>, vector<1x16x2048xbf16>
    %176 = vector.shape_cast %175 : vector<1x16x2048xbf16> to vector<16x2048xbf16>
    %cst_139 = arith.constant dense<0.000000e+00> : vector<1x2048xf32>
    %177 = tpu.matmul %174, %176, %cst_139 {dimension_numbers = #tpu.dot_dimension_numbers<[1], [0], [0], [1], [0, 0, 1, 1], [], []>} : vector<1x16xbf16>, vector<16x2048xbf16>, vector<1x2048xf32> -> vector<1x2048xf32>
    %178 = arith.addf %173, %177 : vector<1x2048xf32>
    %179 = vector.extract_strided_slice %167 {offsets = [2, 0], sizes = [1, 16], strides = [1, 1]} : vector<4x16xbf16> to vector<1x16xbf16>
    %c2_140 = arith.constant 2 : index
    %c0_141 = arith.constant 0 : index
    %c0_142 = arith.constant 0 : index
    %180 = vector.load %arg6[%c2_140, %c0_141, %c0_142] : memref<4x16x2048xbf16, #tpu.memory_space<vmem>>, vector<1x16x2048xbf16>
    %181 = vector.shape_cast %180 : vector<1x16x2048xbf16> to vector<16x2048xbf16>
    %cst_143 = arith.constant dense<0.000000e+00> : vector<1x2048xf32>
    %182 = tpu.matmul %179, %181, %cst_143 {dimension_numbers = #tpu.dot_dimension_numbers<[1], [0], [0], [1], [0, 0, 1, 1], [], []>} : vector<1x16xbf16>, vector<16x2048xbf16>, vector<1x2048xf32> -> vector<1x2048xf32>
    %183 = arith.addf %178, %182 : vector<1x2048xf32>
    %184 = vector.extract_strided_slice %167 {offsets = [3, 0], sizes = [1, 16], strides = [1, 1]} : vector<4x16xbf16> to vector<1x16xbf16>
    %c3_144 = arith.constant 3 : index
    %c0_145 = arith.constant 0 : index
    %c0_146 = arith.constant 0 : index
    %185 = vector.load %arg6[%c3_144, %c0_145, %c0_146] : memref<4x16x2048xbf16, #tpu.memory_space<vmem>>, vector<1x16x2048xbf16>
    %186 = vector.shape_cast %185 : vector<1x16x2048xbf16> to vector<16x2048xbf16>
    %cst_147 = arith.constant dense<0.000000e+00> : vector<1x2048xf32>
    %187 = tpu.matmul %184, %186, %cst_147 {dimension_numbers = #tpu.dot_dimension_numbers<[1], [0], [0], [1], [0, 0, 1, 1], [], []>} : vector<1x16xbf16>, vector<16x2048xbf16>, vector<1x2048xf32> -> vector<1x2048xf32>
    %188 = arith.addf %183, %187 : vector<1x2048xf32>
    %c0_148 = arith.constant 0 : index
    %c0_149 = arith.constant 0 : index
    %c0_150 = arith.constant 0 : index
    %189 = vector.load %arg8[%c0_148, %c0_149, %c0_150] : memref<1x1x2048xf32, #tpu.memory_space<vmem>>, vector<1x1x2048xf32>
    %190 = vector.shape_cast %189 : vector<1x1x2048xf32> to vector<1x2048xf32>
    %191 = vector.shape_cast %188 : vector<1x2048xf32> to vector<1x1x2048xf32>
    tpu.vector_store %arg8[%c0_148, %c0_149, %c0_150], %191 {strides = array<i32>} : memref<1x1x2048xf32, #tpu.memory_space<vmem>>, vector<1x1x2048xf32>,
    return
  }
  func.func @transform_0(%arg0: i32) -> (i32, i32, i32) {
    %c0_i32 = arith.constant 0 : i32
    %c0_i32_0 = arith.constant 0 : i32
    %c0_i32_1 = arith.constant 0 : i32
    return %arg0, %c0_i32, %c0_i32_0 : i32, i32, i32
  }
  func.func @transform_1(%arg0: i32) -> (i32, i32) {
    %c0_i32 = arith.constant 0 : i32
    %c0_i32_0 = arith.constant 0 : i32
    %c0_i32_1 = arith.constant 0 : i32
    return %c0_i32, %c0_i32_0 : i32, i32
  }
  func.func @transform_2(%arg0: i32) -> (i32, i32) {
    %c0_i32 = arith.constant 0 : i32
    %c0_i32_0 = arith.constant 0 : i32
    %c0_i32_1 = arith.constant 0 : i32
    return %c0_i32, %c0_i32_0 : i32, i32
  }
  func.func @transform_3(%arg0: i32) -> (i32, i32, i32) {
    %c0_i32 = arith.constant 0 : i32
    %c0_i32_0 = arith.constant 0 : i32
    %c0_i32_1 = arith.constant 0 : i32
    %c0_i32_2 = arith.constant 0 : i32
    return %c0_i32, %c0_i32_0, %c0_i32_1 : i32, i32, i32
  }
  func.func @transform_4(%arg0: i32) -> (i32, i32) {
    %c0_i32 = arith.constant 0 : i32
    %c0_i32_0 = arith.constant 0 : i32
    %c0_i32_1 = arith.constant 0 : i32
    return %c0_i32, %c0_i32_0 : i32, i32
  }
  func.func @transform_5(%arg0: i32) -> (i32, i32, i32) {
    %c0_i32 = arith.constant 0 : i32
    %c0_i32_0 = arith.constant 0 : i32
    %c0_i32_1 = arith.constant 0 : i32
    %c0_i32_2 = arith.constant 0 : i32
    return %c0_i32, %c0_i32_0, %c0_i32_1 : i32, i32, i32
  }
  func.func @transform_6(%arg0: i32) -> (i32, i32) {
    %c0_i32 = arith.constant 0 : i32
    %c0_i32_0 = arith.constant 0 : i32
    %c0_i32_1 = arith.constant 0 : i32
    return %c0_i32, %c0_i32_0 : i32, i32
  }
  func.func @transform_7(%arg0: i32) -> (i32, i32, i32) {
    %c0_i32 = arith.constant 0 : i32
    %c0_i32_0 = arith.constant 0 : i32
    %c0_i32_1 = arith.constant 0 : i32
    return %arg0, %c0_i32, %c0_i32_0 : i32, i32, i32
  }
}

</mosaic_0001>

<bundles_post_ra>
// kernel: _lambda_.1
= control target key start
LH: loop header
LB: loop body
LE: loop exit
PB: predicated region body
PF: predicated region fallthrough
CT: control target
= control target key end

     0   :  { %12 = vsyncpa [#allocation4], 0  ;;  %s9838_s24 = smov 0   ;;  %s11634_s0 = inlined_call_operand.vmem [shape: bf16[2,196,25], index: 0, kind: input, shape index: {}]   ;;  %s11635_s1 = inlined_call_operand.vmem [shape: bf16[25,128], index: 1, kind: input, shape index: {}]   ;;  %s11636_s2 = inlined_call_operand.vmem [shape: bf16[81,181], index: 2, kind: input, shape index: {}]   ;;  %s11637_s3 = inlined_call_operand.vmem [shape: bf16[25,128,128], index: 3, kind: input, shape index: {}]   ;;  %s11638_s4 = inlined_call_operand.vmem [shape: bf16[4,31], index: 4, kind: input, shape index: {}]   ;;  %s11639_s5 = inlined_call_operand.hbm [shape: bf16[4,16,2048], index: 5, kind: input, shape index: {}]   ;;  %s11640_s6 = inlined_call_operand.vmem [shape: f32[1,2048], index: 6, kind: input, shape index: {}]   ;;  %s11641_s7 = inlined_call_operand.vmem [shape: f32[2,1,2048], index: 7, kind: output, shape index: {}]  }
   0x1 LB: > { %s9844_s25 = sadd.s32 4294967295, %s9781_s24   ;;  %p7260_p0 = scmp.ge.s32.totalorder %s9781_s24, 1  ;;  %s9781_s24 = sphi %s9838_s24, %s18_s24  }
   0x2   : > { %p201_p1 = scmp.lt.s32.totalorder %s9781_s24, 3  ;;  %s9783_s26 = smov [#allocation3]  }
   0x3   : > { %s225_s27 = sshll.u32 %s9783_s26, 4  ;;  %p11642_p3 = scmp.eq.s32.totalorder %s9844_s25, 0  ;;  %s226_s27 = int_to_ptr.vmem [resolvable:$true] %s225_s27 }
   0x4   : > { %p9848_p2 = pnand %p7260_p0, %p201_p1  ;;  %s9743_s9 = scalar_lea.hbm %s11639_s5, 8192 }
   0x5   : > { %p9744_p6 = scmp.ne.s32.totalorder %s11639_s5, %s9743_s9  ;;  %p9750_p10 = scmp.lt.u32.totalorder %s9743_s9, %s11639_s5 }
   0x6   : > { %s11658_s28 = scalar_select %p9848_p2, 1, 0 }
   0x7   : > { %p9441_p4 = pneg %p9848_p2 }
   0x9   : > { %p9857_p5 = pnand %p11642_p3, %p9441_p4 }
   0xb   : > { %p9745_p7 = pneg %p9857_p5 }
   0xd   : > { %p9746_p8 = pnand %p9745_p7, %p9744_p6 }
   0xf   : > { %p9747_p9 = pneg %p9746_p8 }
  0x11   : > { %p9752_p11 = pnand %p9750_p10, %p9747_p9 }
  0x13   : > { %9755 = shalt.err (!%p9752_p11)
}
  0x14   : > { %s9756_s14 = scalar_lea.vmem %s226_s27, 8192  ;;  %p9764_p1 = scmp.lt.s32.totalorder %s226_s27, %s226_s27 }
  0x15   : > { %p9757_p12 = scmp.ne.s32.totalorder %s226_s27, %s9756_s14  ;;  %p9765_p4 = scmp.lt.s32.totalorder %s9756_s14, %s9756_s14 }
  0x17   : > { %p9759_p13 = pnand %p9757_p12, %p9745_p7  ;;  %p9766_p3 = por %p9765_p4, %p9764_p1 }
  0x19   : > { %p9760_p0 = pneg %p9759_p13 }
  0x1b   : > { %p9767_p2 = pnand %p9766_p3, %p9760_p0 }
  0x1d   : > { %9770 = shalt.err (!%p9767_p2)
}
  0x1e   : > { %s9784_s15 = smov 1024   ;;  %s9785_s16 = smov 64  }
  0x1f   : > { %9444 = dma.hbm_to_vmem [thread:$0]  (!%p9857_p5), %s11639_s5, 8192, %s226_s27, [#allocation4], %s9784_s15, %s9784_s15, %s9785_s16  }
  0x20   : > { %p11660_p6 = scmp.ne.s32.totalorder %s11658_s28, 0 }
  0x22   : > { %252 = sbr.rel (%p11660_p6) target bundleno = 2264 (0x8d8), region = 48 }
  0x29   : > { %p11661_p8 = scmp.eq.s32.totalorder %s9844_s25, 0 }
  0x2b   : > { %9776 = dma.done.wait (%p11661_p8), [#allocation4], 8192   ;;  %p11662_p7 = pmov %p11661_p8 }
  0x2c   : > { %v9786_v0 = vmov 0.0   ;;  %vm436_vm0 = vcmask 1043456   ;;  %p283_p2 = scmp.lt.s32.totalorder %s9844_s25, 1  ;;  %vm9787_vm1 = vmmov 0   ;;  %vm437_vm2 = vcmask 1044480   ;;  %v9470_v3 = vld [vmem:[%s11635_s1] sm:$0xff]  }
  0x2d   : > { %9778 = vsyncadd (%p11662_p7), [#allocation4], 4294959104  ;;  %8376 = vmatprep.subr.bf16.mxu0 %v9786_v0  ;;  %8600 = vmatprep.subr.bf16.mxu1 %v9786_v0  ;;  %v11646_v1 = vmov 65535   ;;  %v9471_v5 = vld [vmem:[%s11635_s1 + $0x8] sm:$0x1f]   ;;  %vm396_vm3 = vcmask 203776  }
  0x2e   : > { %8380 = vmatprep.mubr.msk.bf16.mxu0 %vm9787_vm1, %v9786_v0  ;;  %8616 = vmatprep.mubr.msk.bf16.mxu1 %vm9787_vm1, %v9786_v0  ;;  %s11678_s25 = smov (!%p283_p2, %s9844_s25), 1  ;;  %v438_v2 = vsel %vm436_vm0, 4294967295, %v11646_v1  ;;  %v11644_v20 = vmov 0   ;;  %v9487_v21 = vld [vmem:[%s11636_s2 + $0x4] ss:$8 sps:$4 sm:$0xff]   ;;  %vm911_vm4 = vcmask 433152  }
  0x2f   : > { %s9436_s19 = smul.u32 100, %s11678_s25  ;;  %v439_v4 = vsel %vm437_vm2, %v438_v2, 0  ;;  %8377 = vmatpush3.bf16.msra.mxu0 %v9470_v3  ;;  %vm628_vm5 = vcmask 1041408   ;;  %vm745_vm6 = vcmask 1046528   ;;  %v9502_v55 = vld [vmem:[%s11637_s3 + $0x180] sm:$0xff]   ;;  %vm930_vm7 = vcmask 1042432  }
  0x30   : > { %8378 = vmatprep.subr.bf16.mxu0 %v9786_v0  ;;  %v441_v6 = vand.u32 %v9471_v5, %v439_v4  ;;  %8601 = vmatpush3.bf16.msra.mxu1 %v9502_v55  ;;  %vm1131_vm8 = vsmask.f32 7424  ;;  %vm1694_vm9 = vcmask 1045504   ;;  %vm1533_vm10 = vsmask.f32 6400  ;;  %s9790_s10 = smov 112  }
  0x31   : > { %s9905_s28 = scalar_lea.vmem %s11634_s0, %s9436_s19  ;;  %8602 = vmatprep.subr.bf16.mxu1 %v9786_v0  ;;  %vm2446_vm11 = vsmask.f32 5376  ;;  %vm3972_vm12 = vsmask.f32 4352  ;;  %vm1071_vm13 = vcmask 1040384   ;;  %vm4924_vm0 = vcmask 1047552  }
  0x32   : > { %v9472_v7 = vld [vmem:[%s9905_s28] sm:$0xff]   ;;  %v9473_v8 = vld [vmem:[%s9905_s28 + $0x8] sm:$0xff]   ;;  %v9474_v9 = vld [vmem:[%s9905_s28 + $0x10] sm:$0xff]   ;;  %vm1072_vm14 = vsmask.f32 256  ;;  %s9791_s11 = smov 80  }
  0x33   : > { %8379 = vmatpush3.bf16.msra.mxu0 %v441_v6  ;;  %v9475_v10 = vld [vmem:[%s9905_s28 + $0x18] sm:$0xff]   ;;  %v9476_v11 = vld [vmem:[%s9905_s28 + $0x20] sm:$0xff]   ;;  %v9477_v12 = vld [vmem:[%s9905_s28 + $0x28] sm:$0xff]   ;;  %s9792_s12 = smov 96   ;;  %s9793_s13 = smov 64  }
  0x34   : > { %v9478_v13 = vld [vmem:[%s9905_s28 + $0x30] sm:$0xff]   ;;  %v9479_v14 = vld [vmem:[%s9905_s28 + $0x38] sm:$0xff]   ;;  %v9480_v15 = vld [vmem:[%s9905_s28 + $0x40] sm:$0xff]   ;;  %936 = vmatprep.subr.bf16.mxu0 %v11644_v20  ;;  %s9794_s14 = smov 48   ;;  %s9795_s15 = smov 32  }
  0x35   : > { %v9481_v16 = vld [vmem:[%s9905_s28 + $0x48] sm:$0xff]   ;;  %v9482_v17 = vld [vmem:[%s9905_s28 + $0x50] sm:$0xff]   ;;  %v9483_v18 = vld [vmem:[%s9905_s28 + $0x58] sm:$0xff]   ;;  %s9796_s16 = smov 16   ;;  %s7266_s21 = sshll.u32 %s11678_s25, 4 }
  0x36   : > { %8381 = vmatmul.mubr.msk.bf16.vlgmr.msra.gmra.mrb[0].mxu0 %vm396_vm3, %v9472_v7  ;;  %v9484_v19 = vld [vmem:[%s9905_s28 + $0x60] ss:$0 sps:$4 sm:$0x33]   ;;  %vm1073_vm15 = vmand %vm1071_vm13, %vm1072_vm14  ;;  %s291_s26 = scalar_lea.vmem %s11641_s7, %s7266_s21 }
  0x37   : > { %8384 = vmatprep.mubr.msk.bf16.mxu0 %vm9787_vm1, %v9786_v0 }
  0x3e   : > { %8385 = vmatmul.mubr.msk.bf16.gmra.mrb[4].mxu0 %vm396_vm3, %v9473_v8 }
  0x3f   : > { %8388 = vmatprep.mubr.msk.bf16.mxu0 %vm9787_vm1, %v9786_v0 }
  0x46   : > { %8389 = vmatmul.mubr.msk.bf16.gmra.mrb[8].mxu0 %vm396_vm3, %v9474_v9 }
  0x47   : > { %8392 = vmatprep.mubr.msk.bf16.mxu0 %vm9787_vm1, %v9786_v0 }
  0x4e   : > { %8393 = vmatmul.mubr.msk.bf16.gmra.mrb[12].mxu0 %vm396_vm3, %v9475_v10 }
  0x4f   : > { %8396 = vmatprep.mubr.msk.bf16.mxu0 %vm9787_vm1, %v9786_v0 }
  0x56   : > { %8397 = vmatmul.mubr.msk.bf16.gmra.mrb[16].mxu0 %vm396_vm3, %v9476_v11 }
  0x57   : > { %8400 = vmatprep.mubr.msk.bf16.mxu0 %vm9787_vm1, %v9786_v0 }
  0x5e   : > { %8401 = vmatmul.mubr.msk.bf16.gmra.mrb[20].mxu0 %vm396_vm3, %v9477_v12 }
  0x5f   : > { %8404 = vmatprep.mubr.msk.bf16.mxu0 %vm9787_vm1, %v9786_v0 }
  0x66   : > { %8405 = vmatmul.mubr.msk.bf16.gmra.mrb[24].mxu0 %vm396_vm3, %v9478_v13 }
  0x67   : > { %8408 = vmatprep.mubr.msk.bf16.mxu0 %vm9787_vm1, %v9786_v0 }
  0x6e   : > { %8409 = vmatmul.mubr.msk.bf16.gmra.mrb[28].mxu0 %vm396_vm3, %v9479_v14 }
  0x6f   : > { %8412 = vmatprep.mubr.msk.bf16.mxu0 %vm9787_vm1, %v9786_v0 }
  0x76   : > { %8413 = vmatmul.mubr.msk.bf16.gmra.mrb[32].mxu0 %vm396_vm3, %v9480_v15 }
  0x77   : > { %8416 = vmatprep.mubr.msk.bf16.mxu0 %vm9787_vm1, %v9786_v0 }
  0x7e   : > { %8417 = vmatmul.mubr.msk.bf16.gmra.mrb[36].mxu0 %vm396_vm3, %v9481_v16 }
  0x7f   : > { %8420 = vmatprep.mubr.msk.bf16.mxu0 %vm9787_vm1, %v9786_v0 }
  0x86   : > { %8421 = vmatmul.mubr.msk.bf16.gmra.mrb[40].mxu0 %vm396_vm3, %v9482_v17 }
  0x87   : > { %8424 = vmatprep.mubr.msk.bf16.mxu0 %vm9787_vm1, %v9786_v0 }
  0x8e   : > { %8425 = vmatmul.mubr.msk.bf16.gmra.mrb[44].mxu0 %vm396_vm3, %v9483_v18 }
  0x8f   : > { %8428 = vmatprep.mubr.msk.bf16.mxu0 %vm9787_vm1, %v9786_v0 }
  0x96   : > { %8429 = vmatmul.mubr.msk.bf16.gmra.mrb[48].mxu0 %vm396_vm3, %v9484_v19 }
  0x97   : > { %7307 = vmatprep.mubr.msk.bf16.mxu0 %vm911_vm4, %v9487_v21 }
 0x109   : > { %v477_v22 = vpop.f32.mrb[0].mxu0 }
 0x10a   : > { %v8382_v23 = vpop.f32.mrb[1].mxu0  ;;  %v579_v35 = vmax.f32 %v477_v22, 0.0 }
 0x10b   : > { %v480_v24 = vpop.f32.mrb[2].mxu0 }
 0x10c   : > { %v8383_v25 = vpop.f32.mrb[3].mxu0  ;;  %v580_v26 = vmax.f32 %v480_v24, 0.0 }
 0x10e   : > { %v629_v31 = vrot.slane %v580_v26, 6 }
 0x111   : > { %v485_v27 = vpop.f32.mrb[4].mxu0 }
 0x112   : > { %v581_v28 = vmax.f32 %v485_v27, 0.0  ;;  %v8386_v29 = vpop.f32.mrb[5].mxu0 }
 0x113   : > { %v488_v30 = vpop.f32.mrb[6].mxu0 }
 0x114   : > { %v630_v32 = vrot.slane %v581_v28, 6  ;;  %v582_v33 = vmax.f32 %v488_v30, 0.0  ;;  %v8387_v34 = vpop.f32.mrb[7].mxu0 }
 0x116   : > { %v631_v36 = vsel %vm628_vm5, %v629_v31, %v630_v32  ;;  %v632_v37 = vrot.slane %v582_v33, 6 }
 0x117   : > { %v699_v38 = vmax.f32 %v579_v35, %v631_v36 }
 0x118   : > { %v633_v39 = vsel %vm628_vm5, %v630_v32, %v632_v37 }
 0x119   : > { %v700_v40 = vmax.f32 %v580_v26, %v633_v39  ;;  %v493_v41 = vpop.f32.mrb[8].mxu0  ;;  %v746_v44 = vrot.slane %v699_v38, 1 }
 0x11a   : > { %v583_v42 = vmax.f32 %v493_v41, 0.0  ;;  %v8390_v43 = vpop.f32.mrb[9].mxu0 }
 0x11b   : > { %v747_v45 = vrot.slane %v700_v40, 1  ;;  %v496_v46 = vpop.f32.mrb[10].mxu0 }
 0x11c   : > { %v634_v47 = vrot.slane %v583_v42, 6  ;;  %v584_v48 = vmax.f32 %v496_v46, 0.0  ;;  %v8391_v49 = vpop.f32.mrb[11].mxu0 }
 0x11d   : > { %v748_v50 = vsel %vm745_vm6, %v746_v44, %v747_v45 }
 0x11e   : > { %v635_v51 = vsel %vm628_vm5, %v632_v37, %v634_v47  ;;  %v636_v52 = vrot.slane %v584_v48, 6  ;;  %v814_v53 = vmax.f32 %v699_v38, %v748_v50 }
 0x11f   : > { %v701_v54 = vmax.f32 %v581_v28, %v635_v51 }
 0x120   : > { %v637_v56 = vsel %vm628_vm5, %v634_v47, %v636_v52 }
 0x121   : > { %v749_v57 = vrot.slane %v701_v54, 1  ;;  %v702_v58 = vmax.f32 %v582_v33, %v637_v56  ;;  %v501_v59 = vpop.f32.mrb[12].mxu0 }
 0x122   : > { %v585_v60 = vmax.f32 %v501_v59, 0.0  ;;  %v8394_v61 = vpop.f32.mrb[13].mxu0 }
 0x123   : > { %v751_v62 = vrot.slane %v702_v58, 1  ;;  %v504_v63 = vpop.f32.mrb[14].mxu0  ;;  %v750_v2 = vsel %vm745_vm6, %v747_v45, %v749_v57 }
 0x124   : > { %v638_v3 = vrot.slane %v585_v60, 6  ;;  %v586_v4 = vmax.f32 %v504_v63, 0.0  ;;  %v8395_v5 = vpop.f32.mrb[15].mxu0  ;;  %v815_v6 = vmax.f32 %v700_v40, %v750_v2 }
 0x125   : > { %v752_v7 = vsel %vm745_vm6, %v749_v57, %v751_v62 }
 0x126   : > { %v639_v8 = vsel %vm628_vm5, %v636_v52, %v638_v3  ;;  %v640_v9 = vrot.slane %v586_v4, 6  ;;  %v848_v10 = vpack.c.bf16 %v815_v6, %v814_v53  ;;  %v816_v11 = vmax.f32 %v701_v54, %v752_v7 }
 0x127   : > { %v703_v12 = vmax.f32 %v583_v42, %v639_v8 }
 0x128   : > { %v641_v13 = vsel %vm628_vm5, %v638_v3, %v640_v9  ;;  %937 = vmatpush1.bf16.msra.mxu0 %v848_v10 }
 0x129   : > { %v753_v14 = vrot.slane %v703_v12, 1  ;;  %v704_v15 = vmax.f32 %v584_v48, %v641_v13  ;;  %v509_v16 = vpop.f32.mrb[16].mxu0  ;;  %938 = vmatprep.subr.bf16.mxu0 %v11644_v20 }
 0x12a   : > { %v587_v17 = vmax.f32 %v509_v16, 0.0  ;;  %v8398_v18 = vpop.f32.mrb[17].mxu0 }
 0x12b   : > { %v755_v19 = vrot.slane %v704_v15, 1  ;;  %v512_v21 = vpop.f32.mrb[18].mxu0  ;;  %v754_v22 = vsel %vm745_vm6, %v751_v62, %v753_v14 }
 0x12c   : > { %v642_v23 = vrot.slane %v587_v17, 6  ;;  %v588_v24 = vmax.f32 %v512_v21, 0.0  ;;  %v8399_v25 = vpop.f32.mrb[19].mxu0  ;;  %v817_v26 = vmax.f32 %v702_v58, %v754_v22 }
 0x12d   : > { %v756_v27 = vsel %vm745_vm6, %v753_v14, %v755_v19 }
 0x12e   : > { %v643_v28 = vsel %vm628_vm5, %v640_v9, %v642_v23  ;;  %v644_v29 = vrot.slane %v588_v24, 6  ;;  %v849_v30 = vpack.c.bf16 %v817_v26, %v816_v11  ;;  %v818_v31 = vmax.f32 %v703_v12, %v756_v27 }
 0x12f   : > { %v705_v32 = vmax.f32 %v585_v60, %v643_v28 }
 0x130   : > { %v645_v33 = vsel %vm628_vm5, %v642_v23, %v644_v29  ;;  %939 = vmatpush1.bf16.msra.mxu0 %v849_v30 }
 0x131   : > { %v757_v34 = vrot.slane %v705_v32, 1  ;;  %v706_v35 = vmax.f32 %v586_v4, %v645_v33  ;;  %v517_v36 = vpop.f32.mrb[20].mxu0  ;;  %940 = vmatprep.subr.bf16.mxu0 %v11644_v20 }
 0x132   : > { %v589_v37 = vmax.f32 %v517_v36, 0.0  ;;  %v8402_v38 = vpop.f32.mrb[21].mxu0 }
 0x133   : > { %v759_v39 = vrot.slane %v706_v35, 1  ;;  %v520_v40 = vpop.f32.mrb[22].mxu0  ;;  %v758_v41 = vsel %vm745_vm6, %v755_v19, %v757_v34 }
 0x134   : > { %v646_v42 = vrot.slane %v589_v37, 6  ;;  %v590_v43 = vmax.f32 %v520_v40, 0.0  ;;  %v8403_v44 = vpop.f32.mrb[23].mxu0  ;;  %v819_v45 = vmax.f32 %v704_v15, %v758_v41 }
 0x135   : > { %v760_v46 = vsel %vm745_vm6, %v757_v34, %v759_v39 }
 0x136   : > { %v647_v47 = vsel %vm628_vm5, %v644_v29, %v646_v42  ;;  %v648_v48 = vrot.slane %v590_v43, 6  ;;  %v850_v49 = vpack.c.bf16 %v819_v45, %v818_v31  ;;  %v820_v50 = vmax.f32 %v705_v32, %v760_v46 }
 0x137   : > { %v707_v51 = vmax.f32 %v587_v17, %v647_v47 }
 0x138   : > { %v649_v52 = vsel %vm628_vm5, %v646_v42, %v648_v48  ;;  %941 = vmatpush1.bf16.msra.mxu0 %v850_v49 }
 0x139   : > { %v761_v53 = vrot.slane %v707_v51, 1  ;;  %v708_v54 = vmax.f32 %v588_v24, %v649_v52  ;;  %v525_v55 = vpop.f32.mrb[24].mxu0  ;;  %942 = vmatprep.subr.bf16.mxu0 %v11644_v20 }
 0x13a   : > { %v591_v56 = vmax.f32 %v525_v55, 0.0  ;;  %v8406_v57 = vpop.f32.mrb[25].mxu0 }
 0x13b   : > { %v763_v58 = vrot.slane %v708_v54, 1  ;;  %v528_v59 = vpop.f32.mrb[26].mxu0  ;;  %v762_v60 = vsel %vm745_vm6, %v759_v39, %v761_v53 }
 0x13c   : > { %v650_v61 = vrot.slane %v591_v56, 6  ;;  %v592_v62 = vmax.f32 %v528_v59, 0.0  ;;  %v8407_v63 = vpop.f32.mrb[27].mxu0  ;;  %v821_v2 = vmax.f32 %v706_v35, %v762_v60 }
 0x13d   : > { %v764_v3 = vsel %vm745_vm6, %v761_v53, %v763_v58 }
 0x13e   : > { %v651_v4 = vsel %vm628_vm5, %v648_v48, %v650_v61  ;;  %v652_v5 = vrot.slane %v592_v62, 6  ;;  %v851_v6 = vpack.c.bf16 %v821_v2, %v820_v50  ;;  %v822_v7 = vmax.f32 %v707_v51, %v764_v3 }
 0x13f   : > { %v709_v8 = vmax.f32 %v589_v37, %v651_v4 }
 0x140   : > { %v653_v9 = vsel %vm628_vm5, %v650_v61, %v652_v5  ;;  %943 = vmatpush1.bf16.msra.mxu0 %v851_v6 }
 0x141   : > { %v765_v10 = vrot.slane %v709_v8, 1  ;;  %v710_v11 = vmax.f32 %v590_v43, %v653_v9  ;;  %v533_v12 = vpop.f32.mrb[28].mxu0  ;;  %944 = vmatprep.subr.bf16.mxu0 %v11644_v20 }
 0x142   : > { %v593_v13 = vmax.f32 %v533_v12, 0.0  ;;  %v8410_v14 = vpop.f32.mrb[29].mxu0 }
 0x143   : > { %v767_v15 = vrot.slane %v710_v11, 1  ;;  %v536_v16 = vpop.f32.mrb[30].mxu0  ;;  %v766_v17 = vsel %vm745_vm6, %v763_v58, %v765_v10 }
 0x144   : > { %v654_v18 = vrot.slane %v593_v13, 6  ;;  %v594_v19 = vmax.f32 %v536_v16, 0.0  ;;  %v8411_v21 = vpop.f32.mrb[31].mxu0  ;;  %v823_v22 = vmax.f32 %v708_v54, %v766_v17 }
 0x145   : > { %v768_v23 = vsel %vm745_vm6, %v765_v10, %v767_v15 }
 0x146   : > { %v655_v24 = vsel %vm628_vm5, %v652_v5, %v654_v18  ;;  %v656_v25 = vrot.slane %v594_v19, 6  ;;  %v852_v26 = vpack.c.bf16 %v823_v22, %v822_v7  ;;  %v824_v27 = vmax.f32 %v709_v8, %v768_v23 }
 0x147   : > { %v711_v28 = vmax.f32 %v591_v56, %v655_v24 }
 0x148   : > { %v657_v29 = vsel %vm628_vm5, %v654_v18, %v656_v25  ;;  %945 = vmatpush1.bf16.msra.mxu0 %v852_v26 }
 0x149   : > { %v769_v30 = vrot.slane %v711_v28, 1  ;;  %v712_v31 = vmax.f32 %v592_v62, %v657_v29  ;;  %v541_v32 = vpop.f32.mrb[32].mxu0  ;;  %946 = vmatprep.subr.bf16.mxu0 %v11644_v20 }
 0x14a   : > { %v595_v33 = vmax.f32 %v541_v32, 0.0  ;;  %v8414_v34 = vpop.f32.mrb[33].mxu0 }
 0x14b   : > { %v771_v35 = vrot.slane %v712_v31, 1  ;;  %v544_v36 = vpop.f32.mrb[34].mxu0  ;;  %v770_v37 = vsel %vm745_vm6, %v767_v15, %v769_v30 }
 0x14c   : > { %v658_v38 = vrot.slane %v595_v33, 6  ;;  %v596_v39 = vmax.f32 %v544_v36, 0.0  ;;  %v8415_v40 = vpop.f32.mrb[35].mxu0  ;;  %v825_v41 = vmax.f32 %v710_v11, %v770_v37 }
 0x14d   : > { %v772_v42 = vsel %vm745_vm6, %v769_v30, %v771_v35 }
 0x14e   : > { %v659_v43 = vsel %vm628_vm5, %v656_v25, %v658_v38  ;;  %v660_v44 = vrot.slane %v596_v39, 6  ;;  %v853_v45 = vpack.c.bf16 %v825_v41, %v824_v27  ;;  %v826_v46 = vmax.f32 %v711_v28, %v772_v42 }
 0x14f   : > { %v713_v47 = vmax.f32 %v593_v13, %v659_v43 }
 0x150   : > { %v661_v48 = vsel %vm628_vm5, %v658_v38, %v660_v44  ;;  %947 = vmatpush1.bf16.msra.mxu0 %v853_v45 }
 0x151   : > { %v773_v49 = vrot.slane %v713_v47, 1  ;;  %v714_v50 = vmax.f32 %v594_v19, %v661_v48  ;;  %v549_v51 = vpop.f32.mrb[36].mxu0  ;;  %948 = vmatprep.subr.bf16.mxu0 %v11644_v20 }
 0x152   : > { %v597_v52 = vmax.f32 %v549_v51, 0.0  ;;  %v8418_v53 = vpop.f32.mrb[37].mxu0 }
 0x153   : > { %v775_v54 = vrot.slane %v714_v50, 1  ;;  %v552_v55 = vpop.f32.mrb[38].mxu0  ;;  %v774_v56 = vsel %vm745_vm6, %v771_v35, %v773_v49 }
 0x154   : > { %v662_v57 = vrot.slane %v597_v52, 6  ;;  %v598_v58 = vmax.f32 %v552_v55, 0.0  ;;  %v8419_v59 = vpop.f32.mrb[39].mxu0  ;;  %v827_v60 = vmax.f32 %v712_v31, %v774_v56 }
 0x155   : > { %v776_v61 = vsel %vm745_vm6, %v773_v49, %v775_v54 }
 0x156   : > { %v663_v62 = vsel %vm628_vm5, %v660_v44, %v662_v57  ;;  %v664_v63 = vrot.slane %v598_v58, 6  ;;  %v854_v2 = vpack.c.bf16 %v827_v60, %v826_v46  ;;  %v828_v3 = vmax.f32 %v713_v47, %v776_v61 }
 0x157   : > { %v715_v4 = vmax.f32 %v595_v33, %v663_v62 }
 0x158   : > { %v665_v5 = vsel %vm628_vm5, %v662_v57, %v664_v63  ;;  %949 = vmatpush1.bf16.msra.mxu0 %v854_v2 }
 0x159   : > { %v777_v6 = vrot.slane %v715_v4, 1  ;;  %v716_v7 = vmax.f32 %v596_v39, %v665_v5  ;;  %v557_v8 = vpop.f32.mrb[40].mxu0  ;;  %950 = vmatprep.subr.bf16.mxu0 %v11644_v20 }
 0x15a   : > { %v599_v9 = vmax.f32 %v557_v8, 0.0  ;;  %v8422_v10 = vpop.f32.mrb[41].mxu0  ;;  %v9485_v8 = vld [vmem:[%s11636_s2] ss:$8 sps:$4 sm:$0xff]  }
 0x15b   : > { %v779_v11 = vrot.slane %v716_v7, 1  ;;  %v560_v12 = vpop.f32.mrb[42].mxu0  ;;  %v778_v13 = vsel %vm745_vm6, %v775_v54, %v777_v6  ;;  %v9500_v10 = vld [vmem:[%s11637_s3 + $0x40] sm:$0xff]  }
 0x15c   : > { %v666_v14 = vrot.slane %v599_v9, 6  ;;  %v600_v15 = vmax.f32 %v560_v12, 0.0  ;;  %v8423_v16 = vpop.f32.mrb[43].mxu0  ;;  %v829_v17 = vmax.f32 %v714_v50, %v778_v13  ;;  %v9490_v12 = vld [vmem:[%s11636_s2 + $0x10] ss:$8 sps:$4 sm:$0xff]  }
 0x15d   : > { %v780_v18 = vsel %vm745_vm6, %v777_v6, %v779_v11  ;;  %v9491_v13 = vld [vmem:[%s11636_s2 + $0x24] ss:$8 sps:$4 sm:$0xff]   ;;  %v9496_v16 = vld [vmem:[%s11636_s2 + $0x30] ss:$8 sps:$4 sm:$0xff]  }
 0x15e   : > { %v667_v19 = vsel %vm628_vm5, %v664_v63, %v666_v14  ;;  %v668_v21 = vrot.slane %v600_v15, 6  ;;  %v855_v22 = vpack.c.bf16 %v829_v17, %v828_v3  ;;  %v830_v23 = vmax.f32 %v715_v4, %v780_v18  ;;  %v9497_v17 = vld [vmem:[%s11636_s2 + $0x44] ss:$8 sps:$4 sm:$0xff]   ;;  %v9499_v18 = vld [vmem:[%s11636_s2 + $0x40] ss:$8 sps:$4 sm:$0xff]  }
 0x15f   : > { %v717_v24 = vmax.f32 %v597_v52, %v667_v19  ;;  %v931_v3 = vsel %vm628_vm5, 4294967295, %v11646_v1  ;;  %v9503_v19 = vld [vmem:[%s11637_s3 + $0x50] sm:$0xff]  }
 0x160   : > { %v669_v25 = vsel %vm628_vm5, %v666_v14, %v668_v21  ;;  %951 = vmatpush1.bf16.msra.mxu0 %v855_v22  ;;  %v932_v6 = vsel %vm930_vm7, %v931_v3, 0  ;;  %v9493_v14 = vld [vmem:[%s11636_s2 + $0x20] ss:$8 sps:$4 sm:$0xff]   ;;  %v9505_v22 = vld [vmem:[%s11637_s3 + $0x58] sm:$0xff]  }
 0x161   : > { %v781_v26 = vrot.slane %v717_v24, 1  ;;  %v718_v27 = vmax.f32 %v598_v58, %v669_v25  ;;  %v565_v28 = vpop.f32.mrb[44].mxu0  ;;  %952 = vmatprep.subr.bf16.mxu0 %v11644_v20  ;;  %v9508_v25 = vld [vmem:[%s11637_s3 + $0x198] sm:$0xff]  }
 0x162   : > { %v601_v29 = vmax.f32 %v565_v28, 0.0  ;;  %v8426_v30 = vpop.f32.mrb[45].mxu0  ;;  %v847_v28 = vld [vmem:[%s11636_s2 + $0x50] sm:$0x11] }
 0x163   : > { %v783_v31 = vrot.slane %v718_v27, 1  ;;  %v568_v32 = vpop.f32.mrb[46].mxu0  ;;  %v782_v33 = vsel %vm745_vm6, %v779_v11, %v781_v26  ;;  %v9501_v11 = vld [vmem:[%s11637_s3 + $0x48] sm:$0xff]   ;;  %v7305_v30 = vcombine.low %v847_v28, %v847_v28 }
 0x164   : > { %v670_v34 = vrot.slane %v601_v29, 6  ;;  %v602_v35 = vmax.f32 %v568_v32, 0.0  ;;  %v8427_v36 = vpop.f32.mrb[47].mxu0  ;;  %v831_v37 = vmax.f32 %v716_v7, %v782_v33  ;;  %v9514_v32 = vld [vmem:[%s11637_s3 + $0x1a8] sm:$0xff]   ;;  %v9515_v33 = vld [vmem:[%s11637_s3 + $0x78] sm:$0xff]  }
 0x165   : > { %v784_v38 = vsel %vm745_vm6, %v781_v26, %v783_v31  ;;  %v9509_v26 = vld [vmem:[%s11637_s3 + $0x68] sm:$0xff]  }
 0x166   : > { %v671_v39 = vsel %vm628_vm5, %v668_v21, %v670_v34  ;;  %v672_v40 = vrot.slane %v602_v35, 6  ;;  %v856_v41 = vpack.c.bf16 %v831_v37, %v830_v23  ;;  %v832_v42 = vmax.f32 %v717_v24, %v784_v38  ;;  %v9504_v21 = vld [vmem:[%s11637_s3 + $0x188] sm:$0xff]   ;;  %v9506_v23 = vld [vmem:[%s11637_s3 + $0x190] sm:$0xff]   ;;  %v9507_v24 = vld [vmem:[%s11637_s3 + $0x60] sm:$0xff]  }
 0x167   : > { %v719_v43 = vmax.f32 %v599_v9, %v671_v39  ;;  %v9488_v9 = vld [vmem:[%s11636_s2 + $0x14] ss:$8 sps:$4 sm:$0xff]   ;;  %8603 = vmatpush3.bf16.msra.mxu1 %v9504_v21 }
 0x168   : > { %v673_v44 = vsel %vm628_vm5, %v670_v34, %v672_v40  ;;  %953 = vmatpush1.bf16.msra.mxu0 %v856_v41  ;;  %8604 = vmatprep.subr.bf16.mxu1 %v9786_v0  ;;  %v9516_v34 = vld [vmem:[%s11637_s3 + $0x1b0] sm:$0xff]   ;;  %v9520_v35 = vld [vmem:[%s11637_s3 + $0x1b8] sm:$0xff]  }
 0x169   : > { %v785_v45 = vrot.slane %v719_v43, 1  ;;  %v720_v46 = vmax.f32 %v600_v15, %v673_v44  ;;  %v573_v47 = vpop.f32.mrb[48].mxu0  ;;  %954 = vmatprep.subr.bf16.mxu0 %v11644_v20  ;;  %v9494_v15 = vld [vmem:[%s11636_s2 + $0x34] ss:$8 sps:$4 sm:$0xff]  }
 0x16a   : > { %v603_v48 = vmax.f32 %v573_v47, 0.0  ;;  %v8430_v49 = vpop.f32.mrb[49].mxu0 }
 0x16b   : > { %v787_v50 = vrot.slane %v720_v46, 1  ;;  %v576_v51 = vpop.f32.mrb[50].mxu0  ;;  %v786_v52 = vsel %vm745_vm6, %v783_v31, %v785_v45  ;;  %8605 = vmatpush3.bf16.msra.mxu1 %v9506_v23  ;;  %v9513_v31 = vld [vmem:[%s11637_s3 + $0x70] sm:$0xff]  }
 0x16c   : > { %v674_v53 = vrot.slane %v603_v48, 6  ;;  %v8431_v54 = vpop.f32.mrb[51].mxu0  ;;  %v833_v55 = vmax.f32 %v718_v27, %v786_v52  ;;  %8606 = vmatprep.subr.bf16.mxu1 %v9786_v0  ;;  %v9510_v27 = vld [vmem:[%s11637_s3 + $0x1a0] sm:$0xff]  }
 0x16d   : > { %v788_v56 = vsel %vm745_vm6, %v785_v45, %v787_v50 }
 0x16e   : > { %v675_v57 = vsel %vm628_vm5, %v672_v40, %v674_v53  ;;  %v857_v58 = vpack.c.bf16 %v833_v55, %v832_v42  ;;  %v834_v59 = vmax.f32 %v719_v43, %v788_v56 }
 0x16f   : > { %v721_v60 = vmax.f32 %v601_v29, %v675_v57  ;;  %8607 = vmatpush3.bf16.msra.mxu1 %v9508_v25  ;;  %v7306_v29 = vcombine.high %v847_v28, %v847_v28  ;;  %v9521_v28 = vld [vmem:[%s11637_s3 + $0x8] sm:$0xff]  }
 0x170   : > { %955 = vmatpush1.bf16.msra.mxu0 %v857_v58  ;;  %8608 = vmatprep.subr.bf16.mxu1 %v9786_v0 }
 0x171   : > { %v789_v61 = vrot.slane %v721_v60, 1  ;;  %956 = vmatprep.subr.bf16.mxu0 %v11644_v20 }
 0x173   : > { %v836_v62 = vmax.f32 %v721_v60, %v789_v61  ;;  %v790_v63 = vsel %vm745_vm6, %v787_v50, %v789_v61  ;;  %8609 = vmatpush3.bf16.msra.mxu1 %v9510_v27 }
 0x174   : > { %v835_v2 = vmax.f32 %v720_v46, %v790_v63  ;;  %8610 = vmatprep.subr.bf16.mxu1 %v9786_v0 }
 0x175   : > { %v859_v4 = vpack.c.bf16 %v836_v62, %v836_v62 }
 0x176   : > { %v858_v5 = vpack.c.bf16 %v835_v2, %v834_v59 }
 0x177   : > { %v934_v7 = vand.u32 %v932_v6, %v859_v4  ;;  %8611 = vmatpush3.bf16.msra.mxu1 %v9514_v32 }
 0x178   : > { %957 = vmatpush1.bf16.msra.mxu0 %v858_v5  ;;  %8612 = vmatprep.subr.bf16.mxu1 %v9786_v0 }
 0x179   : > { %958 = vmatprep.subr.bf16.mxu0 %v11644_v20 }
 0x17b   : > { %8613 = vmatpush3.bf16.msra.mxu1 %v9516_v34 }
 0x17c   : > { %959 = vmatpush1.bf16.msra.mxu0 %v934_v7  ;;  %8614 = vmatprep.subr.bf16.mxu1 %v9786_v0  ;;  %v9519_v7 = vld [vmem:[%s11637_s3] sm:$0xff]  }
 0x17d   : > { %8432 = vmatprep.subr.bf16.mxu0 %v9786_v0 }
 0x17f   : > { %969 = vmatmul.mubr.bf16.vlgmr.msra.gmra.mrb[52].mxu0 %v9485_v8  ;;  %8615 = vmatpush3.bf16.msra.mxu1 %v9520_v35 }
 0x180   : > { %7308 = vmatprep.mubr.msk.bf16.mxu0 %vm911_vm4, %v9488_v9  ;;  %8433 = vmatpush3.bf16.msra.mxu0 %v9500_v10 }
 0x181   : > { %8434 = vmatprep.subr.bf16.mxu0 %v9786_v0  ;;  %8628 = vmatprep.subr.bf16.mxu1 %v9786_v0 }
 0x184   : > { %8435 = vmatpush3.bf16.msra.mxu0 %v9501_v11 }
 0x185   : > { %8436 = vmatprep.subr.bf16.mxu0 %v9786_v0 }
 0x187   : > { %977 = vmatmul.mubr.bf16.gmra.mrb[56].mxu0 %v9490_v12 }
 0x188   : > { %7309 = vmatprep.mubr.msk.bf16.mxu0 %vm911_vm4, %v9491_v13  ;;  %8437 = vmatpush3.bf16.msra.mxu0 %v9503_v19 }
 0x189   : > { %8438 = vmatprep.subr.bf16.mxu0 %v9786_v0 }
 0x18c   : > { %8439 = vmatpush3.bf16.msra.mxu0 %v9505_v22 }
 0x18d   : > { %8440 = vmatprep.subr.bf16.mxu0 %v9786_v0 }
 0x18f   : > { %985 = vmatmul.mubr.bf16.gmra.mrb[60].mxu0 %v9493_v14 }
 0x190   : > { %7310 = vmatprep.mubr.msk.bf16.mxu0 %vm911_vm4, %v9494_v15  ;;  %8441 = vmatpush3.bf16.msra.mxu0 %v9507_v24 }
 0x191   : > { %8442 = vmatprep.subr.bf16.mxu0 %v9786_v0 }
 0x194   : > { %8443 = vmatpush3.bf16.msra.mxu0 %v9509_v26 }
 0x195   : > { %8444 = vmatprep.subr.bf16.mxu0 %v9786_v0 }
 0x197   : > { %993 = vmatmul.mubr.bf16.gmra.mrb[64].mxu0 %v9496_v16 }
 0x198   : > { %7311 = vmatprep.mubr.msk.bf16.mxu0 %vm911_vm4, %v9497_v17  ;;  %8445 = vmatpush3.bf16.msra.mxu0 %v9513_v31 }
 0x199   : > { %8446 = vmatprep.subr.bf16.mxu0 %v9786_v0 }
 0x19c   : > { %8447 = vmatpush3.bf16.msra.mxu0 %v9515_v33 }
 0x19d   : > { %8460 = vmatprep.subr.bf16.mxu0 %v9786_v0 }
 0x19f   : > { %1001 = vmatmul.mubr.bf16.gmra.mrb[68].mxu0 %v9499_v18 }
 0x1a0   : > { %7312 = vmatprep.mubr.msk.bf16.mxu0 %vm911_vm4, %v7306_v29 }
 0x1a7   : > { %1009 = vmatmul.mubr.bf16.gmra.mrb[72].mxu0 %v7305_v30 }
 0x1a8   : > { %8448 = vmatprep.mubr.msk.bf16.mxu0 %vm9787_vm1, %v9786_v0 }
 0x252   : > { %v970_v36 = vpop.f32.mrb[52].mxu0 }
 0x253   : > { %v972_v37 = vpop.f32.mrb[53].mxu0 }
 0x254   : > { %v973_v38 = vpop.f32.mrb[54].mxu0 }
 0x255   : > { %v8057_v39 = vpack.c.bf16 %v973_v38, %v970_v36  ;;  %v975_v40 = vpop.f32.mrb[55].mxu0 }
 0x257   : > { %8058 = vst [vmem:[#allocation2] sm:$0xff] %v8057_v39  }
 0x25a   : > { %v978_v41 = vpop.f32.mrb[56].mxu0 }
 0x25b   : > { %v980_v42 = vpop.f32.mrb[57].mxu0 }
 0x25c   : > { %v981_v43 = vpop.f32.mrb[58].mxu0 }
 0x25d   : > { %v8062_v44 = vpack.c.bf16 %v981_v43, %v978_v41  ;;  %v983_v45 = vpop.f32.mrb[59].mxu0  ;;  %v9524_v41 = vld [vmem:[%s11637_s3 + $0x1c0] sm:$0xff]  }
 0x25e   : > { %v1077_v46 = vld [vmem:[#allocation2] sm:$0xf]  ;;  %v1078_v47 = vld [vmem:[#allocation2 + $0x4] sm:$0xf] }
 0x25f   : > { %8079 = vst [vmem:[#allocation2 + $0x8] sm:$0xff] %v8062_v44   ;;  %v10123_v48 = vcombine.low %v1077_v46, %v1078_v47  ;;  %v1371_v49 = vld [vmem:[#allocation2] sm:$0xe]  ;;  %v2285_v5 = vld [vmem:[#allocation2 + $0x4] sm:$0xc] }
 0x260   : > { %v7375_v50 = vcombine.low %v1371_v49, %v1078_v47  ;;  %v1669_v59 = vld [vmem:[#allocation2] sm:$0xc]  ;;  %v1989_v15 = vld [vmem:[#allocation2 + $0x4] sm:$0xe] }
 0x261   : > { %v1135_v52 = vshll.u32 %v10123_v48, 16  ;;  %v1133_v62 = vshrl.u32 %v10123_v48, 16  ;;  %v7425_v6 = vcombine.low %v1669_v59, %v1078_v47 }
 0x262   : > { %v986_v51 = vpop.f32.mrb[60].mxu0  ;;  %v1535_v57 = vshrl.u32 %v7375_v50, 16  ;;  %v1538_v58 = vshll.u32 %v7375_v50, 16  ;;  %v1397_v8 = vrot.slane %v7375_v50, 1 }
 0x263   : > { %v988_v53 = vpop.f32.mrb[61].mxu0  ;;  %v1137_v61 = vrot.slane %v1135_v52, 1  ;;  %v1695_v25 = vrot.slane %v7425_v6, 2 }
 0x264   : > { %v989_v54 = vpop.f32.mrb[62].mxu0  ;;  %v1537_v10 = vrot.slane %v1535_v57, 1  ;;  %v1540_v11 = vrot.slane %v1538_v58, 2 }
 0x265   : > { %v8067_v55 = vpack.c.bf16 %v989_v54, %v986_v51  ;;  %v991_v56 = vpop.f32.mrb[63].mxu0  ;;  %v1138_v13 = vor.u32 %v1137_v61, %v1133_v62  ;;  %v9525_v51 = vld [vmem:[%s11637_s3 + $0x10] sm:$0xff]   ;;  %v9526_v61 = vld [vmem:[%s11637_s3 + $0x1c8] sm:$0xff]  }
 0x266   : > { %v10126_v60 = vld [vmem:[#allocation2 + $0x8] sm:$0xff]   ;;  %v1541_v29 = vor.u32 %v1540_v11, %v1537_v10  ;;  %v9527_v11 = vld [vmem:[%s11637_s3 + $0x18] sm:$0xff]  }
 0x267   : > { %8080 = vst [vmem:[#allocation2 + $0x10] sm:$0xff] %v8067_v55   ;;  %v10129_v63 = vld [vmem:[#allocation2 + $0x8] sm:$0xf]  ;;  %v1140_v2 = vshll.u32 %v10126_v60, 16  ;;  %v1144_v3 = vshrl.u32 %v10126_v60, 16  ;;  %v1398_v4 = vrot.slane %v10126_v60, 1 }
 0x268   : > { %v7528_v9 = vcombine.low %v2285_v5, %v10129_v63  ;;  %v1696_v17 = vrot.slane %v10126_v60, 2  ;;  %v10140_v19 = vcombine.low %v1989_v15, %v10129_v63 }
 0x269   : > { %v1142_v14 = vrot.slane %v1140_v2, 1  ;;  %v1542_v16 = vrot.slane %v1144_v3, 1  ;;  %v10145_v21 = vsel %vm745_vm6, %v1397_v8, %v1398_v4  ;;  %v1543_v22 = vrot.slane %v1140_v2, 2 }
 0x26a   : > { %v994_v12 = vpop.f32.mrb[64].mxu0  ;;  %v2448_v31 = vshrl.u32 %v7528_v9, 16  ;;  %v2451_v34 = vshll.u32 %v7528_v9, 16  ;;  %v10162_v35 = vsel %vm1694_vm9, %v1695_v25, %v1696_v17  ;;  %v2014_v36 = vrot.slane %v10140_v19, 1 }
 0x26b   : > { %v996_v18 = vpop.f32.mrb[65].mxu0  ;;  %v1143_v24 = vsel %vm1131_vm8, %v1138_v13, %v1142_v14  ;;  %v10151_v30 = vor.u32 %v1543_v22, %v1542_v16  ;;  %v2310_v45 = vrot.slane %v7528_v9, 2  ;;  %v1146_v56 = vor.u32 %v1144_v3, %v1142_v14 }
 0x26c   : > { %v997_v23 = vpop.f32.mrb[66].mxu0  ;;  %8449 = vmatmul.mubr.bf16.vlgmr.msra.gmra.mrb[76].mxu0 %v1143_v24  ;;  %v2450_v53 = vrot.slane %v2448_v31, 2  ;;  %v2453_v54 = vrot.slane %v2451_v34, 3  ;;  %v9531_v34 = vld [vmem:[%s11637_s3 + $0x20] sm:$0xff]  }
 0x26d   : > { %v8072_v26 = vpack.c.bf16 %v997_v23, %v994_v12  ;;  %v999_v27 = vpop.f32.mrb[67].mxu0  ;;  %8461 = vmatpush3.bf16.msra.mxu0 %v9519_v7  ;;  %8452 = vmatprep.mubr.msk.bf16.mxu0 %vm9787_vm1, %v9786_v0  ;;  %v10168_v39 = vsel %vm1533_vm10, %v1541_v29, %v10151_v30 }
 0x26e   : > { %v10153_v32 = vld [vmem:[#allocation2 + $0xc] sm:$0xff]   ;;  %8462 = vmatprep.subr.bf16.mxu0 %v9786_v0  ;;  %v1082_v37 = vld [vmem:[#allocation2 + $0x14] sm:$0x1]  ;;  %v2454_v15 = vor.u32 %v2453_v54, %v2450_v53 }
 0x26f   : > { %v10157_v33 = vld [vmem:[#allocation2 + $0x10] sm:$0xf]  ;;  %8081 = vst [vmem:[#allocation2 + $0x18] sm:$0xff] %v8072_v26   ;;  %v1372_v38 = vld [vmem:[#allocation2 + $0x14] sm:$0x3]  ;;  %v2015_v40 = vrot.slane %v10153_v32, 1 }
 0x270   : > { %v10175_v42 = vcombine.low %v10157_v33, %v1082_v37  ;;  %v10178_v43 = vshll.u32 %v10153_v32, 16  ;;  %v10181_v44 = vshrl.u32 %v10153_v32, 16  ;;  %v2311_v46 = vrot.slane %v10153_v32, 2  ;;  %v10206_v2 = vld [vmem:[#allocation2 + $0x14] sm:$0xf]  ;;  %v9533_v32 = vld [vmem:[%s11637_s3 + $0x28] sm:$0xff]  }
 0x271   : > { %v10185_v47 = vcombine.low %v10157_v33, %v1372_v38  ;;  %8463 = vmatpush3.bf16.msra.mxu0 %v9521_v28  ;;  %v2016_v50 = vsel %vm745_vm6, %v2014_v36, %v2015_v40  ;;  %v1670_v10 = vld [vmem:[#allocation2 + $0x14] sm:$0x7]  ;;  %v1814_v26 = vld [vmem:[#allocation2 + $0x4] sm:$0xf] }
 0x272   : > { %v1002_v49 = vpop.f32.mrb[68].mxu0  ;;  %v1148_v52 = vshll.u32 %v10175_v42, 16  ;;  %8617 = vmatmul.mubr.bf16.vlgmr.msra.gmra.mrb[0].mxu1 %v2016_v50  ;;  %8464 = vmatprep.subr.bf16.mxu0 %v9786_v0  ;;  %v10198_v57 = vsel %vm1694_vm9, %v2310_v45, %v2311_v46  ;;  %v2455_v3 = vrot.slane %v10181_v44, 2  ;;  %v2456_v5 = vrot.slane %v10178_v43, 3  ;;  %v9530_v28 = vld [vmem:[%s11637_s3 + $0x1d0] sm:$0xff]  }
 0x273   : > { %v1004_v55 = vpop.f32.mrb[69].mxu0  ;;  %v11652_v58 = vrot.slane %v10185_v47, 1  ;;  %8629 = vmatpush3.bf16.msra.mxu1 %v9524_v41  ;;  %8620 = vmatprep.mubr.msk.bf16.mxu1 %vm9787_vm1, %v9786_v0  ;;  %v1547_v6 = vshrl.u32 %v10185_v47, 16  ;;  %v1550_v9 = vshll.u32 %v10185_v47, 16  ;;  %v7426_v25 = vcombine.low %v10157_v33, %v1670_v10 }
 0x274   : > { %v1005_v59 = vpop.f32.mrb[70].mxu0  ;;  %v1150_v62 = vrot.slane %v1148_v52, 1  ;;  %8630 = vmatprep.subr.bf16.mxu1 %v9786_v0  ;;  %v2457_v16 = vor.u32 %v2456_v5, %v2455_v3  ;;  %v7451_v31 = vcombine.low %v1814_v26, %v10129_v63  ;;  %v1152_v41 = vshrl.u32 %v10175_v42, 16  ;;  %v9532_v52 = vld [vmem:[%s11637_s3 + $0x1d8] sm:$0xff]   ;;  %v10283_v55 = vld [vmem:[#allocation2 + $0x10] sm:$0xff]  }
 0x275   : > { %v8077_v7 = vpack.c.bf16 %v1005_v59, %v1002_v49  ;;  %v10217_v8 = vsel %vm745_vm6, %v1398_v4, %v11652_v58  ;;  %8465 = vmatpush3.bf16.msra.mxu0 %v9525_v51  ;;  %v1549_v18 = vrot.slane %v1547_v6, 1  ;;  %v1552_v23 = vrot.slane %v1550_v9, 2  ;;  %v1007_v51 = vpop.f32.mrb[71].mxu0 }
 0x276   : > { %v1151_v12 = vsel %vm1131_vm8, %v1146_v56, %v1150_v62  ;;  %v1990_v13 = vld [vmem:[#allocation2 + $0x18] sm:$0x3]  ;;  %8466 = vmatprep.subr.bf16.mxu0 %v9786_v0  ;;  %v10234_v24 = vsel %vm2446_vm11, %v2454_v15, %v2457_v16  ;;  %v1855_v53 = vshll.u32 %v7451_v31, 16  ;;  %v1862_v59 = vrot.slane %v10178_v43, 1 }
 0x277   : > { %v2286_v14 = vld [vmem:[#allocation2 + $0x18] sm:$0x7]  ;;  %8082 = vst [vmem:[#allocation2 + $0x20] sm:$0xff] %v8077_v7   ;;  %8453 = vmatmul.mubr.bf16.gmra.mrb[80].mxu0 %v1151_v12  ;;  %v10226_v4 = vcombine.low %v10206_v2, %v1990_v13  ;;  %8631 = vmatpush3.bf16.msra.mxu1 %v9526_v61  ;;  %v10247_v36 = vor.u32 %v1552_v23, %v1549_v18  ;;  %v1853_v3 = vshrl.u32 %v7451_v31, 16  ;;  %v3192_v12 = vld [vmem:[#allocation2 + $0x8] sm:$0x8] }
 0x278   : > { %v10229_v22 = vcombine.low %v10206_v2, %v2286_v14  ;;  %8456 = vmatprep.mubr.msk.bf16.mxu0 %vm9787_vm1, %v9786_v0  ;;  %8632 = vmatprep.subr.bf16.mxu1 %v9786_v0  ;;  %v1819_v61 = vld [vmem:[#allocation2 + $0x18] sm:$0x1]  ;;  %v1857_v5 = vrot.slane %v1855_v53, 1  ;;  %v9535_v13 = vld [vmem:[%s11637_s3 + $0x30] sm:$0xff]   ;;  %v11650_v14 = vshrl.u32 %v10283_v55, 16  ;;  %v1866_v15 = vor.u32 %v10181_v44, %v1862_v59 }
 0x279   : > { %v2017_v27 = vrot.slane %v10226_v4, 1  ;;  %8467 = vmatpush3.bf16.msra.mxu0 %v9527_v11  ;;  %v10266_v45 = vsel %vm1533_vm10, %v10151_v30, %v10247_v36  ;;  %v10278_v30 = vld [vmem:[#allocation2 + $0xc] sm:$0xf]  ;;  %v10302_v7 = vld [vmem:[#allocation2 + $0x18] sm:$0xf]  ;;  %v10305_v10 = vcombine.low %v10206_v2, %v1819_v61  ;;  %v2151_v23 = vshrl.u32 %v10140_v19, 16 }
 0x27a   : > { %v11651_v29 = vrot.slane %v10229_v22, 2  ;;  %v2460_v33 = vshrl.u32 %v10229_v22, 16  ;;  %v2463_v37 = vshll.u32 %v10229_v22, 16  ;;  %8468 = vmatprep.subr.bf16.mxu0 %v9786_v0  ;;  %v1858_v9 = vor.u32 %v1857_v5, %v1853_v3  ;;  %v9538_v61 = vld [vmem:[%s11637_s3 + $0x1f0] sm:$0xff]  }
 0x27b   : > { %v2018_v38 = vsel %vm745_vm6, %v2015_v40, %v2017_v27  ;;  %v10268_v40 = vrot.slane %v7426_v25, 2  ;;  %8633 = vmatpush3.bf16.msra.mxu1 %v9530_v28  ;;  %v1868_v18 = vshll.u32 %v10305_v10, 16  ;;  %v11648_v25 = vshll.u32 %v10283_v55, 16  ;;  %v9536_v28 = vld [vmem:[%s11637_s3 + $0x1e8] sm:$0xff]  }
 0x27c   : > { %v10261_v63 = vsel %vm1694_vm9, %v2311_v46, %v11651_v29  ;;  %8621 = vmatmul.mubr.bf16.gmra.mrb[4].mxu1 %v2018_v38  ;;  %v2462_v49 = vrot.slane %v2460_v33, 2  ;;  %v2465_v50 = vrot.slane %v2463_v37, 3  ;;  %v1154_v46 = vor.u32 %v1152_v41, %v1150_v62  ;;  %8634 = vmatprep.subr.bf16.mxu1 %v9786_v0  ;;  %v2896_v62 = vld [vmem:[#allocation2 + $0x8] sm:$0xc]  ;;  %v9537_v37 = vld [vmem:[%s11637_s3 + $0x38] sm:$0xff]  }
 0x27d   : > { %8624 = vmatprep.mubr.msk.bf16.mxu1 %vm9787_vm1, %v9786_v0  ;;  %8469 = vmatpush3.bf16.msra.mxu0 %v9531_v34  ;;  %v10289_v56 = vsel %vm1694_vm9, %v1696_v17, %v10268_v40  ;;  %v9534_v17 = vld [vmem:[%s11637_s3 + $0x1e0] sm:$0xff]   ;;  %v7629_v11 = vcombine.low %v2896_v62, %v10278_v30  ;;  %v10316_v2 = vsel %vm1131_vm8, %v1858_v9, %v1862_v59  ;;  %v10327_v31 = vrot.slane %v1868_v18, 1  ;;  %v3193_v59 = vld [vmem:[#allocation2 + $0x1c] sm:$0xf] }
 0x27e   : > { %v10281_v54 = vor.u32 %v2465_v50, %v2462_v49  ;;  %8470 = vmatprep.subr.bf16.mxu0 %v9786_v0  ;;  %v7679_v26 = vcombine.low %v3192_v12, %v10278_v30  ;;  %v2922_v33 = vrot.slane %v10283_v55, 2  ;;  %v2154_v38 = vshll.u32 %v10140_v19, 16  ;;  %v9539_v9 = vld [vmem:[%s11637_s3 + $0x80] sm:$0xff]  }
 0x27f   : > { %8457 = vmatmul.mubr.bf16.gmra.mrb[84].mxu0 %v1154_v46  ;;  %8635 = vmatpush3.bf16.msra.mxu1 %v9532_v52  ;;  %v2921_v34 = vrot.slane %v7629_v11, 2  ;;  %v3058_v41 = vshrl.u32 %v7629_v11, 16  ;;  %v3061_v49 = vshll.u32 %v7629_v11, 16  ;;  %v3065_v50 = vrot.slane %v11650_v14, 2  ;;  %v3812_v1 = vld [vmem:[#allocation2 + $0x20] sm:$0xf] }
 0x280   : > { %8476 = vmatprep.mubr.msk.bf16.mxu0 %vm9787_vm1, %v9786_v0  ;;  %v10297_v6 = vsel %vm2446_vm11, %v2457_v16, %v10281_v54  ;;  %8636 = vmatprep.subr.bf16.mxu1 %v9786_v0  ;;  %v2897_v16 = vld [vmem:[#allocation2 + $0x1c] sm:$0x7]  ;;  %v10343_v51 = vsel %vm1131_vm8, %v1866_v15, %v10327_v31  ;;  %v3066_v19 = vrot.slane %v11648_v25, 3  ;;  %v2158_v62 = vrot.slane %v10181_v44, 1  ;;  %v10367_v15 = vld [vmem:[#allocation2 + $0x14] sm:$0xff]  }
 0x281   : > { %8471 = vmatpush3.bf16.msra.mxu0 %v9533_v32  ;;  %v10346_v52 = vsel %vm1694_vm9, %v2921_v34, %v2922_v33  ;;  %v3060_v46 = vrot.slane %v3058_v41, 2  ;;  %v3063_v53 = vrot.slane %v3061_v49, 3  ;;  %v3219_v44 = vrot.slane %v10283_v55, 3  ;;  %v3338_v34 = vld [vmem:[#allocation2 + $0x10] sm:$0xf]  ;;  %v9540_v41 = vld [vmem:[%s11637_s3 + $0x1f8] sm:$0xff]  }
 0x282   : > { %8472 = vmatprep.subr.bf16.mxu0 %v9786_v0  ;;  %v2153_v49 = vrot.slane %v2151_v23, 1 }
 0x283   : > { %8637 = vmatpush3.bf16.msra.mxu1 %v9534_v17  ;;  %v3218_v17 = vrot.slane %v7679_v26, 3  ;;  %v3064_v12 = vor.u32 %v3063_v53, %v3060_v46  ;;  %v3515_v53 = vld [vmem:[#allocation2 + $0xc] sm:$0xc] }
 0x284   : > { %8625 = vmatmul.mubr.bf16.gmra.mrb[8].mxu1 %v2017_v27  ;;  %v10331_v27 = vcombine.low %v10302_v7, %v2897_v16  ;;  %8638 = vmatprep.subr.bf16.mxu1 %v9786_v0  ;;  %v2159_v16 = vrot.slane %v10178_v43, 2  ;;  %v2156_v43 = vrot.slane %v2154_v38, 2  ;;  %v10395_v23 = vcombine.low %v3515_v53, %v3338_v34  ;;  %v3516_v38 = vld [vmem:[#allocation2 + $0x20] sm:$0x7]  ;;  %v3811_v53 = vld [vmem:[#allocation2 + $0xc] sm:$0x8] }
 0x285   : > { %8644 = vmatprep.mubr.msk.bf16.mxu1 %vm9787_vm1, %v9786_v0  ;;  %8473 = vmatpush3.bf16.msra.mxu0 %v9535_v13  ;;  %v3067_v13 = vor.u32 %v3066_v19, %v3065_v50  ;;  %v9541_v19 = vld [vmem:[%s11637_s3 + $0x88] sm:$0xff]  }
 0x286   : > { %8474 = vmatprep.subr.bf16.mxu0 %v9786_v0  ;;  %v11647_v32 = vrot.slane %v10331_v27, 2  ;;  %v3070_v3 = vshrl.u32 %v10331_v27, 16  ;;  %v3073_v5 = vshll.u32 %v10331_v27, 16 }
 0x287   : > { %8639 = vmatpush3.bf16.msra.mxu1 %v9536_v28  ;;  %v7680_v28 = vcombine.low %v10302_v7, %v3193_v59  ;;  %v2166_v59 = vshll.u32 %v10226_v4, 16 }
 0x288   : > { %8640 = vmatprep.subr.bf16.mxu1 %v9786_v0  ;;  %v10364_v11 = vsel %vm1694_vm9, %v2922_v33, %v11647_v32  ;;  %v3072_v18 = vrot.slane %v3070_v3, 2  ;;  %v3075_v26 = vrot.slane %v3073_v5, 3  ;;  %v10376_v33 = vsel %vm437_vm2, %v3218_v17, %v3219_v44 }
 0x289   : > { %8475 = vmatpush3.bf16.msra.mxu0 %v9537_v37  ;;  %v10373_v37 = vsel %vm2446_vm11, %v3064_v12, %v3067_v13  ;;  %v10384_v46 = vrot.slane %v7680_v28, 3  ;;  %v10398_v3 = vor.u32 %v2159_v16, %v2158_v62  ;;  %v10411_v17 = vshll.u32 %v10367_v15, 16  ;;  %v9542_v62 = vld [vmem:[%s11637_s3 + $0x200] sm:$0xff]  }
 0x28a   : > { %8488 = vmatprep.subr.bf16.mxu0 %v9786_v0  ;;  %v10382_v50 = vor.u32 %v3075_v26, %v3072_v18  ;;  %v2157_v12 = vor.u32 %v2156_v43, %v2153_v49  ;;  %v2168_v26 = vrot.slane %v2166_v59, 2  ;;  %v3680_v28 = vshll.u32 %v10395_v23, 16 }
 0x28b   : > { %8641 = vmatpush3.bf16.msra.mxu1 %v9538_v61  ;;  %v10393_v61 = vshrl.u32 %v10367_v15, 16 }
 0x28c   : > { %8477 = vmatmul.mubr.bf16.vlgmr.msra.gmra.mrb[76].mxu0 %v10123_v48  ;;  %8642 = vmatprep.subr.bf16.mxu1 %v9786_v0  ;;  %v2163_v48 = vshrl.u32 %v10226_v4, 16  ;;  %v10404_v5 = vsel %vm2446_vm11, %v3067_v13, %v10382_v50  ;;  %v10408_v4 = vsel %vm437_vm2, %v3219_v44, %v10384_v46  ;;  %v3677_v13 = vshrl.u32 %v10395_v23, 16  ;;  %v9543_v44 = vld [vmem:[%s11637_s3 + $0x90] sm:$0xff]  }
 0x28d   : > { %8489 = vmatpush3.bf16.msra.mxu0 %v9539_v9  ;;  %8480 = vmatprep.mubr.msk.bf16.mxu0 %vm9787_vm1, %v9786_v0  ;;  %v10413_v9 = vld [vmem:[#allocation2 + $0x1c] sm:$0xf]  ;;  %v2161_v49 = vsel %vm1533_vm10, %v2157_v12, %v10398_v3  ;;  %v7782_v12 = vcombine.low %v3811_v53, %v3338_v34 }
 0x28e   : > { %8490 = vmatprep.subr.bf16.mxu0 %v9786_v0  ;;  %v10419_v16 = vcombine.low %v10413_v9, %v3516_v38  ;;  %v2165_v18 = vrot.slane %v2163_v48, 1  ;;  %v3679_v43 = vrot.slane %v3677_v13, 2  ;;  %v3685_v38 = vrot.slane %v10411_v17, 3  ;;  %v9544_v48 = vld [vmem:[%s11637_s3 + $0x208] sm:$0xff]  }
 0x28f   : > { %8643 = vmatpush3.bf16.msra.mxu1 %v9540_v41  ;;  %v3684_v41 = vrot.slane %v10393_v61, 2  ;;  %v3837_v13 = vrot.slane %v10367_v15, 3  ;;  %v3836_v53 = vrot.slane %v7782_v12, 3  ;;  %v10449_v15 = vcombine.low %v10413_v9, %v3812_v1 }
 0x290   : > { %8656 = vmatprep.subr.bf16.mxu1 %v9786_v0  ;;  %v3689_v20 = vshrl.u32 %v10419_v16, 16  ;;  %v3692_v59 = vshll.u32 %v10419_v16, 16 }
 0x291   : > { %8491 = vmatpush3.bf16.msra.mxu0 %v9541_v19  ;;  %v3682_v19 = vrot.slane %v3680_v28, 3  ;;  %v9545_v28 = vld [vmem:[%s11637_s3 + $0x98] sm:$0xff]   ;;  %v10464_v1 = vsel %vm437_vm2, %v3836_v53, %v3837_v13  ;;  %v3986_v25 = vshrl.u32 %v10449_v15, 16 }
 0x292   : > { %8492 = vmatprep.subr.bf16.mxu0 %v9786_v0  ;;  %8645 = vmatmul.mubr.bf16.vlgmr.msra.gmra.mrb[0].mxu1 %v2161_v49  ;;  %v10443_v49 = vor.u32 %v2168_v26, %v2165_v18  ;;  %v3691_v32 = vrot.slane %v3689_v20, 2  ;;  %v3694_v34 = vrot.slane %v3692_v59, 3  ;;  %v3977_v26 = vshll.u32 %v7782_v12, 16 }
 0x293   : > { %8657 = vmatpush3.bf16.msra.mxu1 %v9542_v62  ;;  %v3683_v62 = vor.u32 %v3682_v19, %v3679_v43  ;;  %8648 = vmatprep.mubr.msk.bf16.mxu1 %vm9787_vm1, %v9786_v0  ;;  %v3981_v20 = vrot.slane %v10393_v61, 3  ;;  %v9546_v43 = vld [vmem:[%s11637_s3 + $0x210] sm:$0xff]  }
 0x294   : > { %8481 = vmatmul.mubr.bf16.gmra.mrb[80].mxu0 %v10126_v60  ;;  %8658 = vmatprep.subr.bf16.mxu1 %v9786_v0  ;;  %v3686_v60 = vor.u32 %v3685_v38, %v3684_v41  ;;  %v3982_v41 = vrot.slane %v10411_v17, 4  ;;  %v10461_v19 = vor.u32 %v3694_v34, %v3691_v32  ;;  %v11649_v38 = vrot.slane %v10449_v15, 3  ;;  %v10473_v34 = vld [vmem:[#allocation2 + $0x18] sm:$0xff]  }
 0x295   : > { %8493 = vmatpush3.bf16.msra.mxu0 %v9543_v44  ;;  %v3974_v44 = vshrl.u32 %v7782_v12, 16  ;;  %8484 = vmatprep.mubr.msk.bf16.mxu0 %vm9787_vm1, %v9786_v0  ;;  %v9547_v12 = vld [vmem:[%s11637_s3 + $0xa0] sm:$0xff]   ;;  %v3989_v32 = vshll.u32 %v10449_v15, 16  ;;  %11663 = vst [vmem:[#allocation6_spill] sm:$0xff] %v10473_v34  ;;  %v2170_v53 = vsel %vm1533_vm10, %v10398_v3, %v10443_v49  ;;  %v9548_v3 = vld [vmem:[%s11637_s3 + $0x218] sm:$0xff]  }
 0x296   : > { %8494 = vmatprep.subr.bf16.mxu0 %v9786_v0  ;;  %v10454_v18 = vsel %vm2446_vm11, %v3683_v62, %v3686_v60  ;;  %v3983_v62 = vor.u32 %v3982_v41, %v3981_v20  ;;  %v3988_v20 = vrot.slane %v3986_v25, 3  ;;  %v4109_v25 = vld [vmem:[#allocation2 + $0x14] sm:$0xf] }
 0x297   : > { %8659 = vmatpush3.bf16.msra.mxu1 %v9544_v48  ;;  %v3976_v59 = vrot.slane %v3974_v44, 3  ;;  %v3979_v48 = vrot.slane %v3977_v26, 4  ;;  %v10486_v44 = vsel %vm437_vm2, %v3837_v13, %v11649_v38  ;;  %v3991_v41 = vrot.slane %v3989_v32, 4  ;;  %v9549_v13 = vld [vmem:[%s11637_s3 + $0xa8] sm:$0xff]   ;;  %v9551_v38 = vld [vmem:[%s11637_s3 + $0xb0] sm:$0xff]  }
 0x298   : > { %8660 = vmatprep.subr.bf16.mxu1 %v9786_v0 }
 0x299   : > { %8495 = vmatpush3.bf16.msra.mxu0 %v9545_v28  ;;  %v10481_v28 = vsel %vm2446_vm11, %v3686_v60, %v10461_v19  ;;  %v3980_v26 = vor.u32 %v3979_v48, %v3976_v59  ;;  %v10499_v59 = vor.u32 %v3991_v41, %v3988_v20  ;;  %v4423_v48 = vld [vmem:[#allocation2 + $0x24] sm:$0xf]  ;;  %v4448_v41 = vrot.slane %v10473_v34, 3 }
 0x29a   : > { %8496 = vmatprep.subr.bf16.mxu0 %v9786_v0  ;;  %8649 = vmatmul.mubr.bf16.gmra.mrb[4].mxu1 %v2170_v53  ;;  %v11653_v53 = vshll.u32 %v10473_v34, 16 }
 0x29b   : > { %8661 = vmatpush3.bf16.msra.mxu1 %v9546_v43  ;;  %v10497_v60 = vsel %vm3972_vm12, %v3980_v26, %v3983_v62  ;;  %11664 = vst [vmem:[#allocation7_spill] sm:$0xff] %v10499_v59  ;;  %v11654_v43 = vshrl.u32 %v10473_v34, 16  ;;  %8652 = vmatprep.mubr.msk.bf16.mxu1 %vm9787_vm1, %v9786_v0  ;;  %v10509_v32 = vsel %vm3972_vm12, %v3983_v62, %v10499_v59  ;;  %v9550_v26 = vld [vmem:[%s11637_s3 + $0x220] sm:$0xff]  }
 0x29c   : > { %8485 = vmatmul.mubr.bf16.gmra.mrb[84].mxu0 %v10175_v42  ;;  %8662 = vmatprep.subr.bf16.mxu1 %v9786_v0  ;;  %v4422_v42 = vld [vmem:[#allocation2 + $0x10] sm:$0x8] }
 0x29d   : > { %8497 = vmatpush3.bf16.msra.mxu0 %v9547_v12  ;;  %v4112_v12 = vld [vmem:[#allocation2 + $0x20] sm:$0xf]  ;;  %8504 = vmatprep.mubr.msk.bf16.mxu0 %vm9787_vm1, %v9786_v0  ;;  %v7883_v20 = vcombine.low %v4422_v42, %v4109_v25  ;;  %v4591_v62 = vrot.slane %v11654_v43, 3  ;;  %v4592_v25 = vrot.slane %v11653_v53, 4  ;;  %v9553_v53 = vld [vmem:[%s11637_s3 + $0xb8] sm:$0xff]  }
 0x29e   : > { %8498 = vmatprep.subr.bf16.mxu0 %v9786_v0  ;;  %v10520_v14 = vcombine.low %v4112_v12, %v4423_v48  ;;  %v9552_v12 = vld [vmem:[%s11637_s3 + $0x228] sm:$0xff]  }
 0x29f   : > { %8663 = vmatpush3.bf16.msra.mxu1 %v9548_v3  ;;  %v4447_v3 = vrot.slane %v7883_v20, 3  ;;  %v4584_v29 = vshrl.u32 %v7883_v20, 16  ;;  %v4587_v58 = vshll.u32 %v7883_v20, 16  ;;  %v4593_v43 = vor.u32 %v4592_v25, %v4591_v62  ;;  %v9563_v25 = vld [vmem:[%s11637_s3 + $0x248] sm:$0xff]  }
 0x2a0   : > { %8664 = vmatprep.subr.bf16.mxu1 %v9786_v0  ;;  %v4596_v42 = vshrl.u32 %v10520_v14, 16  ;;  %v4599_v59 = vshll.u32 %v10520_v14, 16 }
 0x2a1   : > { %8499 = vmatpush3.bf16.msra.mxu0 %v9549_v13  ;;  %v4450_v13 = vrot.slane %v10520_v14, 3  ;;  %v10536_v48 = vsel %vm437_vm2, %v4447_v3, %v4448_v41  ;;  %v4586_v20 = vrot.slane %v4584_v29, 3  ;;  %v9735_v14 = vld [vmem:[%s11637_s3 + $0x5f8] sm:$0xff]  }
 0x2a2   : > { %8500 = vmatprep.subr.bf16.mxu0 %v9786_v0  ;;  %8653 = vmatmul.mubr.bf16.gmra.mrb[8].mxu1 %v10443_v49  ;;  %v4589_v49 = vrot.slane %v4587_v58, 4  ;;  %v4598_v34 = vrot.slane %v4596_v42, 3  ;;  %v4601_v58 = vrot.slane %v4599_v59, 4  ;;  %v9564_v42 = vld [vmem:[%s11637_s3 + $0xd8] sm:$0xff]  }
 0x2a3   : > { %8665 = vmatpush3.bf16.msra.mxu1 %v9550_v26  ;;  %8672 = vmatprep.mubr.msk.bf16.mxu1 %vm9787_vm1, %v9786_v0  ;;  %v10545_v26 = vsel %vm437_vm2, %v4448_v41, %v4450_v13  ;;  %v9556_v41 = vld [vmem:[%s11637_s3 + $0xc0] sm:$0xff]   ;;  %vm5098_vm2 = vcmask 130048  }
 0x2a4   : > { %8666 = vmatprep.subr.bf16.mxu1 %v9786_v0  ;;  %v4590_v29 = vor.u32 %v4589_v49, %v4586_v20  ;;  %v10559_v62 = vor.u32 %v4601_v58, %v4598_v34  ;;  %v9558_v34 = vld [vmem:[%s11637_s3 + $0xc8] sm:$0xff]   ;;  %v9568_v20 = vld [vmem:[%s11637_s3 + $0x258] sm:$0xff]  }
 0x2a5   : > { %8501 = vmatpush3.bf16.msra.mxu0 %v9551_v38  ;;  %v9554_v38 = vld [vmem:[%s11637_s3 + $0x230] sm:$0xff]   ;;  %v9569_v49 = vld [vmem:[%s11637_s3 + $0xe8] sm:$0xff]  }
 0x2a6   : > { %8502 = vmatprep.subr.bf16.mxu0 %v9786_v0  ;;  %v10553_v3 = vsel %vm3972_vm12, %v4590_v29, %v4593_v43  ;;  %v10564_v59 = vsel %vm3972_vm12, %v4593_v43, %v10559_v62  ;;  %v9562_v43 = vld [vmem:[%s11637_s3 + $0xd0] sm:$0xff]   ;;  %v11666_v29 = vrot.slane %v10229_v22, 2  ;;  %v9572_v58 = vld [vmem:[%s11637_s3 + $0x268] sm:$0xff]  }
 0x2a7   : > { %8667 = vmatpush3.bf16.msra.mxu1 %v9552_v12  ;;  %v11665_v12 = vrot.slane %v10185_v47, 1  ;;  %v9570_v47 = vld [vmem:[%s11637_s3 + $0x260] sm:$0xff]   ;;  %v9574_v22 = vld [vmem:[%s11637_s3 + $0x270] sm:$0xff]  }
 0x2a8   : > { %8668 = vmatprep.subr.bf16.mxu1 %v9786_v0 }
 0x2a9   : > { %8503 = vmatpush3.bf16.msra.mxu0 %v9553_v53  ;;  %v9557_v53 = vld [vmem:[%s11637_s3 + $0x238] sm:$0xff]  }
 0x2aa   : > { %8516 = vmatprep.subr.bf16.mxu0 %v9786_v0 }
 0x2ab   : > { %8669 = vmatpush3.bf16.msra.mxu1 %v9554_v38  ;;  %v9573_v38 = vld [vmem:[%s11637_s3 + $0xf8] sm:$0xff]  }
 0x2ac   : > { %8505 = vmatmul.mubr.bf16.vlgmr.msra.gmra.mrb[76].mxu0 %v10145_v21  ;;  %8670 = vmatprep.subr.bf16.mxu1 %v9786_v0  ;;  %v9560_v21 = vld [vmem:[%s11637_s3 + $0x240] sm:$0xff]  }
 0x2ad   : > { %8517 = vmatpush3.bf16.msra.mxu0 %v9556_v41  ;;  %8508 = vmatprep.mubr.msk.bf16.mxu0 %vm9787_vm1, %v9786_v0  ;;  %v9575_v41 = vld [vmem:[%s11637_s3 + $0x100] sm:$0xff]  }
 0x2ae   : > { %8518 = vmatprep.subr.bf16.mxu0 %v9786_v0 }
 0x2af   : > { %8671 = vmatpush3.bf16.msra.mxu1 %v9557_v53  ;;  %v9576_v53 = vld [vmem:[%s11637_s3 + $0x278] sm:$0xff]  }
 0x2b0   : > { %8684 = vmatprep.subr.bf16.mxu1 %v9786_v0 }
 0x2b1   : > { %8519 = vmatpush3.bf16.msra.mxu0 %v9558_v34  ;;  %v9577_v34 = vld [vmem:[%s11637_s3 + $0x108] sm:$0xff]  }
 0x2b2   : > { %8520 = vmatprep.subr.bf16.mxu0 %v9786_v0  ;;  %8673 = vmatmul.mubr.bf16.vlgmr.msra.gmra.mrb[0].mxu1 %v10198_v57  ;;  %v9566_v57 = vld [vmem:[%s11637_s3 + $0x250] sm:$0xff]  }
 0x2b3   : > { %8685 = vmatpush3.bf16.msra.mxu1 %v9560_v21  ;;  %8676 = vmatprep.mubr.msk.bf16.mxu1 %vm9787_vm1, %v9786_v0  ;;  %v9579_v21 = vld [vmem:[%s11637_s3 + $0x110] sm:$0xff]  }
 0x2b4   : > { %8509 = vmatmul.mubr.bf16.gmra.mrb[80].mxu0 %v10217_v8  ;;  %8686 = vmatprep.subr.bf16.mxu1 %v9786_v0  ;;  %v9567_v8 = vld [vmem:[%s11637_s3 + $0xe0] sm:$0xff]  }
 0x2b5   : > { %8521 = vmatpush3.bf16.msra.mxu0 %v9562_v43  ;;  %8512 = vmatprep.mubr.msk.bf16.mxu0 %vm9787_vm1, %v9786_v0  ;;  %v9580_v43 = vld [vmem:[%s11637_s3 + $0x288] sm:$0xff]  }
 0x2b6   : > { %8522 = vmatprep.subr.bf16.mxu0 %v9786_v0 }
 0x2b7   : > { %8687 = vmatpush3.bf16.msra.mxu1 %v9563_v25  ;;  %v9581_v25 = vld [vmem:[%s11637_s3 + $0x118] sm:$0xff]  }
 0x2b8   : > { %8688 = vmatprep.subr.bf16.mxu1 %v9786_v0 }
 0x2b9   : > { %8523 = vmatpush3.bf16.msra.mxu0 %v9564_v42  ;;  %v9584_v42 = vld [vmem:[%s11637_s3 + $0x298] sm:$0xff]  }
 0x2ba   : > { %8524 = vmatprep.subr.bf16.mxu0 %v9786_v0  ;;  %8677 = vmatmul.mubr.bf16.gmra.mrb[4].mxu1 %v10261_v63  ;;  %v9571_v63 = vld [vmem:[%s11637_s3 + $0xf0] sm:$0xff]  }
 0x2bb   : > { %8689 = vmatpush3.bf16.msra.mxu1 %v9566_v57  ;;  %8680 = vmatprep.mubr.msk.bf16.mxu1 %vm9787_vm1, %v9786_v0  ;;  %v9585_v57 = vld [vmem:[%s11637_s3 + $0x128] sm:$0xff]  }
 0x2bc   : > { %8513 = vmatmul.mubr.bf16.gmra.mrb[84].mxu0 %v11665_v12  ;;  %8690 = vmatprep.subr.bf16.mxu1 %v9786_v0  ;;  %v9589_v12 = vld [vmem:[%s11637_s3 + $0x138] sm:$0xff]  }
 0x2bd   : > { %8525 = vmatpush3.bf16.msra.mxu0 %v9567_v8  ;;  %8532 = vmatprep.mubr.msk.bf16.mxu0 %vm9787_vm1, %v9786_v0  ;;  %v9588_v8 = vld [vmem:[%s11637_s3 + $0x2a8] sm:$0xff]  }
 0x2be   : > { %8526 = vmatprep.subr.bf16.mxu0 %v9786_v0 }
 0x2bf   : > { %8691 = vmatpush3.bf16.msra.mxu1 %v9568_v20  ;;  %v9592_v20 = vld [vmem:[%s11637_s3 + $0x140] sm:$0xff]  }
 0x2c0   : > { %8692 = vmatprep.subr.bf16.mxu1 %v9786_v0 }
 0x2c1   : > { %8527 = vmatpush3.bf16.msra.mxu0 %v9569_v49  ;;  %v2582_v49 = vld [vmem:[#allocation2 + $0x8] sm:$0xe] }
 0x2c2   : > { %8528 = vmatprep.subr.bf16.mxu0 %v9786_v0  ;;  %8681 = vmatmul.mubr.bf16.gmra.mrb[8].mxu1 %v11666_v29  ;;  %v9594_v29 = vld [vmem:[%s11637_s3 + $0x148] sm:$0xff]  }
 0x2c3   : > { %8693 = vmatpush3.bf16.msra.mxu1 %v9570_v47  ;;  %8700 = vmatprep.mubr.msk.bf16.mxu1 %vm9787_vm1, %v9786_v0  ;;  %v9593_v47 = vld [vmem:[%s11637_s3 + $0x2b8] sm:$0xff]  }
 0x2c4   : > { %8694 = vmatprep.subr.bf16.mxu1 %v9786_v0 }
 0x2c5   : > { %8529 = vmatpush3.bf16.msra.mxu0 %v9571_v63  ;;  %v10737_v63 = vcombine.low %v2582_v49, %v10278_v30  ;;  %v9597_v30 = vld [vmem:[%s11637_s3 + $0x2c0] sm:$0xff]   ;;  %v11668_v49 = vshll.u32 %v10283_v55, 16 }
 0x2c6   : > { %8530 = vmatprep.subr.bf16.mxu0 %v9786_v0 }
 0x2c7   : > { %8695 = vmatpush3.bf16.msra.mxu1 %v9572_v58  ;;  %v2621_v58 = vrot.slane %v10283_v55, 1 }
 0x2c8   : > { %8696 = vmatprep.subr.bf16.mxu1 %v9786_v0 }
 0x2c9   : > { %8531 = vmatpush3.bf16.msra.mxu0 %v9573_v38  ;;  %v2620_v38 = vrot.slane %v10737_v63, 1 }
 0x2ca   : > { %8544 = vmatprep.subr.bf16.mxu0 %v9786_v0 }
 0x2cb   : > { %8697 = vmatpush3.bf16.msra.mxu1 %v9574_v22  ;;  %v9599_v22 = vld [vmem:[%s11637_s3 + $0x150] sm:$0xff]  }
 0x2cc   : > { %8533 = vmatmul.mubr.bf16.vlgmr.msra.gmra.mrb[76].mxu0 %v10168_v39  ;;  %8698 = vmatprep.subr.bf16.mxu1 %v9786_v0  ;;  %v9578_v39 = vld [vmem:[%s11637_s3 + $0x280] sm:$0xff]  }
 0x2cd   : > { %8545 = vmatpush3.bf16.msra.mxu0 %v9575_v41  ;;  %8536 = vmatprep.mubr.msk.bf16.mxu0 %vm9787_vm1, %v9786_v0  ;;  %v2622_v41 = vsel %vm745_vm6, %v2620_v38, %v2621_v58 }
 0x2ce   : > { %8546 = vmatprep.subr.bf16.mxu0 %v9786_v0 }
 0x2cf   : > { %8699 = vmatpush3.bf16.msra.mxu1 %v9576_v53 }
 0x2d0   : > { %8712 = vmatprep.subr.bf16.mxu1 %v9786_v0 }
 0x2d1   : > { %8547 = vmatpush3.bf16.msra.mxu0 %v9577_v34  ;;  %v9600_v34 = vld [vmem:[%s11637_s3 + $0x2c8] sm:$0xff]  }
 0x2d2   : > { %8548 = vmatprep.subr.bf16.mxu0 %v9786_v0  ;;  %8701 = vmatmul.mubr.bf16.vlgmr.msra.gmra.mrb[0].mxu1 %v10234_v24  ;;  %v9582_v24 = vld [vmem:[%s11637_s3 + $0x290] sm:$0xff]  }
 0x2d3   : > { %8713 = vmatpush3.bf16.msra.mxu1 %v9578_v39  ;;  %8704 = vmatprep.mubr.msk.bf16.mxu1 %vm9787_vm1, %v9786_v0  ;;  %v9601_v39 = vld [vmem:[%s11637_s3 + $0x158] sm:$0xff]  }
 0x2d4   : > { %8537 = vmatmul.mubr.bf16.gmra.mrb[80].mxu0 %v10266_v45  ;;  %8714 = vmatprep.subr.bf16.mxu1 %v9786_v0  ;;  %v9583_v45 = vld [vmem:[%s11637_s3 + $0x120] sm:$0xff]  }
 0x2d5   : > { %8549 = vmatpush3.bf16.msra.mxu0 %v9579_v21  ;;  %8540 = vmatprep.mubr.msk.bf16.mxu0 %vm9787_vm1, %v9786_v0  ;;  %v9604_v21 = vld [vmem:[%s11637_s3 + $0x160] sm:$0xff]  }
 0x2d6   : > { %8550 = vmatprep.subr.bf16.mxu0 %v9786_v0 }
 0x2d7   : > { %8715 = vmatpush3.bf16.msra.mxu1 %v9580_v43 }
 0x2d8   : > { %8716 = vmatprep.subr.bf16.mxu1 %v9786_v0 }
 0x2d9   : > { %8551 = vmatpush3.bf16.msra.mxu0 %v9581_v25  ;;  %v9605_v25 = vld [vmem:[%s11637_s3 + $0x2d8] sm:$0xff]  }
 0x2da   : > { %8552 = vmatprep.subr.bf16.mxu0 %v9786_v0  ;;  %8705 = vmatmul.mubr.bf16.gmra.mrb[4].mxu1 %v10297_v6  ;;  %v9587_v6 = vld [vmem:[%s11637_s3 + $0x130] sm:$0xff]  }
 0x2db   : > { %8717 = vmatpush3.bf16.msra.mxu1 %v9582_v24  ;;  %8708 = vmatprep.mubr.msk.bf16.mxu1 %vm9787_vm1, %v9786_v0  ;;  %v9606_v24 = vld [vmem:[%s11637_s3 + $0x168] sm:$0xff]  }
 0x2dc   : > { %8541 = vmatmul.mubr.bf16.gmra.mrb[84].mxu0 %v10247_v36  ;;  %8718 = vmatprep.subr.bf16.mxu1 %v9786_v0  ;;  %v9586_v36 = vld [vmem:[%s11637_s3 + $0x2a0] sm:$0xff]  }
 0x2dd   : > { %8553 = vmatpush3.bf16.msra.mxu0 %v9583_v45  ;;  %8560 = vmatprep.mubr.msk.bf16.mxu0 %vm9787_vm1, %v9786_v0  ;;  %v9608_v45 = vld [vmem:[%s11637_s3 + $0x170] sm:$0xff]  }
 0x2de   : > { %8554 = vmatprep.subr.bf16.mxu0 %v9786_v0 }
 0x2df   : > { %8719 = vmatpush3.bf16.msra.mxu1 %v9584_v42  ;;  %v9609_v42 = vld [vmem:[%s11637_s3 + $0x2e8] sm:$0xff]  }
 0x2e0   : > { %8720 = vmatprep.subr.bf16.mxu1 %v9786_v0 }
 0x2e1   : > { %8555 = vmatpush3.bf16.msra.mxu0 %v9585_v57  ;;  %v9610_v57 = vld [vmem:[%s11637_s3 + $0x178] sm:$0xff]  }
 0x2e2   : > { %8556 = vmatprep.subr.bf16.mxu0 %v9786_v0  ;;  %8709 = vmatmul.mubr.bf16.gmra.mrb[8].mxu1 %v10281_v54  ;;  %v9590_v54 = vld [vmem:[%s11637_s3 + $0x2b0] sm:$0xff]  }
 0x2e3   : > { %8721 = vmatpush3.bf16.msra.mxu1 %v9586_v36  ;;  %8728 = vmatprep.mubr.msk.bf16.mxu1 %vm9787_vm1, %v9786_v0  ;;  %v9611_v36 = vld [vmem:[%s11637_s3 + $0x2f0] sm:$0xff]  }
 0x2e4   : > { %8722 = vmatprep.subr.bf16.mxu1 %v9786_v0 }
 0x2e5   : > { %8557 = vmatpush3.bf16.msra.mxu0 %v9587_v6  ;;  %v2757_v6 = vshrl.u32 %v10737_v63, 16 }
 0x2e6   : > { %8558 = vmatprep.subr.bf16.mxu0 %v9786_v0 }
 0x2e7   : > { %8723 = vmatpush3.bf16.msra.mxu1 %v9588_v8  ;;  %v2760_v8 = vshll.u32 %v10737_v63, 16  ;;  %v9614_v63 = vld [vmem:[%s11637_s3 + $0x2f8] sm:$0xff]  }
 0x2e8   : > { %8724 = vmatprep.subr.bf16.mxu1 %v9786_v0 }
 0x2e9   : > { %8559 = vmatpush3.bf16.msra.mxu0 %v9589_v12  ;;  %v10823_v12 = vld [vmem:[%s11637_s3 + $0x600] sm:$0xff]  }
 0x2ea   : > { %8572 = vmatprep.subr.bf16.mxu0 %v9786_v0 }
 0x2eb   : > { %8725 = vmatpush3.bf16.msra.mxu1 %v9590_v54  ;;  %v11667_v54 = vshrl.u32 %v10283_v55, 16 }
 0x2ec   : > { %8561 = vmatmul.mubr.bf16.vlgmr.msra.gmra.mrb[76].mxu0 %v10162_v35  ;;  %8726 = vmatprep.subr.bf16.mxu1 %v9786_v0  ;;  %v2587_v35 = vld [vmem:[#allocation2 + $0x1c] sm:$0x3] }
 0x2ed   : > { %8573 = vmatpush3.bf16.msra.mxu0 %v9592_v20  ;;  %8564 = vmatprep.mubr.msk.bf16.mxu0 %vm9787_vm1, %v9786_v0  ;;  %v10758_v53 = vcombine.low %v10302_v7, %v2587_v35  ;;  %v2767_v20 = vrot.slane %v11667_v54, 1  ;;  %v10839_v35 = vld [vmem:[%s11637_s3 + $0x608] sm:$0xff]  }
 0x2ee   : > { %8574 = vmatprep.subr.bf16.mxu0 %v9786_v0 }
 0x2ef   : > { %8727 = vmatpush3.bf16.msra.mxu1 %v9593_v47  ;;  %v2623_v7 = vrot.slane %v10758_v53, 1  ;;  %v2770_v47 = vrot.slane %v11668_v49, 2  ;;  %v2777_v38 = vshll.u32 %v10758_v53, 16  ;;  %v10911_v49 = vld [vmem:[%s11637_s3 + $0x630] sm:$0xff]  }
 0x2f0   : > { %8740 = vmatprep.subr.bf16.mxu1 %v9786_v0 }
 0x2f1   : > { %8575 = vmatpush3.bf16.msra.mxu0 %v9594_v29  ;;  %v2624_v43 = vsel %vm745_vm6, %v2621_v58, %v2623_v7  ;;  %v2759_v29 = vrot.slane %v2757_v6, 1  ;;  %v2762_v58 = vrot.slane %v2760_v8, 2  ;;  %v2771_v55 = vor.u32 %v2770_v47, %v2767_v20  ;;  %v9625_v20 = vld [vmem:[%s11637_s3 + $0x320] sm:$0xff]   ;;  %v9627_v47 = vld [vmem:[%s11637_s3 + $0x328] sm:$0xff]  }
 0x2f2   : > { %8576 = vmatprep.subr.bf16.mxu0 %v9786_v0  ;;  %8729 = vmatmul.mubr.bf16.vlgmr.msra.gmra.mrb[0].mxu1 %v2622_v41  ;;  %v10854_v41 = vld [vmem:[%s11637_s3 + $0x610] sm:$0xff]  }
 0x2f3   : > { %8741 = vmatpush3.bf16.msra.mxu1 %v9597_v30  ;;  %8732 = vmatprep.mubr.msk.bf16.mxu1 %vm9787_vm1, %v9786_v0  ;;  %v2763_v30 = vor.u32 %v2762_v58, %v2759_v29  ;;  %v9629_v29 = vld [vmem:[%s11637_s3 + $0x330] sm:$0xff]  }
 0x2f4   : > { %8565 = vmatmul.mubr.bf16.gmra.mrb[80].mxu0 %v10289_v56  ;;  %8742 = vmatprep.subr.bf16.mxu1 %v9786_v0  ;;  %v9603_v56 = vld [vmem:[%s11637_s3 + $0x2d0] sm:$0xff]  }
 0x2f5   : > { %8577 = vmatpush3.bf16.msra.mxu0 %v9599_v22  ;;  %8568 = vmatprep.mubr.msk.bf16.mxu0 %vm9787_vm1, %v9786_v0  ;;  %v9616_v22 = vld [vmem:[%s11637_s3 + $0x300] sm:$0xff]   ;;  %v9630_v58 = vld [vmem:[#allocation2 + $0x14] sm:$0xff]  }
 0x2f6   : > { %8578 = vmatprep.subr.bf16.mxu0 %v9786_v0 }
 0x2f7   : > { %8743 = vmatpush3.bf16.msra.mxu1 %v9600_v34  ;;  %v2772_v34 = vsel %vm1533_vm10, %v2763_v30, %v2771_v55  ;;  %v9636_v30 = vld [vmem:[%s11637_s3 + $0x350] sm:$0xff]  }
 0x2f8   : > { %8744 = vmatprep.subr.bf16.mxu1 %v9786_v0 }
 0x2f9   : > { %8579 = vmatpush3.bf16.msra.mxu0 %v9601_v39  ;;  %v2779_v39 = vrot.slane %v2777_v38, 2  ;;  %v9634_v38 = vld [vmem:[%s11637_s3 + $0x348] sm:$0xff]  }
 0x2fa   : > { %8580 = vmatprep.subr.bf16.mxu0 %v9786_v0  ;;  %8733 = vmatmul.mubr.bf16.gmra.mrb[4].mxu1 %v2624_v43  ;;  %v1872_v43 = vshrl.u32 %v10305_v10, 16  ;;  %v9623_v10 = vld [vmem:[%s11637_s3 + $0x318] sm:$0xff]  }
 0x2fb   : > { %8745 = vmatpush3.bf16.msra.mxu1 %v9603_v56  ;;  %8736 = vmatprep.mubr.msk.bf16.mxu1 %vm9787_vm1, %v9786_v0  ;;  %v10867_v56 = vld [vmem:[%s11637_s3 + $0x618] sm:$0xff]  }
 0x2fc   : > { %8569 = vmatmul.mubr.bf16.gmra.mrb[84].mxu0 %v10268_v40  ;;  %8746 = vmatprep.subr.bf16.mxu1 %v9786_v0  ;;  %v9607_v40 = vld [vmem:[%s11637_s3 + $0x2e0] sm:$0xff]  }
 0x2fd   : > { %8581 = vmatpush3.bf16.msra.mxu0 %v9604_v21  ;;  %8588 = vmatprep.mubr.msk.bf16.mxu0 %vm9787_vm1, %v9786_v0 }
 0x2fe   : > { %8582 = vmatprep.subr.bf16.mxu0 %v9786_v0 }
 0x2ff   : > { %8747 = vmatpush3.bf16.msra.mxu1 %v9605_v25  ;;  %v10883_v25 = vld [vmem:[%s11637_s3 + $0x620] sm:$0xff]  }
 0x300   : > { %8748 = vmatprep.subr.bf16.mxu1 %v9786_v0 }
 0x301   : > { %8583 = vmatpush3.bf16.msra.mxu0 %v9606_v24 }
 0x302   : > { %8584 = vmatprep.subr.bf16.mxu0 %v9786_v0  ;;  %8737 = vmatmul.mubr.bf16.gmra.mrb[8].mxu1 %v2623_v7  ;;  %v9619_v7 = vld [vmem:[%s11637_s3 + $0x308] sm:$0xff]  }
 0x303   : > { %8749 = vmatpush3.bf16.msra.mxu1 %v9607_v40  ;;  %8756 = vmatprep.mubr.msk.bf16.mxu1 %vm9787_vm1, %v9786_v0  ;;  %v1874_v40 = vor.u32 %v1872_v43, %v10327_v31  ;;  %v10896_v31 = vld [vmem:[%s11637_s3 + $0x628] sm:$0xff]   ;;  %v9648_v43 = vld [vmem:[%s11637_s3 + $0x3b0] sm:$0xff]  }
 0x304   : > { %8750 = vmatprep.subr.bf16.mxu1 %v9786_v0 }
 0x305   : > { %8585 = vmatpush3.bf16.msra.mxu0 %v9608_v45  ;;  %v1010_v45 = vpop.f32.mrb[72].mxu0 }
 0x306   : > { %8586 = vmatprep.subr.bf16.mxu0 %v9786_v0 }
 0x307   : > { %8751 = vmatpush3.bf16.msra.mxu1 %v9609_v42  ;;  %v1074_v42 = vld [vmem:[#allocation2 + $0x28] sm:$0x1] }
 0x308   : > { %8752 = vmatprep.subr.bf16.mxu1 %v9786_v0 }
 0x309   : > { %8587 = vmatpush3.bf16.msra.mxu0 %v9610_v57  ;;  %v8053_v57 = vpack.c.bf16 %v1010_v45, %v1010_v45  ;;  %v9656_v45 = vld [vmem:[%s11637_s3 + $0x3e0] sm:$0xff]  }
 0x30a   : > { %9104 = vmatprep.subr.bf16.mxu0 %v9786_v0 }
 0x30b   : > { %8753 = vmatpush3.bf16.msra.mxu1 %v9611_v36  ;;  %v1012_v36 = vpop.f32.mrb[73].mxu0  ;;  %v1075_v8 = vsel %vm1073_vm15, %v8053_v57, %v1074_v42  ;;  %v9657_v42 = vld [vmem:[%s11637_s3 + $0x3e8] sm:$0xff]   ;;  %v9738_v57 = vld [vmem:[#allocation2 + $0x10] sm:$0xf] }
 0x30c   : > { %8589 = vmatmul.mubr.bf16.vlgmr.msra.gmra.mrb[76].mxu0 %v10316_v2  ;;  %8754 = vmatprep.subr.bf16.mxu1 %v9786_v0  ;;  %v2774_v2 = vshrl.u32 %v10758_v53, 16  ;;  %v1013_v6 = vpop.f32.mrb[74].mxu0  ;;  %1076 = vst [vmem:[#allocation2 + $0x28] sm:$0x1] %v1075_v8  ;;  %v9658_v8 = vld [vmem:[%s11637_s3 + $0x3f0] sm:$0xff]  }
 0x30d   : > { %9105 = vmatpush3.bf16.msra.mxu0 %v10823_v12  ;;  %8592 = vmatprep.mubr.msk.bf16.mxu0 %vm9787_vm1, %v9786_v0  ;;  %v1014_v54 = vpop.f32.mrb[75].mxu0  ;;  %v3342_v6 = vld [vmem:[#allocation2 + $0x20] sm:$0x3] }
 0x30e   : > { %9106 = vmatprep.subr.bf16.mxu0 %v9786_v0  ;;  %v2776_v53 = vrot.slane %v2774_v2, 1  ;;  %v9633_v2 = vld [vmem:[%s11637_s3 + $0x340] sm:$0xff]  }
 0x30f   : > { %8755 = vmatpush3.bf16.msra.mxu1 %v9614_v63  ;;  %v10924_v63 = vld [vmem:[%s11637_s3 + $0x638] sm:$0xff]  }
 0x310   : > { %8768 = vmatprep.subr.bf16.mxu1 %v9786_v0  ;;  %v2780_v21 = vor.u32 %v2779_v39, %v2776_v53  ;;  %v9640_v53 = vld [vmem:[%s11637_s3 + $0x370] sm:$0xff]   ;;  %v9642_v39 = vld [vmem:[%s11637_s3 + $0x380] sm:$0xff]  }
 0x311   : > { %9107 = vmatpush3.bf16.msra.mxu0 %v10839_v35 }
 0x312   : > { %9108 = vmatprep.subr.bf16.mxu0 %v9786_v0  ;;  %8757 = vmatmul.mubr.bf16.vlgmr.msra.gmra.mrb[0].mxu1 %v2772_v34  ;;  %v2781_v24 = vsel %vm1533_vm10, %v2771_v55, %v2780_v21  ;;  %v9631_v55 = vld [vmem:[%s11637_s3 + $0x338] sm:$0xff]   ;;  %v11669_v34 = vrot.slane %v10331_v27, 2 }
 0x313   : > { %8769 = vmatpush3.bf16.msra.mxu1 %v9616_v22  ;;  %8760 = vmatprep.mubr.msk.bf16.mxu1 %vm9787_vm1, %v9786_v0  ;;  %v9638_v22 = vld [vmem:[%s11637_s3 + $0x360] sm:$0xff]   ;;  %v9641_v27 = vld [vmem:[%s11637_s3 + $0x378] sm:$0xff]  }
 0x314   : > { %8593 = vmatmul.mubr.bf16.gmra.mrb[80].mxu0 %v10343_v51  ;;  %8770 = vmatprep.subr.bf16.mxu1 %v9786_v0  ;;  %v9621_v51 = vld [vmem:[%s11637_s3 + $0x310] sm:$0xff]  }
 0x315   : > { %9109 = vmatpush3.bf16.msra.mxu0 %v10854_v41  ;;  %8596 = vmatprep.mubr.msk.bf16.mxu0 %vm9787_vm1, %v9786_v0 }
 0x316   : > { %9110 = vmatprep.subr.bf16.mxu0 %v9786_v0 }
 0x317   : > { %8771 = vmatpush3.bf16.msra.mxu1 %v9619_v7  ;;  %v9643_v7 = vld [vmem:[%s11637_s3 + $0x388] sm:$0xff]  }
 0x318   : > { %8772 = vmatprep.subr.bf16.mxu1 %v9786_v0 }
 0x319   : > { %9111 = vmatpush3.bf16.msra.mxu0 %v10867_v56 }
 0x31a   : > { %9112 = vmatprep.subr.bf16.mxu0 %v9786_v0  ;;  %8761 = vmatmul.mubr.bf16.gmra.mrb[4].mxu1 %v2781_v24  ;;  %v9651_v24 = vld [vmem:[%s11637_s3 + $0x3c0] sm:$0xff]  }
 0x31b   : > { %8773 = vmatpush3.bf16.msra.mxu1 %v9621_v51  ;;  %8764 = vmatprep.mubr.msk.bf16.mxu1 %vm9787_vm1, %v9786_v0  ;;  %v9646_v51 = vld [vmem:[%s11637_s3 + $0x3a0] sm:$0xff]  }
 0x31c   : > { %8597 = vmatmul.mubr.bf16.gmra.mrb[84].mxu0 %v1874_v40  ;;  %8774 = vmatprep.subr.bf16.mxu1 %v9786_v0  ;;  %v9652_v40 = vld [vmem:[%s11637_s3 + $0x3c8] sm:$0xff]  }
 0x31d   : > { %9113 = vmatpush3.bf16.msra.mxu0 %v10883_v25  ;;  %9120 = vmatprep.mubr.msk.bf16.mxu0 %vm9787_vm1, %v9786_v0 }
 0x31e   : > { %9114 = vmatprep.subr.bf16.mxu0 %v9786_v0 }
 0x31f   : > { %8775 = vmatpush3.bf16.msra.mxu1 %v9623_v10  ;;  %v9654_v10 = vld [vmem:[%s11637_s3 + $0x3d0] sm:$0xff]  }
 0x320   : > { %8776 = vmatprep.subr.bf16.mxu1 %v9786_v0 }
 0x321   : > { %9115 = vmatpush3.bf16.msra.mxu0 %v10896_v31 }
 0x322   : > { %9116 = vmatprep.subr.bf16.mxu0 %v9786_v0  ;;  %8765 = vmatmul.mubr.bf16.gmra.mrb[8].mxu1 %v2780_v21  ;;  %v9644_v21 = vld [vmem:[%s11637_s3 + $0x390] sm:$0xff]  }
 0x323   : > { %8777 = vmatpush3.bf16.msra.mxu1 %v9625_v20  ;;  %8784 = vmatprep.mubr.msk.bf16.mxu1 %vm9787_vm1, %v9786_v0  ;;  %v3386_v20 = vrot.slane %v10393_v61, 1  ;;  %v9662_v61 = vld [vmem:[%s11637_s3 + $0x400] sm:$0xff]  }
 0x324   : > { %8778 = vmatprep.subr.bf16.mxu1 %v9786_v0 }
 0x325   : > { %9117 = vmatpush3.bf16.msra.mxu0 %v10911_v49 }
 0x326   : > { %9118 = vmatprep.subr.bf16.mxu0 %v9786_v0 }
 0x327   : > { %8779 = vmatpush3.bf16.msra.mxu1 %v9627_v47  ;;  %v3389_v47 = vrot.slane %v10411_v17, 2 }
 0x328   : > { %8780 = vmatprep.subr.bf16.mxu1 %v9786_v0 }
 0x329   : > { %9119 = vmatpush3.bf16.msra.mxu0 %v10924_v63 }
 0x32a   : > { %9132 = vmatprep.subr.bf16.mxu0 %v9786_v0 }
 0x32b   : > { %8781 = vmatpush3.bf16.msra.mxu1 %v9629_v29  ;;  %v7707_v29 = vcombine.low %v10413_v9, %v3342_v6  ;;  %v9680_v6 = vld [vmem:[%s11637_s3 + $0x478] sm:$0xff]  }
 0x32c   : > { %9121 = vmatmul.mubr.bf16.vlgmr.msra.gmra.mrb[88].mxu0 %v9630_v58  ;;  %8782 = vmatprep.subr.bf16.mxu1 %v9786_v0  ;;  %v9659_v58 = vld [vmem:[%s11637_s3 + $0x3f8] sm:$0xff]  }
 0x32d   : > { %9136 = vmatprep.mubr.msk.bf16.mxu0 %vm9787_vm1, %v9786_v0 }
 0x32f   : > { %8783 = vmatpush3.bf16.msra.mxu1 %v9631_v55 }
 0x330   : > { %8796 = vmatprep.subr.bf16.mxu1 %v9786_v0 }
 0x332   : > { %8785 = vmatmul.mubr.bf16.vlgmr.msra.gmra.mrb[0].mxu1 %v10346_v52  ;;  %v9637_v52 = vld [vmem:[%s11637_s3 + $0x358] sm:$0xff]  }
 0x333   : > { %8797 = vmatpush3.bf16.msra.mxu1 %v9633_v2  ;;  %8788 = vmatprep.mubr.msk.bf16.mxu1 %vm9787_vm1, %v9786_v0 }
 0x334   : > { %8798 = vmatprep.subr.bf16.mxu1 %v9786_v0 }
 0x337   : > { %8799 = vmatpush3.bf16.msra.mxu1 %v9634_v38  ;;  %v3390_v38 = vor.u32 %v3389_v47, %v3386_v20 }
 0x338   : > { %8800 = vmatprep.subr.bf16.mxu1 %v9786_v0 }
 0x33a   : > { %8789 = vmatmul.mubr.bf16.gmra.mrb[4].mxu1 %v10364_v11  ;;  %v9639_v11 = vld [vmem:[%s11637_s3 + $0x368] sm:$0xff]  }
 0x33b   : > { %8801 = vmatpush3.bf16.msra.mxu1 %v9636_v30  ;;  %8792 = vmatprep.mubr.msk.bf16.mxu1 %vm9787_vm1, %v9786_v0  ;;  %v3393_v30 = vshrl.u32 %v7707_v29, 16 }
 0x33c   : > { %8802 = vmatprep.subr.bf16.mxu1 %v9786_v0 }
 0x33d   : > { %v3395_v9 = vrot.slane %v3393_v30, 1  ;;  %v9687_v30 = vld [vmem:[%s11637_s3 + $0x4b0] sm:$0xff]  }
 0x33f   : > { %8803 = vmatpush3.bf16.msra.mxu1 %v9637_v52  ;;  %v3396_v52 = vshll.u32 %v7707_v29, 16  ;;  %v9685_v29 = vld [vmem:[%s11637_s3 + $0x4a0] sm:$0xff]  }
 0x340   : > { %8804 = vmatprep.subr.bf16.mxu1 %v9786_v0 }
 0x342   : > { %8793 = vmatmul.mubr.bf16.gmra.mrb[8].mxu1 %v11669_v34  ;;  %v3398_v34 = vrot.slane %v3396_v52, 2 }
 0x343   : > { %8805 = vmatpush3.bf16.msra.mxu1 %v9638_v22  ;;  %8812 = vmatprep.mubr.msk.bf16.mxu1 %vm9787_vm1, %v9786_v0 }
 0x344   : > { %8806 = vmatprep.subr.bf16.mxu1 %v9786_v0 }
 0x347   : > { %8807 = vmatpush3.bf16.msra.mxu1 %v9639_v11  ;;  %v9663_v11 = vld [vmem:[%s11637_s3 + $0x408] sm:$0xff]  }
 0x348   : > { %8808 = vmatprep.subr.bf16.mxu1 %v9786_v0 }
 0x34b   : > { %8809 = vmatpush3.bf16.msra.mxu1 %v9640_v53  ;;  %v3399_v53 = vor.u32 %v3398_v34, %v3395_v9  ;;  %v9690_v9 = vld [vmem:[%s11637_s3 + $0x4c0] sm:$0xff]  }
 0x34c   : > { %8810 = vmatprep.subr.bf16.mxu1 %v9786_v0 }
 0x34f   : > { %8811 = vmatpush3.bf16.msra.mxu1 %v9641_v27  ;;  %v9665_v27 = vld [vmem:[%s11637_s3 + $0x410] sm:$0xff]  }
 0x350   : > { %8824 = vmatprep.subr.bf16.mxu1 %v9786_v0 }
 0x352   : > { %8813 = vmatmul.mubr.bf16.vlgmr.msra.gmra.mrb[0].mxu1 %v10373_v37  ;;  %v9645_v37 = vld [vmem:[%s11637_s3 + $0x398] sm:$0xff]  }
 0x353   : > { %8825 = vmatpush3.bf16.msra.mxu1 %v9642_v39  ;;  %8816 = vmatprep.mubr.msk.bf16.mxu1 %vm9787_vm1, %v9786_v0  ;;  %v3400_v39 = vsel %vm1533_vm10, %v3390_v38, %v3399_v53 }
 0x354   : > { %8826 = vmatprep.subr.bf16.mxu1 %v9786_v0 }
 0x357   : > { %8827 = vmatpush3.bf16.msra.mxu1 %v9643_v7  ;;  %v9666_v7 = vld [vmem:[%s11637_s3 + $0x418] sm:$0xff]  }
 0x358   : > { %8828 = vmatprep.subr.bf16.mxu1 %v9786_v0 }
 0x35a   : > { %8817 = vmatmul.mubr.bf16.gmra.mrb[4].mxu1 %v10404_v5  ;;  %v9647_v5 = vld [vmem:[%s11637_s3 + $0x3a8] sm:$0xff]  }
 0x35b   : > { %8829 = vmatpush3.bf16.msra.mxu1 %v9644_v21  ;;  %8820 = vmatprep.mubr.msk.bf16.mxu1 %vm9787_vm1, %v9786_v0  ;;  %v9667_v21 = vld [vmem:[%s11637_s3 + $0x420] sm:$0xff]  }
 0x35c   : > { %8830 = vmatprep.subr.bf16.mxu1 %v9786_v0 }
 0x35f   : > { %8831 = vmatpush3.bf16.msra.mxu1 %v9645_v37  ;;  %v9668_v37 = vld [vmem:[%s11637_s3 + $0x428] sm:$0xff]  }
 0x360   : > { %8832 = vmatprep.subr.bf16.mxu1 %v9786_v0 }
 0x362   : > { %8821 = vmatmul.mubr.bf16.gmra.mrb[8].mxu1 %v10382_v50  ;;  %v9649_v50 = vld [vmem:[%s11637_s3 + $0x3b8] sm:$0xff]  }
 0x363   : > { %8833 = vmatpush3.bf16.msra.mxu1 %v9646_v51  ;;  %8840 = vmatprep.mubr.msk.bf16.mxu1 %vm9787_vm1, %v9786_v0  ;;  %v9669_v51 = vld [vmem:[%s11637_s3 + $0x430] sm:$0xff]  }
 0x364   : > { %8834 = vmatprep.subr.bf16.mxu1 %v9786_v0 }
 0x367   : > { %8835 = vmatpush3.bf16.msra.mxu1 %v9647_v5  ;;  %v9670_v5 = vld [vmem:[%s11637_s3 + $0x438] sm:$0xff]  }
 0x368   : > { %8836 = vmatprep.subr.bf16.mxu1 %v9786_v0 }
 0x36b   : > { %8837 = vmatpush3.bf16.msra.mxu1 %v9648_v43  ;;  %v9739_v43 = vld [vmem:[#allocation2 + $0x14] sm:$0xff]  }
 0x36c   : > { %8838 = vmatprep.subr.bf16.mxu1 %v9786_v0 }
 0x36f   : > { %8839 = vmatpush3.bf16.msra.mxu1 %v9649_v50  ;;  %v3541_v50 = vrot.slane %v9739_v43, 2  ;;  %v9697_v43 = vld [vmem:[%s11637_s3 + $0x4f0] sm:$0xff]  }
 0x370   : > { %8852 = vmatprep.subr.bf16.mxu1 %v9786_v0 }
 0x372   : > { %8841 = vmatmul.mubr.bf16.vlgmr.msra.gmra.mrb[0].mxu1 %v10376_v33  ;;  %v9655_v33 = vld [vmem:[%s11637_s3 + $0x3d8] sm:$0xff]  }
 0x373   : > { %8853 = vmatpush3.bf16.msra.mxu1 %v9651_v24  ;;  %8844 = vmatprep.mubr.msk.bf16.mxu1 %vm9787_vm1, %v9786_v0  ;;  %v3540_v24 = vrot.slane %v10395_v23, 2  ;;  %v3543_v23 = vrot.slane %v10419_v16, 2  ;;  %v9677_v16 = vld [vmem:[%s11637_s3 + $0x460] sm:$0xff]  }
 0x374   : > { %8854 = vmatprep.subr.bf16.mxu1 %v9786_v0 }
 0x377   : > { %8855 = vmatpush3.bf16.msra.mxu1 %v9652_v40  ;;  %v9672_v40 = vld [vmem:[%s11637_s3 + $0x440] sm:$0xff]  }
 0x378   : > { %8856 = vmatprep.subr.bf16.mxu1 %v9786_v0 }
 0x37a   : > { %8845 = vmatmul.mubr.bf16.gmra.mrb[4].mxu1 %v10408_v4  ;;  %v3337_v4 = vld [vmem:[#allocation2 + $0xc] sm:$0xe] }
 0x37b   : > { %8857 = vmatpush3.bf16.msra.mxu1 %v9654_v10  ;;  %8848 = vmatprep.mubr.msk.bf16.mxu1 %vm9787_vm1, %v9786_v0  ;;  %v7705_v36 = vcombine.low %v3337_v4, %v9738_v57  ;;  %v3542_v10 = vsel %vm1694_vm9, %v3540_v24, %v3541_v50  ;;  %v3544_v4 = vsel %vm1694_vm9, %v3541_v50, %v3543_v23  ;;  %v9678_v57 = vld [vmem:[%s11637_s3 + $0x468] sm:$0xff]   ;;  %v9699_v50 = vld [vmem:[%s11637_s3 + $0x500] sm:$0xff]  }
 0x37c   : > { %8858 = vmatprep.subr.bf16.mxu1 %v9786_v0  ;;  %v9700_v24 = vld [vmem:[%s11637_s3 + $0x508] sm:$0xff]  }
 0x37d   : > { %v3379_v54 = vshll.u32 %v7705_v36, 16 }
 0x37f   : > { %8859 = vmatpush3.bf16.msra.mxu1 %v9655_v33  ;;  %v3381_v2 = vrot.slane %v3379_v54, 2  ;;  %v9673_v33 = vld [vmem:[%s11637_s3 + $0x448] sm:$0xff]   ;;  %v9683_v54 = vld [vmem:[%s11637_s3 + $0x490] sm:$0xff]  }
 0x380   : > { %8860 = vmatprep.subr.bf16.mxu1 %v9786_v0 }
 0x382   : > { %8849 = vmatmul.mubr.bf16.gmra.mrb[8].mxu1 %v10384_v46  ;;  %v3376_v46 = vshrl.u32 %v7705_v36, 16  ;;  %v9679_v36 = vld [vmem:[%s11637_s3 + $0x470] sm:$0xff]  }
 0x383   : > { %8861 = vmatpush3.bf16.msra.mxu1 %v9656_v45  ;;  %8868 = vmatprep.mubr.msk.bf16.mxu1 %vm9787_vm1, %v9786_v0  ;;  %v9675_v45 = vld [vmem:[%s11637_s3 + $0x450] sm:$0xff]  }
 0x384   : > { %8862 = vmatprep.subr.bf16.mxu1 %v9786_v0  ;;  %v3378_v55 = vrot.slane %v3376_v46, 1  ;;  %v9682_v46 = vld [vmem:[%s11637_s3 + $0x488] sm:$0xff]  }
 0x386   : > { %v3382_v22 = vor.u32 %v3381_v2, %v3378_v55  ;;  %v9686_v55 = vld [vmem:[%s11637_s3 + $0x4a8] sm:$0xff]  }
 0x387   : > { %8863 = vmatpush3.bf16.msra.mxu1 %v9657_v42  ;;  %v9676_v42 = vld [vmem:[%s11637_s3 + $0x458] sm:$0xff]  }
 0x388   : > { %8864 = vmatprep.subr.bf16.mxu1 %v9786_v0  ;;  %v3391_v17 = vsel %vm1533_vm10, %v3382_v22, %v3390_v38  ;;  %v9688_v22 = vld [vmem:[%s11637_s3 + $0x4b8] sm:$0xff]  }
 0x38b   : > { %8865 = vmatpush3.bf16.msra.mxu1 %v9658_v8  ;;  %v9681_v8 = vld [vmem:[%s11637_s3 + $0x480] sm:$0xff]  }
 0x38c   : > { %8866 = vmatprep.subr.bf16.mxu1 %v9786_v0 }
 0x38f   : > { %8867 = vmatpush3.bf16.msra.mxu1 %v9659_v58 }
 0x390   : > { %8880 = vmatprep.subr.bf16.mxu1 %v9786_v0 }
 0x392   : > { %8869 = vmatmul.mubr.bf16.vlgmr.msra.gmra.mrb[0].mxu1 %v3391_v17 }
 0x393   : > { %8881 = vmatpush3.bf16.msra.mxu1 %v9662_v61  ;;  %8872 = vmatprep.mubr.msk.bf16.mxu1 %vm9787_vm1, %v9786_v0 }
 0x394   : > { %8882 = vmatprep.subr.bf16.mxu1 %v9786_v0 }
 0x397   : > { %8883 = vmatpush3.bf16.msra.mxu1 %v9663_v11 }
 0x398   : > { %8884 = vmatprep.subr.bf16.mxu1 %v9786_v0 }
 0x39a   : > { %8873 = vmatmul.mubr.bf16.gmra.mrb[4].mxu1 %v3400_v39 }
 0x39b   : > { %8885 = vmatpush3.bf16.msra.mxu1 %v9665_v27  ;;  %8876 = vmatprep.mubr.msk.bf16.mxu1 %vm9787_vm1, %v9786_v0  ;;  %v9693_v27 = vld [vmem:[%s11637_s3 + $0x4d0] sm:$0xff]  }
 0x39c   : > { %8886 = vmatprep.subr.bf16.mxu1 %v9786_v0 }
 0x39f   : > { %8887 = vmatpush3.bf16.msra.mxu1 %v9666_v7 }
 0x3a0   : > { %8888 = vmatprep.subr.bf16.mxu1 %v9786_v0 }
 0x3a2   : > { %8877 = vmatmul.mubr.bf16.gmra.mrb[8].mxu1 %v3399_v53  ;;  %v9691_v53 = vld [vmem:[%s11637_s3 + $0x4c8] sm:$0xff]  }
 0x3a3   : > { %8889 = vmatpush3.bf16.msra.mxu1 %v9667_v21  ;;  %8896 = vmatprep.mubr.msk.bf16.mxu1 %vm9787_vm1, %v9786_v0  ;;  %v9695_v21 = vld [vmem:[%s11637_s3 + $0x4e0] sm:$0xff]  }
 0x3a4   : > { %8890 = vmatprep.subr.bf16.mxu1 %v9786_v0 }
 0x3a7   : > { %8891 = vmatpush3.bf16.msra.mxu1 %v9668_v37 }
 0x3a8   : > { %8892 = vmatprep.subr.bf16.mxu1 %v9786_v0 }
 0x3ab   : > { %8893 = vmatpush3.bf16.msra.mxu1 %v9669_v51  ;;  %v11670_v51 = vrot.slane %v10449_v15, 3  ;;  %v9698_v15 = vld [vmem:[%s11637_s3 + $0x4f8] sm:$0xff]  }
 0x3ac   : > { %8894 = vmatprep.subr.bf16.mxu1 %v9786_v0 }
 0x3af   : > { %8895 = vmatpush3.bf16.msra.mxu1 %v9670_v5  ;;  %v9696_v5 = vld [vmem:[%s11637_s3 + $0x4e8] sm:$0xff]  }
 0x3b0   : > { %8908 = vmatprep.subr.bf16.mxu1 %v9786_v0 }
 0x3b2   : > { %8897 = vmatmul.mubr.bf16.vlgmr.msra.gmra.mrb[0].mxu1 %v3542_v10  ;;  %v9703_v10 = vld [vmem:[%s11637_s3 + $0x520] sm:$0xff]  }
 0x3b3   : > { %8909 = vmatpush3.bf16.msra.mxu1 %v9672_v40  ;;  %8900 = vmatprep.mubr.msk.bf16.mxu1 %vm9787_vm1, %v9786_v0  ;;  %v9701_v40 = vld [vmem:[%s11637_s3 + $0x510] sm:$0xff]  }
 0x3b4   : > { %8910 = vmatprep.subr.bf16.mxu1 %v9786_v0 }
 0x3b7   : > { %8911 = vmatpush3.bf16.msra.mxu1 %v9673_v33  ;;  %v11671_v33 = vld [vmem:[#allocation7_spill] sm:$0xff] }
 0x3b8   : > { %8912 = vmatprep.subr.bf16.mxu1 %v9786_v0 }
 0x3ba   : > { %8901 = vmatmul.mubr.bf16.gmra.mrb[4].mxu1 %v3544_v4  ;;  %v9706_v4 = vld [vmem:[%s11637_s3 + $0x538] sm:$0xff]  }
 0x3bb   : > { %8913 = vmatpush3.bf16.msra.mxu1 %v9675_v45  ;;  %8904 = vmatprep.mubr.msk.bf16.mxu1 %vm9787_vm1, %v9786_v0  ;;  %v4108_v45 = vld [vmem:[#allocation2 + $0x10] sm:$0xc] }
 0x3bc   : > { %8914 = vmatprep.subr.bf16.mxu1 %v9786_v0 }
 0x3bf   : > { %8915 = vmatpush3.bf16.msra.mxu1 %v9676_v42  ;;  %v9740_v42 = vld [vmem:[#allocation2 + $0x14] sm:$0xf] }
 0x3c0   : > { %8916 = vmatprep.subr.bf16.mxu1 %v9786_v0 }
 0x3c2   : > { %8905 = vmatmul.mubr.bf16.gmra.mrb[8].mxu1 %v3543_v23  ;;  %v9705_v23 = vld [vmem:[%s11637_s3 + $0x530] sm:$0xff]  }
 0x3c3   : > { %8917 = vmatpush3.bf16.msra.mxu1 %v9677_v16  ;;  %8924 = vmatprep.mubr.msk.bf16.mxu1 %vm9787_vm1, %v9786_v0  ;;  %v7832_v16 = vcombine.low %v4108_v45, %v9740_v42  ;;  %v9720_v45 = vld [vmem:[%s11637_s3 + $0x590] sm:$0xff]   ;;  %v9721_v42 = vld [vmem:[%s11637_s3 + $0x598] sm:$0xff]  }
 0x3c4   : > { %8918 = vmatprep.subr.bf16.mxu1 %v9786_v0 }
 0x3c7   : > { %8919 = vmatpush3.bf16.msra.mxu1 %v9678_v57  ;;  %v9741_v57 = vld [vmem:[#allocation2 + $0x18] sm:$0xff]  }
 0x3c8   : > { %8920 = vmatprep.subr.bf16.mxu1 %v9786_v0 }
 0x3cb   : > { %8921 = vmatpush3.bf16.msra.mxu1 %v9679_v36  ;;  %v4147_v36 = vrot.slane %v9741_v57, 2  ;;  %v9723_v57 = vld [vmem:[%s11637_s3 + $0x5a8] sm:$0xff]  }
 0x3cc   : > { %8922 = vmatprep.subr.bf16.mxu1 %v9786_v0 }
 0x3cf   : > { %8923 = vmatpush3.bf16.msra.mxu1 %v9680_v6  ;;  %v4113_v6 = vld [vmem:[#allocation2 + $0x24] sm:$0x7] }
 0x3d0   : > { %8936 = vmatprep.subr.bf16.mxu1 %v9786_v0 }
 0x3d2   : > { %8925 = vmatmul.mubr.bf16.vlgmr.msra.gmra.mrb[0].mxu1 %v10454_v18  ;;  %v9684_v18 = vld [vmem:[%s11637_s3 + $0x498] sm:$0xff]  }
 0x3d3   : > { %8937 = vmatpush3.bf16.msra.mxu1 %v9681_v8  ;;  %8928 = vmatprep.mubr.msk.bf16.mxu1 %vm9787_vm1, %v9786_v0  ;;  %v4146_v8 = vrot.slane %v7832_v16, 2 }
 0x3d4   : > { %8938 = vmatprep.subr.bf16.mxu1 %v9786_v0 }
 0x3d7   : > { %8939 = vmatpush3.bf16.msra.mxu1 %v9682_v46  ;;  %v9709_v46 = vld [vmem:[%s11637_s3 + $0x540] sm:$0xff]  }
 0x3d8   : > { %8940 = vmatprep.subr.bf16.mxu1 %v9786_v0 }
 0x3da   : > { %8929 = vmatmul.mubr.bf16.gmra.mrb[4].mxu1 %v10481_v28 }
 0x3db   : > { %8941 = vmatpush3.bf16.msra.mxu1 %v9683_v54  ;;  %8932 = vmatprep.mubr.msk.bf16.mxu1 %vm9787_vm1, %v9786_v0  ;;  %v4148_v54 = vsel %vm1694_vm9, %v4146_v8, %v4147_v36  ;;  %v9727_v8 = vld [vmem:[%s11637_s3 + $0x5c0] sm:$0xff]  }
 0x3dc   : > { %8942 = vmatprep.subr.bf16.mxu1 %v9786_v0 }
 0x3df   : > { %v11170_v20 = vpop.f32.mrb[76].mxu0  ;;  %8943 = vmatpush3.bf16.msra.mxu1 %v9684_v18  ;;  %v9742_v18 = vld [vmem:[#allocation2 + $0x20] sm:$0xf] }
 0x3e0   : > { %v8590_v47 = vpop.f32.mrb[77].mxu0  ;;  %8944 = vmatprep.subr.bf16.mxu1 %v9786_v0 }
 0x3e1   : > { %v11175_v58 = vpop.f32.mrb[78].mxu0  ;;  %v7834_v47 = vcombine.low %v9742_v18, %v4113_v6  ;;  %v9725_v6 = vld [vmem:[%s11637_s3 + $0x5b8] sm:$0xff]   ;;  %v9732_v18 = vld [vmem:[%s11637_s3 + $0x5e0] sm:$0xff]  }
 0x3e2   : > { %v8591_v28 = vpop.f32.mrb[79].mxu0  ;;  %8933 = vmatmul.mubr.bf16.gmra.mrb[8].mxu1 %v10461_v19 }
 0x3e3   : > { %8945 = vmatpush3.bf16.msra.mxu1 %v9685_v29  ;;  %8952 = vmatprep.mubr.msk.bf16.mxu1 %vm9787_vm1, %v9786_v0  ;;  %v9710_v29 = vld [vmem:[%s11637_s3 + $0x548] sm:$0xff]   ;;  %v4149_v28 = vrot.slane %v7834_v47, 2 }
 0x3e4   : > { %8946 = vmatprep.subr.bf16.mxu1 %v9786_v0 }
 0x3e7   : > { %v11185_v2 = vpop.f32.mrb[80].mxu0  ;;  %8947 = vmatpush3.bf16.msra.mxu1 %v9686_v55  ;;  %v9712_v55 = vld [vmem:[%s11637_s3 + $0x550] sm:$0xff]  }
 0x3e8   : > { %v8594_v38 = vpop.f32.mrb[81].mxu0  ;;  %8948 = vmatprep.subr.bf16.mxu1 %v9786_v0 }
 0x3e9   : > { %v11190_v52 = vpop.f32.mrb[82].mxu0  ;;  %v4150_v38 = vsel %vm1694_vm9, %v4147_v36, %v4149_v28  ;;  %v9724_v36 = vld [vmem:[%s11637_s3 + $0x5b0] sm:$0xff]  }
 0x3ea   : > { %v8595_v19 = vpop.f32.mrb[83].mxu0 }
 0x3eb   : > { %8949 = vmatpush3.bf16.msra.mxu1 %v9687_v30  ;;  %v9713_v30 = vld [vmem:[%s11637_s3 + $0x558] sm:$0xff]   ;;  %v9714_v19 = vld [vmem:[%s11637_s3 + $0x560] sm:$0xff]  }
 0x3ec   : > { %8950 = vmatprep.subr.bf16.mxu1 %v9786_v0 }
 0x3ef   : > { %v11197_v61 = vpop.f32.mrb[84].mxu0  ;;  %8951 = vmatpush3.bf16.msra.mxu1 %v9688_v22  ;;  %v9715_v22 = vld [vmem:[%s11637_s3 + $0x568] sm:$0xff]  }
 0x3f0   : > { %v8598_v17 = vpop.f32.mrb[85].mxu0  ;;  %8964 = vmatprep.subr.bf16.mxu1 %v9786_v0 }
 0x3f1   : > { %v11202_v34 = vpop.f32.mrb[86].mxu0  ;;  %v9716_v17 = vld [vmem:[%s11637_s3 + $0x570] sm:$0xff]  }
 0x3f2   : > { %v8599_v11 = vpop.f32.mrb[87].mxu0  ;;  %8953 = vmatmul.mubr.bf16.vlgmr.msra.gmra.mrb[0].mxu1 %v10464_v1  ;;  %v9694_v1 = vld [vmem:[%s11637_s3 + $0x4d8] sm:$0xff]  }
 0x3f3   : > { %8965 = vmatpush3.bf16.msra.mxu1 %v9690_v9  ;;  %8956 = vmatprep.mubr.msk.bf16.mxu1 %vm9787_vm1, %v9786_v0  ;;  %v4283_v9 = vshrl.u32 %v7832_v16, 16  ;;  %v4286_v11 = vshll.u32 %v7832_v16, 16  ;;  %v9722_v16 = vld [vmem:[%s11637_s3 + $0x5a0] sm:$0xff]  }
 0x3f4   : > { %8966 = vmatprep.subr.bf16.mxu1 %v9786_v0 }
 0x3f7   : > { %8967 = vmatpush3.bf16.msra.mxu1 %v9691_v53  ;;  %v11672_v53 = vld [vmem:[#allocation6_spill] sm:$0xff] }
 0x3f8   : > { %8968 = vmatprep.subr.bf16.mxu1 %v9786_v0 }
 0x3fa   : > { %8957 = vmatmul.mubr.bf16.gmra.mrb[4].mxu1 %v10486_v44 }
 0x3fb   : > { %8969 = vmatpush3.bf16.msra.mxu1 %v9693_v27  ;;  %8960 = vmatprep.mubr.msk.bf16.mxu1 %vm9787_vm1, %v9786_v0  ;;  %v11673_v27 = vshrl.u32 %v11672_v53, 16 }
 0x3fc   : > { %8970 = vmatprep.subr.bf16.mxu1 %v9786_v0 }
 0x3ff   : > { %v11223_v39 = vpop.f32.mrb[88].mxu0  ;;  %8971 = vmatpush3.bf16.msra.mxu1 %v9694_v1  ;;  %v4293_v1 = vrot.slane %v11673_v27, 2 }
 0x400   : > { %v9122_v7 = vpop.f32.mrb[89].mxu0  ;;  %8972 = vmatprep.subr.bf16.mxu1 %v9786_v0 }
 0x401   : > { %v11228_v37 = vpop.f32.mrb[90].mxu0  ;;  %v11674_v7 = vshll.u32 %v11672_v53, 16 }
 0x402   : > { %v9123_v44 = vpop.f32.mrb[91].mxu0  ;;  %8961 = vmatmul.mubr.bf16.gmra.mrb[8].mxu1 %v11670_v51  ;;  %v4285_v51 = vrot.slane %v4283_v9, 2 }
 0x403   : > { %8973 = vmatpush3.bf16.msra.mxu1 %v9695_v21  ;;  %8980 = vmatprep.mubr.msk.bf16.mxu1 %vm9787_vm1, %v9786_v0  ;;  %v4296_v21 = vrot.slane %v11674_v7, 3  ;;  %v9717_v44 = vld [vmem:[%s11637_s3 + $0x578] sm:$0xff]  }
 0x404   : > { %8974 = vmatprep.subr.bf16.mxu1 %v9786_v0 }
 0x407   : > { %8975 = vmatpush3.bf16.msra.mxu1 %v9696_v5  ;;  %v4288_v5 = vrot.slane %v4286_v11, 3 }
 0x408   : > { %8976 = vmatprep.subr.bf16.mxu1 %v9786_v0 }
 0x40b   : > { %8977 = vmatpush3.bf16.msra.mxu1 %v9697_v43  ;;  %v4297_v43 = vor.u32 %v4296_v21, %v4293_v1 }
 0x40c   : > { %8978 = vmatprep.subr.bf16.mxu1 %v9786_v0 }
 0x40f   : > { %8979 = vmatpush3.bf16.msra.mxu1 %v9698_v15  ;;  %v4300_v15 = vshrl.u32 %v7834_v47, 16 }
 0x410   : > { %8992 = vmatprep.subr.bf16.mxu1 %v9786_v0 }
 0x412   : > { %8981 = vmatmul.mubr.bf16.vlgmr.msra.gmra.mrb[0].mxu1 %v10497_v60  ;;  %v9702_v60 = vld [vmem:[%s11637_s3 + $0x518] sm:$0xff]  }
 0x413   : > { %8993 = vmatpush3.bf16.msra.mxu1 %v9699_v50  ;;  %8984 = vmatprep.mubr.msk.bf16.mxu1 %vm9787_vm1, %v9786_v0  ;;  %v4303_v50 = vshll.u32 %v7834_v47, 16  ;;  %v9734_v47 = vld [vmem:[%s11637_s3 + $0x5f0] sm:$0xff]  }
 0x414   : > { %8994 = vmatprep.subr.bf16.mxu1 %v9786_v0 }
 0x417   : > { %8995 = vmatpush3.bf16.msra.mxu1 %v9700_v24  ;;  %v4289_v24 = vor.u32 %v4288_v5, %v4285_v51 }
 0x418   : > { %8996 = vmatprep.subr.bf16.mxu1 %v9786_v0 }
 0x41a   : > { %8985 = vmatmul.mubr.bf16.gmra.mrb[4].mxu1 %v10509_v32  ;;  %v9704_v32 = vld [vmem:[%s11637_s3 + $0x528] sm:$0xff]  }
 0x41b   : > { %8997 = vmatpush3.bf16.msra.mxu1 %v9701_v40  ;;  %8988 = vmatprep.mubr.msk.bf16.mxu1 %vm9787_vm1, %v9786_v0  ;;  %v9718_v40 = vld [vmem:[%s11637_s3 + $0x580] sm:$0xff]  }
 0x41c   : > { %8998 = vmatprep.subr.bf16.mxu1 %v9786_v0 }
 0x41f   : > { %8999 = vmatpush3.bf16.msra.mxu1 %v9702_v60  ;;  %v4298_v60 = vsel %vm2446_vm11, %v4289_v24, %v4297_v43 }
 0x420   : > { %9000 = vmatprep.subr.bf16.mxu1 %v9786_v0 }
 0x422   : > { %8989 = vmatmul.mubr.bf16.gmra.mrb[8].mxu1 %v11671_v33  ;;  %v4305_v33 = vrot.slane %v4303_v50, 3 }
 0x423   : > { %9001 = vmatpush3.bf16.msra.mxu1 %v9703_v10  ;;  %9008 = vmatprep.mubr.msk.bf16.mxu1 %vm9787_vm1, %v9786_v0  ;;  %v4302_v10 = vrot.slane %v4300_v15, 2 }
 0x424   : > { %9002 = vmatprep.subr.bf16.mxu1 %v9786_v0 }
 0x427   : > { %9003 = vmatpush3.bf16.msra.mxu1 %v9704_v32  ;;  %v9719_v32 = vld [vmem:[%s11637_s3 + $0x588] sm:$0xff]  }
 0x428   : > { %9004 = vmatprep.subr.bf16.mxu1 %v9786_v0 }
 0x42b   : > { %9005 = vmatpush3.bf16.msra.mxu1 %v9705_v23  ;;  %v4306_v23 = vor.u32 %v4305_v33, %v4302_v10 }
 0x42c   : > { %9006 = vmatprep.subr.bf16.mxu1 %v9786_v0 }
 0x42f   : > { %9007 = vmatpush3.bf16.msra.mxu1 %v9706_v4  ;;  %v4307_v4 = vsel %vm2446_vm11, %v4297_v43, %v4306_v23 }
 0x430   : > { %9020 = vmatprep.subr.bf16.mxu1 %v9786_v0 }
 0x432   : > { %9009 = vmatmul.mubr.bf16.vlgmr.msra.gmra.mrb[0].mxu1 %v4148_v54  ;;  %v9730_v54 = vld [vmem:[%s11637_s3 + $0x5d0] sm:$0xff]  }
 0x433   : > { %9021 = vmatpush3.bf16.msra.mxu1 %v9709_v46  ;;  %9012 = vmatprep.mubr.msk.bf16.mxu1 %vm9787_vm1, %v9786_v0  ;;  %v9728_v46 = vld [vmem:[%s11637_s3 + $0x5c8] sm:$0xff]  }
 0x434   : > { %9022 = vmatprep.subr.bf16.mxu1 %v9786_v0 }
 0x437   : > { %9023 = vmatpush3.bf16.msra.mxu1 %v9710_v29 }
 0x438   : > { %9024 = vmatprep.subr.bf16.mxu1 %v9786_v0 }
 0x43a   : > { %9013 = vmatmul.mubr.bf16.gmra.mrb[4].mxu1 %v4150_v38 }
 0x43b   : > { %9025 = vmatpush3.bf16.msra.mxu1 %v9712_v55  ;;  %9016 = vmatprep.mubr.msk.bf16.mxu1 %vm9787_vm1, %v9786_v0 }
 0x43c   : > { %9026 = vmatprep.subr.bf16.mxu1 %v9786_v0 }
 0x43f   : > { %9027 = vmatpush3.bf16.msra.mxu1 %v9713_v30 }
 0x440   : > { %9028 = vmatprep.subr.bf16.mxu1 %v9786_v0 }
 0x442   : > { %9017 = vmatmul.mubr.bf16.gmra.mrb[8].mxu1 %v4149_v28 }
 0x443   : > { %9029 = vmatpush3.bf16.msra.mxu1 %v9714_v19  ;;  %9036 = vmatprep.mubr.msk.bf16.mxu1 %vm9787_vm1, %v9786_v0 }
 0x444   : > { %9030 = vmatprep.subr.bf16.mxu1 %v9786_v0 }
 0x447   : > { %9031 = vmatpush3.bf16.msra.mxu1 %v9715_v22 }
 0x448   : > { %9032 = vmatprep.subr.bf16.mxu1 %v9786_v0 }
 0x44b   : > { %9033 = vmatpush3.bf16.msra.mxu1 %v9716_v17 }
 0x44c   : > { %9034 = vmatprep.subr.bf16.mxu1 %v9786_v0 }
 0x44f   : > { %9035 = vmatpush3.bf16.msra.mxu1 %v9717_v44 }
 0x450   : > { %9048 = vmatprep.subr.bf16.mxu1 %v9786_v0 }
 0x452   : > { %9037 = vmatmul.mubr.bf16.vlgmr.msra.gmra.mrb[0].mxu1 %v4298_v60 }
 0x453   : > { %9049 = vmatpush3.bf16.msra.mxu1 %v9718_v40  ;;  %9040 = vmatprep.mubr.msk.bf16.mxu1 %vm9787_vm1, %v9786_v0 }
 0x454   : > { %9050 = vmatprep.subr.bf16.mxu1 %v9786_v0 }
 0x457   : > { %9051 = vmatpush3.bf16.msra.mxu1 %v9719_v32 }
 0x458   : > { %9052 = vmatprep.subr.bf16.mxu1 %v9786_v0 }
 0x45a   : > { %9041 = vmatmul.mubr.bf16.gmra.mrb[4].mxu1 %v4307_v4  ;;  %v11675_v4 = vmov 65535  }
 0x45b   : > { %9053 = vmatpush3.bf16.msra.mxu1 %v9720_v45  ;;  %9044 = vmatprep.mubr.msk.bf16.mxu1 %vm9787_vm1, %v9786_v0 }
 0x45c   : > { %9054 = vmatprep.subr.bf16.mxu1 %v9786_v0 }
 0x45f   : > { %9055 = vmatpush3.bf16.msra.mxu1 %v9721_v42  ;;  %v4925_v42 = vsel %vm745_vm6, 4294967295, %v11675_v4 }
 0x460   : > { %9056 = vmatprep.subr.bf16.mxu1 %v9786_v0 }
 0x462   : > { %9045 = vmatmul.mubr.bf16.gmra.mrb[8].mxu1 %v4306_v23 }
 0x463   : > { %9057 = vmatpush3.bf16.msra.mxu1 %v9722_v16  ;;  %9064 = vmatprep.mubr.msk.bf16.mxu1 %vm9787_vm1, %v9786_v0 }
 0x464   : > { %9058 = vmatprep.subr.bf16.mxu1 %v9786_v0 }
 0x467   : > { %9059 = vmatpush3.bf16.msra.mxu1 %v9723_v57 }
 0x468   : > { %9060 = vmatprep.subr.bf16.mxu1 %v9786_v0 }
 0x46b   : > { %9061 = vmatpush3.bf16.msra.mxu1 %v9724_v36 }
 0x46c   : > { %9062 = vmatprep.subr.bf16.mxu1 %v9786_v0 }
 0x46f   : > { %9063 = vmatpush3.bf16.msra.mxu1 %v9725_v6 }
 0x470   : > { %9076 = vmatprep.subr.bf16.mxu1 %v9786_v0 }
 0x472   : > { %9065 = vmatmul.mubr.bf16.vlgmr.msra.gmra.mrb[0].mxu1 %v10536_v48  ;;  %v9731_v48 = vld [vmem:[%s11637_s3 + $0x5d8] sm:$0xff]  }
 0x473   : > { %9077 = vmatpush3.bf16.msra.mxu1 %v9727_v8  ;;  %9068 = vmatprep.mubr.msk.bf16.mxu1 %vm9787_vm1, %v9786_v0  ;;  %v4926_v8 = vsel %vm4924_vm0, %v4925_v42, 0  ;;  %v5550_v42 = vld [vmem:[#allocation3 + $0x88] sm:$0xff] }
 0x474   : > { %9078 = vmatprep.subr.bf16.mxu1 %v9786_v0 }
 0x477   : > { %9079 = vmatpush3.bf16.msra.mxu1 %v9728_v46 }
 0x478   : > { %9080 = vmatprep.subr.bf16.mxu1 %v9786_v0 }
 0x47a   : > { %9069 = vmatmul.mubr.bf16.gmra.mrb[4].mxu1 %v10545_v26  ;;  %v9733_v26 = vld [vmem:[%s11637_s3 + $0x5e8] sm:$0xff]  }
 0x47b   : > { %9081 = vmatpush3.bf16.msra.mxu1 %v9730_v54  ;;  %9072 = vmatprep.mubr.msk.bf16.mxu1 %vm9787_vm1, %v9786_v0 }
 0x47c   : > { %9082 = vmatprep.subr.bf16.mxu1 %v9786_v0 }
 0x47f   : > { %9083 = vmatpush3.bf16.msra.mxu1 %v9731_v48  ;;  %v4917_v48 = vld [vmem:[%s11638_s4] sm:$0x3] }
 0x480   : > { %9084 = vmatprep.subr.bf16.mxu1 %v9786_v0 }
 0x482   : > { %9073 = vmatmul.mubr.bf16.gmra.mrb[8].mxu1 %v4450_v13  ;;  %v9736_v13 = vld [vmem:[#allocation2 + $0x1c] sm:$0xff]  }
 0x483   : > { %9085 = vmatpush3.bf16.msra.mxu1 %v9732_v18  ;;  %9092 = vmatprep.mubr.msk.bf16.mxu1 %vm9787_vm1, %v9786_v0  ;;  %v11676_v18 = vmov 0  }
 0x484   : > { %9086 = vmatprep.subr.bf16.mxu1 %v9786_v0 }
 0x487   : > { %9087 = vmatpush3.bf16.msra.mxu1 %v9733_v26 }
 0x488   : > { %9088 = vmatprep.subr.bf16.mxu1 %v9786_v0 }
 0x48b   : > { %9089 = vmatpush3.bf16.msra.mxu1 %v9734_v47 }
 0x48c   : > { %9090 = vmatprep.subr.bf16.mxu1 %v9786_v0 }
 0x48f   : > { %9091 = vmatpush3.bf16.msra.mxu1 %v9735_v14 }
 0x490   : > { %9140 = vmatprep.subr.bf16.mxu1 %v9786_v0 }
 0x492   : > { %9093 = vmatmul.mubr.bf16.vlgmr.msra.gmra.mrb[0].mxu1 %v10553_v3  ;;  %v9737_v3 = vld [vmem:[#allocation2 + $0x24] sm:$0x1f]  }
 0x493   : > { %9148 = vmatpush3.bf16.msra.mxu1 %v10823_v12  ;;  %9096 = vmatprep.mubr.msk.bf16.mxu1 %vm9787_vm1, %v9786_v0 }
 0x494   : > { %9141 = vmatprep.subr.bf16.mxu1 %v9786_v0 }
 0x497   : > { %9149 = vmatpush3.bf16.msra.mxu1 %v10839_v35 }
 0x498   : > { %9142 = vmatprep.subr.bf16.mxu1 %v9786_v0 }
 0x49a   : > { %9097 = vmatmul.mubr.bf16.gmra.mrb[4].mxu1 %v10564_v59 }
 0x49b   : > { %9150 = vmatpush3.bf16.msra.mxu1 %v10854_v41  ;;  %9100 = vmatprep.mubr.msk.bf16.mxu1 %vm9787_vm1, %v9786_v0 }
 0x49c   : > { %9143 = vmatprep.subr.bf16.mxu1 %v9786_v0 }
 0x49f   : > { %9151 = vmatpush3.bf16.msra.mxu1 %v10867_v56 }
 0x4a0   : > { %9144 = vmatprep.subr.bf16.mxu1 %v9786_v0 }
 0x4a2   : > { %9101 = vmatmul.mubr.bf16.gmra.mrb[8].mxu1 %v10559_v62 }
 0x4a3   : > { %9152 = vmatpush3.bf16.msra.mxu1 %v10883_v25  ;;  %9124 = vmatprep.mubr.msk.bf16.mxu1 %vm9787_vm1, %v9786_v0 }
 0x4a4   : > { %9145 = vmatprep.subr.bf16.mxu1 %v9786_v0 }
 0x4a7   : > { %9153 = vmatpush3.bf16.msra.mxu1 %v10896_v31 }
 0x4a8   : > { %9146 = vmatprep.subr.bf16.mxu1 %v9786_v0 }
 0x4ab   : > { %9154 = vmatpush3.bf16.msra.mxu1 %v10911_v49 }
 0x4ac   : > { %9147 = vmatprep.subr.bf16.mxu1 %v9786_v0 }
 0x4af   : > { %9155 = vmatpush3.bf16.msra.mxu1 %v10924_v63 }
 0x4b2   : > { %9125 = vmatmul.mubr.bf16.vlgmr.msra.gmra.mrb[4].mxu1 %v9736_v13 }
 0x4b3   : > { %9128 = vmatprep.mubr.msk.bf16.mxu1 %vm9787_vm1, %v9786_v0  ;;  %vm4920_vm1 = vcmask 252928  }
 0x4ba   : > { %9129 = vmatmul.mubr.bf16.gmra.mrb[8].mxu1 %v9737_v3  ;;  %v5002_v3 = vld [vmem:[#allocation3] sm:$0xff] }
 0x565   : > { %v4689_v62 = vpop.f32.mrb[0].mxu1 }
 0x566   : > { %v9156_v59 = vadd.f32 %v4689_v62, %v11170_v20  ;;  %v9094_v12 = vpop.f32.mrb[1].mxu1 }
 0x567   : > { %v4692_v35 = vpop.f32.mrb[2].mxu1  ;;  %v5003_v12 = vld [vmem:[#allocation3 + $0x8] sm:$0xff] }
 0x568   : > { %v9157_v41 = vadd.f32 %v9156_v59, %v11223_v39  ;;  %v9158_v56 = vadd.f32 %v4692_v35, %v11175_v58  ;;  %v9095_v25 = vpop.f32.mrb[3].mxu1  ;;  %v5011_v35 = vld [vmem:[#allocation3 + $0x48] sm:$0xff] }
 0x56a   : > { %v9159_v31 = vadd.f32 %v9158_v56, %v11228_v37  ;;  %v4870_v9 = vmax.f32 %v9157_v41, 0.0  ;;  %v7947_v41 = vcombine.low %v5003_v12, %v5011_v35  ;;  %v7948_v56 = vcombine.high %v5003_v12, %v5011_v35  ;;  %v5554_v12 = vld [vmem:[#allocation3 + $0xa8] sm:$0xff] }
 0x56b   : > { %v5562_v35 = vld [vmem:[#allocation3 + $0xe8] sm:$0xff] }
 0x56c   : > { %v4871_v63 = vmax.f32 %v9159_v31, 0.0 }
 0x56e   : > { %v4881_v20 = vrot.slane %v4871_v63, 1 }
 0x585   : > { %v4849_v49 = vpop.f32.mrb[4].mxu1 }
 0x586   : > { %v9160_v29 = vadd.f32 %v4849_v49, %v11185_v2  ;;  %v9126_v28 = vpop.f32.mrb[5].mxu1 }
 0x587   : > { %v4852_v55 = vpop.f32.mrb[6].mxu1 }
 0x588   : > { %v4872_v38 = vmax.f32 %v9160_v29, 0.0  ;;  %v9161_v30 = vadd.f32 %v4852_v55, %v11190_v52  ;;  %v9127_v19 = vpop.f32.mrb[7].mxu1 }
 0x58a   : > { %v4882_v22 = vrot.slane %v4872_v38, 1  ;;  %v4873_v17 = vmax.f32 %v9161_v30, 0.0 }
 0x58c   : > { %v4883_v39 = vsel %vm745_vm6, %v4881_v20, %v4882_v22  ;;  %v4884_v58 = vrot.slane %v4873_v17, 1 }
 0x58d   : > { %v4894_v11 = vmax.f32 %v4870_v9, %v4883_v39  ;;  %v4857_v53 = vpop.f32.mrb[8].mxu1  ;;  %v5004_v9 = vld [vmem:[#allocation3 + $0x10] sm:$0xff] }
 0x58e   : > { %v4885_v37 = vsel %vm745_vm6, %v4882_v22, %v4884_v58  ;;  %v9162_v27 = vadd.f32 %v4857_v53, %v11197_v61  ;;  %v9130_v2 = vpop.f32.mrb[9].mxu1  ;;  %v5012_v39 = vld [vmem:[#allocation3 + $0x50] sm:$0xff] }
 0x58f   : > { %v4895_v1 = vmax.f32 %v4871_v63, %v4885_v37  ;;  %v4860_v7 = vpop.f32.mrb[10].mxu1  ;;  %v4902_v51 = vrot.slane %v4894_v11, 1  ;;  %v7950_v53 = vcombine.high %v5004_v9, %v5012_v39  ;;  %v5005_v37 = vld [vmem:[#allocation3 + $0x18] sm:$0xff]  ;;  %v7949_v2 = vcombine.low %v5004_v9, %v5012_v39  ;;  %v6106_v9 = vld [vmem:[#allocation3 + $0x148] sm:$0xff] }
 0x590   : > { %v4874_v21 = vmax.f32 %v9162_v27, 0.0  ;;  %v9163_v52 = vadd.f32 %v4860_v7, %v11202_v34  ;;  %v9131_v44 = vpop.f32.mrb[11].mxu1  ;;  %v5013_v27 = vld [vmem:[#allocation3 + $0x58] sm:$0xff]  ;;  %v5006_v7 = vld [vmem:[#allocation3 + $0x20] sm:$0xff] }
 0x591   : > { %v4903_v5 = vrot.slane %v4895_v1, 1 }
 0x592   : > { %v4886_v43 = vrot.slane %v4874_v21, 1  ;;  %v4875_v15 = vmax.f32 %v9163_v52, 0.0  ;;  %v5014_v21 = vld [vmem:[#allocation3 + $0x60] sm:$0xff]  ;;  %v7951_v52 = vcombine.low %v5005_v37, %v5013_v27 }
 0x593   : > { %v4904_v50 = vsel %vm745_vm6, %v4902_v51, %v4903_v5  ;;  %v7954_v44 = vcombine.high %v5006_v7, %v5014_v21  ;;  %v5007_v51 = vld [vmem:[#allocation3 + $0x28] sm:$0xff] }
 0x594   : > { %v4887_v24 = vsel %vm745_vm6, %v4884_v58, %v4886_v43  ;;  %v4888_v40 = vrot.slane %v4875_v15, 1  ;;  %v4913_v60 = vmax.f32 %v4894_v11, %v4904_v50  ;;  %v5008_v50 = vld [vmem:[#allocation3 + $0x30] sm:$0xff] }
 0x595   : > { %v4896_v10 = vmax.f32 %v4872_v38, %v4887_v24  ;;  %v5016_v24 = vld [vmem:[#allocation3 + $0x70] sm:$0xff] }
 0x596   : > { %v4889_v61 = vsel %vm745_vm6, %v4886_v43, %v4888_v40  ;;  %v7953_v43 = vcombine.low %v5006_v7, %v5014_v21  ;;  %v6100_v7 = vld [vmem:[#allocation3 + $0x118] sm:$0xff] }
 0x597   : > { %v4905_v33 = vrot.slane %v4896_v10, 1  ;;  %v4897_v32 = vmax.f32 %v4873_v17, %v4889_v61  ;;  %v5017_v61 = vld [vmem:[#allocation3 + $0x78] sm:$0xff] }
 0x598   : > { %v6108_v21 = vld [vmem:[#allocation3 + $0x158] sm:$0xff] }
 0x599   : > { %v4907_v23 = vrot.slane %v4897_v32, 1  ;;  %v4906_v45 = vsel %vm745_vm6, %v4903_v5, %v4905_v33  ;;  %v5015_v5 = vld [vmem:[#allocation3 + $0x68] sm:$0xff] }
 0x59a   : > { %v4914_v34 = vmax.f32 %v4895_v1, %v4906_v45  ;;  %v7952_v1 = vcombine.high %v5005_v37, %v5013_v27  ;;  %v7956_v15 = vcombine.high %v5007_v51, %v5015_v5  ;;  %v7955_v40 = vcombine.low %v5007_v51, %v5015_v5  ;;  %v5557_v45 = vld [vmem:[#allocation3 + $0xc0] sm:$0xff]  ;;  %v6107_v37 = vld [vmem:[#allocation3 + $0x150] sm:$0xff] }
 0x59b   : > { %v4916_v16 = vmax.f32 %v4897_v32, %v4907_v23  ;;  %v4908_v57 = vsel %vm745_vm6, %v4905_v33, %v4907_v23  ;;  %v7957_v33 = vcombine.low %v5008_v50, %v5016_v24  ;;  %v5549_v23 = vld [vmem:[#allocation3 + $0x80] sm:$0xff] }
 0x59c   : > { %v4918_v36 = vpack.c.bf16 %v4914_v34, %v4913_v60  ;;  %v4915_v6 = vmax.f32 %v4896_v10, %v4908_v57  ;;  %v7958_v60 = vcombine.high %v5008_v50, %v5016_v24  ;;  %v5009_v10 = vld [vmem:[#allocation3 + $0x38] sm:$0xff]  ;;  %v7970_v4 = vcombine.high %v5549_v23, %v5557_v45  ;;  %v6101_v51 = vld [vmem:[#allocation3 + $0x120] sm:$0xff]  ;;  %v6110_v50 = vld [vmem:[#allocation3 + $0x168] sm:$0xff] }
 0x59d   : > { %v7960_v32 = vcombine.high %v5009_v10, %v5017_v61  ;;  %v7959_v34 = vcombine.low %v5009_v10, %v5017_v61  ;;  %v7969_v57 = vcombine.low %v5549_v23, %v5557_v45  ;;  %v6109_v5 = vld [vmem:[#allocation3 + $0x160] sm:$0xff]  ;;  %v6111_v10 = vld [vmem:[#allocation3 + $0x170] sm:$0xff]  ;;  %v6112_v23 = vld [vmem:[#allocation3 + $0x178] sm:$0xff] }
 0x59e   : > { %9133 = vmatpush3.bf16.msra.mxu0 %v4918_v36  ;;  %v4919_v46 = vpack.c.bf16 %v4916_v16, %v4915_v6  ;;  %v5558_v16 = vld [vmem:[#allocation3 + $0xc8] sm:$0xff]  ;;  %v5551_v6 = vld [vmem:[#allocation3 + $0x90] sm:$0xff]  ;;  %v8001_v24 = vcombine.low %v6101_v51, %v6109_v5 }
 0x59f   : > { %9134 = vmatprep.subr.bf16.mxu0 %v9786_v0  ;;  %v5010_v0 = vld [vmem:[#allocation3 + $0x40] sm:$0xff]  ;;  %v7972_v36 = vcombine.high %v5550_v42, %v5558_v16 }
 0x5a0   : > { %v4928_v54 = vand.u32 %v4926_v8, %v4919_v46  ;;  %v7945_v62 = vcombine.low %v5002_v3, %v5010_v0  ;;  %v7946_v59 = vcombine.high %v5002_v3, %v5010_v0  ;;  %v5559_v8 = vld [vmem:[#allocation3 + $0xd0] sm:$0xff]  ;;  %v7971_v46 = vcombine.low %v5550_v42, %v5558_v16  ;;  %v5553_v3 = vld [vmem:[#allocation3 + $0xa0] sm:$0xff] }
 0x5a1   : > { %v5561_v0 = vld [vmem:[#allocation3 + $0xe0] sm:$0xff] }
 0x5a2   : > { %9135 = vmatpush3.bf16.msra.mxu0 %v4928_v54  ;;  %v6653_v42 = vld [vmem:[#allocation3 + $0x1c0] sm:$0xff] }
 0x5a3   : > { %5102 = vmatprep.subr.bf16.mxu0 %v7946_v59  ;;  %v7978_v59 = vcombine.high %v5553_v3, %v5561_v0 }
 0x5a5   : > { %9137 = vmatmul.mubr.msk.bf16.vlgmr.msra.gmra.mrb[92].mxu0 %vm4920_vm1, %v4917_v48  ;;  %v7974_v48 = vcombine.high %v5551_v6, %v5559_v8 }
 0x5a6   : > { %5134 = vmatprep.mubr.bf16.mxu0 %v11676_v18  ;;  %5103 = vmatpush1.bf16.msra.mxu0 %v7945_v62 }
 0x5a7   : > { %5143 = vmatprep.subr.bf16.mxu0 %v7948_v56  ;;  %v7980_v56 = vcombine.high %v5554_v12, %v5562_v35 }
 0x678   : > { %v4964_v26 = vpop.f32.mrb[92].mxu0 }
 0x679   : > { %4971 = vrot.lane.b32.xlu0 %v4964_v26, %s9790_s10  ;;  %4979 = vrot.lane.b32.xlu1 %v4964_v26, %s9791_s11  ;;  %v9138_v47 = vpop.f32.mrb[93].mxu0 }
 0x67a   : > { %v4967_v14 = vpop.f32.mrb[94].mxu0  ;;  %v5560_v47 = vld [vmem:[#allocation3 + $0xd8] sm:$0xff] }
 0x67b   : > { %v9139_v13 = vpop.f32.mrb[95].mxu0  ;;  %v7973_v14 = vcombine.low %v5551_v6, %v5559_v8  ;;  %v6654_v6 = vld [vmem:[#allocation3 + $0x1c8] sm:$0xff] }
 0x67d   : > { %4975 = vrot.lane.b32.xlu0 %v4964_v26, %s9792_s12  ;;  %4983 = vrot.lane.b32.xlu1 %v4964_v26, %s9793_s13 }
 0x681   : > { %4987 = vrot.lane.b32.xlu0 %v4964_v26, %s9794_s14  ;;  %4991 = vrot.lane.b32.xlu1 %v4964_v26, %s9795_s15 }
 0x685   : > { %4995 = vrot.lane.b32.xlu0 %v4964_v26, %s9796_s16 }
 0x6eb   : > { %v4972_v25 = vpop.permute.xlu0 %4971  ;;  %v4980_v31 = vpop.permute.xlu1 %4979 }
 0x6ec   : > { %v4974_v49 = vmax.f32 %v4964_v26, %v4972_v25  ;;  %v5552_v26 = vld [vmem:[#allocation3 + $0x98] sm:$0xff]  ;;  %v5555_v25 = vld [vmem:[#allocation3 + $0xb0] sm:$0xff] }
 0x6ed   : > { %v7976_v13 = vcombine.high %v5552_v26, %v5560_v47  ;;  %v7975_v62 = vcombine.low %v5552_v26, %v5560_v47  ;;  %v6655_v26 = vld [vmem:[#allocation3 + $0x1d0] sm:$0xff] }
 0x6ef   : > { %v4976_v63 = vpop.permute.xlu0 %4975  ;;  %v4984_v28 = vpop.permute.xlu1 %4983 }
 0x6f0   : > { %v4978_v29 = vmax.f32 %v4974_v49, %v4976_v63  ;;  %v7979_v49 = vcombine.low %v5554_v12, %v5562_v35  ;;  %v6657_v12 = vld [vmem:[#allocation3 + $0x1e0] sm:$0xff] }
 0x6f2   : > { %v4982_v55 = vmax.f32 %v4978_v29, %v4980_v31  ;;  %v5563_v31 = vld [vmem:[#allocation3 + $0xf0] sm:$0xff]  ;;  %v5556_v29 = vld [vmem:[#allocation3 + $0xb8] sm:$0xff] }
 0x6f3   : > { %v4988_v38 = vpop.permute.xlu0 %4987  ;;  %v4992_v20 = vpop.permute.xlu1 %4991  ;;  %v7982_v63 = vcombine.high %v5555_v25, %v5563_v31 }
 0x6f4   : > { %v4986_v30 = vmax.f32 %v4982_v55, %v4984_v28  ;;  %v5564_v28 = vld [vmem:[#allocation3 + $0xf8] sm:$0xff]  ;;  %v7981_v55 = vcombine.low %v5555_v25, %v5563_v31  ;;  %v9797_v25 = vmov 1966171168  }
 0x6f5   : > { %v5451_v31 = vunpack.c.l.s4 %v9797_v25 }
 0x6f6   : > { %v4990_v19 = vmax.f32 %v4986_v30, %v4988_v38  ;;  %v7984_v38 = vcombine.high %v5556_v29, %v5564_v28  ;;  %v6097_v30 = vld [vmem:[#allocation3 + $0x100] sm:$0xff] }
 0x6f7   : > { %v4996_v17 = vpop.permute.xlu0 %4995 }
 0x6f8   : > { %v4994_v22 = vmax.f32 %v4990_v19, %v4992_v20  ;;  %v6105_v19 = vld [vmem:[#allocation3 + $0x140] sm:$0xff]  ;;  %v7983_v20 = vcombine.low %v5556_v29, %v5564_v28  ;;  %v6658_v29 = vld [vmem:[#allocation3 + $0x1e8] sm:$0xff] }
 0x6f9   : > { %v7993_v39 = vcombine.low %v6097_v30, %v6105_v19 }
 0x6fa   : > { %v4998_v58 = vmax.f32 %v4994_v22, %v4996_v17  ;;  %v7994_v22 = vcombine.high %v6097_v30, %v6105_v19  ;;  %v6098_v17 = vld [vmem:[#allocation3 + $0x108] sm:$0xff] }
 0x6fb   : > { %v7995_v27 = vcombine.low %v6098_v17, %v6106_v9 }
 0x6fc   : > { %v11463_v11 = vpack.c.bf16 %v4998_v58, %v4998_v58  ;;  %v7996_v58 = vcombine.high %v6098_v17, %v6106_v9 }
 0x6fe   : > { %7961 = vmatmul.mubr.msk.bf16.vlgmr.msra.gmra.mrb[96].mxu0 %vm5098_vm2, %v11463_v11  ;;  %v11490_v54 = vshrl.u32 %v11463_v11, 16 }
 0x6ff   : > { %5144 = vmatpush1.bf16.msra.mxu0 %v7947_v41  ;;  %5175 = vmatprep.mubr.bf16.mxu0 %v11676_v18  ;;  %v7977_v41 = vcombine.low %v5553_v3, %v5561_v0  ;;  %v6648_v3 = vld [vmem:[#allocation3 + $0x198] sm:$0xff] }
 0x700   : > { %5184 = vmatprep.subr.bf16.mxu0 %v7950_v53  ;;  %v6099_v53 = vld [vmem:[#allocation3 + $0x110] sm:$0xff]  ;;  %v6656_v0 = vld [vmem:[#allocation3 + $0x1d8] sm:$0xff] }
 0x701   : > { %v8023_v35 = vcombine.low %v6648_v3, %v6656_v0 }
 0x706   : > { %7962 = vmatmul.mubr.msk.bf16.vlgmr.msra.gmra.mrb[100].mxu0 %vm5098_vm2, %v11463_v11 }
 0x707   : > { %5185 = vmatpush1.bf16.msra.mxu0 %v7949_v2  ;;  %5216 = vmatprep.mubr.bf16.mxu0 %v11676_v18  ;;  %v6114_v2 = vrot.slane %v11463_v11, 1 }
 0x708   : > { %5225 = vmatprep.subr.bf16.mxu0 %v7952_v1  ;;  %v7998_v1 = vcombine.high %v6099_v53, %v6107_v37 }
 0x70e   : > { %7963 = vmatmul.mubr.msk.bf16.vlgmr.msra.gmra.mrb[104].mxu0 %vm5098_vm2, %v11463_v11 }
 0x70f   : > { %5226 = vmatpush1.bf16.msra.mxu0 %v7951_v52  ;;  %5257 = vmatprep.mubr.bf16.mxu0 %v11676_v18  ;;  %v7997_v52 = vcombine.low %v6099_v53, %v6107_v37  ;;  %v6659_v53 = vld [vmem:[#allocation3 + $0x1f0] sm:$0xff] }
 0x710   : > { %5266 = vmatprep.subr.bf16.mxu0 %v7954_v44  ;;  %v8000_v44 = vcombine.high %v6100_v7, %v6108_v21 }
 0x716   : > { %7964 = vmatmul.mubr.msk.bf16.vlgmr.msra.gmra.mrb[108].mxu0 %vm5098_vm2, %v11463_v11 }
 0x717   : > { %5267 = vmatpush1.bf16.msra.mxu0 %v7953_v43  ;;  %5298 = vmatprep.mubr.bf16.mxu0 %v11676_v18  ;;  %v8002_v43 = vcombine.high %v6101_v51, %v6109_v5 }
 0x718   : > { %5307 = vmatprep.subr.bf16.mxu0 %v7956_v15  ;;  %v6102_v15 = vld [vmem:[#allocation3 + $0x128] sm:$0xff] }
 0x719   : > { %v8003_v61 = vcombine.low %v6102_v15, %v6110_v50 }
 0x71e   : > { %7965 = vmatmul.mubr.msk.bf16.vlgmr.msra.gmra.mrb[112].mxu0 %vm5098_vm2, %v11463_v11 }
 0x71f   : > { %5308 = vmatpush1.bf16.msra.mxu0 %v7955_v40  ;;  %5339 = vmatprep.mubr.bf16.mxu0 %v11676_v18  ;;  %v8004_v40 = vcombine.high %v6102_v15, %v6110_v50 }
 0x720   : > { %5348 = vmatprep.subr.bf16.mxu0 %v7958_v60  ;;  %v6103_v60 = vld [vmem:[#allocation3 + $0x130] sm:$0xff] }
 0x721   : > { %v8005_v45 = vcombine.low %v6103_v60, %v6111_v10 }
 0x726   : > { %7966 = vmatmul.mubr.msk.bf16.vlgmr.msra.gmra.mrb[116].mxu0 %vm5098_vm2, %v11463_v11 }
 0x727   : > { %5349 = vmatpush1.bf16.msra.mxu0 %v7957_v33  ;;  %5380 = vmatprep.mubr.bf16.mxu0 %v11676_v18  ;;  %v8006_v33 = vcombine.high %v6103_v60, %v6111_v10 }
 0x728   : > { %5389 = vmatprep.subr.bf16.mxu0 %v7960_v32  ;;  %v6104_v32 = vld [vmem:[#allocation3 + $0x138] sm:$0xff] }
 0x729   : > { %v8007_v16 = vcombine.low %v6104_v32, %v6112_v23 }
 0x72e   : > { %7967 = vmatmul.mubr.msk.bf16.vlgmr.msra.gmra.mrb[120].mxu0 %vm5098_vm2, %v11463_v11 }
 0x72f   : > { %5390 = vmatpush1.bf16.msra.mxu0 %v7959_v34  ;;  %5421 = vmatprep.mubr.bf16.mxu0 %v11676_v18  ;;  %v8008_v34 = vcombine.high %v6104_v32, %v6112_v23 }
 0x730   : > { %5650 = vmatprep.subr.bf16.mxu0 %v7970_v4  ;;  %v6645_v4 = vld [vmem:[#allocation3 + $0x180] sm:$0xff] }
 0x731   : > { %v8017_v8 = vcombine.low %v6645_v4, %v6653_v42 }
 0x736   : > { %7968 = vmatmul.mubr.msk.bf16.vlgmr.msra.gmra.mrb[124].mxu0 %vm5098_vm2, %v11463_v11  ;;  %v7999_v11 = vcombine.low %v6100_v7, %v6108_v21 }
 0x737   : > { %5651 = vmatpush1.bf16.msra.mxu0 %v7969_v57  ;;  %5682 = vmatprep.mubr.bf16.mxu0 %v11676_v18  ;;  %v8018_v57 = vcombine.high %v6645_v4, %v6653_v42 }
 0x738   : > { %5691 = vmatprep.subr.bf16.mxu0 %v7972_v36  ;;  %v6646_v36 = vld [vmem:[#allocation3 + $0x188] sm:$0xff] }
 0x739   : > { %v8019_v47 = vcombine.low %v6646_v36, %v6654_v6 }
 0x73e   : > { %7985 = vmatmul.mubr.msk.bf16.vlgmr.msra.gmra.mrb[128].mxu0 %vm5098_vm2, %v11490_v54 }
 0x73f   : > { %5692 = vmatpush1.bf16.msra.mxu0 %v7971_v46  ;;  %5723 = vmatprep.mubr.bf16.mxu0 %v11676_v18  ;;  %v8020_v46 = vcombine.high %v6646_v36, %v6654_v6 }
 0x740   : > { %5732 = vmatprep.subr.bf16.mxu0 %v7974_v48  ;;  %v6647_v48 = vld [vmem:[#allocation3 + $0x190] sm:$0xff] }
 0x746   : > { %7986 = vmatmul.mubr.msk.bf16.vlgmr.msra.gmra.mrb[132].mxu0 %vm5098_vm2, %v11490_v54 }
 0x747   : > { %5733 = vmatpush1.bf16.msra.mxu0 %v7973_v14  ;;  %5764 = vmatprep.mubr.bf16.mxu0 %v11676_v18  ;;  %v11534_v14 = vrot.slane %v11490_v54, 1 }
 0x748   : > { %5773 = vmatprep.subr.bf16.mxu0 %v7976_v13  ;;  %v8022_v13 = vcombine.high %v6647_v48, %v6655_v26 }
 0x74e   : > { %7987 = vmatmul.mubr.msk.bf16.vlgmr.msra.gmra.mrb[136].mxu0 %vm5098_vm2, %v11490_v54 }
 0x74f   : > { %5774 = vmatpush1.bf16.msra.mxu0 %v7975_v62  ;;  %5805 = vmatprep.mubr.bf16.mxu0 %v11676_v18  ;;  %v8021_v62 = vcombine.low %v6647_v48, %v6655_v26 }
 0x750   : > { %5814 = vmatprep.subr.bf16.mxu0 %v7978_v59  ;;  %v8024_v59 = vcombine.high %v6648_v3, %v6656_v0 }
 0x756   : > { %7988 = vmatmul.mubr.msk.bf16.vlgmr.msra.gmra.mrb[140].mxu0 %vm5098_vm2, %v11490_v54 }
 0x757   : > { %5815 = vmatpush1.bf16.msra.mxu0 %v7977_v41  ;;  %5846 = vmatprep.mubr.bf16.mxu0 %v11676_v18 }
 0x758   : > { %5855 = vmatprep.subr.bf16.mxu0 %v7980_v56 }
 0x75e   : > { %7989 = vmatmul.mubr.msk.bf16.vlgmr.msra.gmra.mrb[144].mxu0 %vm5098_vm2, %v11490_v54 }
 0x75f   : > { %5856 = vmatpush1.bf16.msra.mxu0 %v7979_v49  ;;  %5887 = vmatprep.mubr.bf16.mxu0 %v11676_v18  ;;  %v5453_v49 = vlaneseq }
 0x760   : > { %5896 = vmatprep.subr.bf16.mxu0 %v7982_v63  ;;  %v6650_v63 = vld [vmem:[#allocation3 + $0x1a8] sm:$0xff] }
 0x761   : > { %v5454_v17 = vshrl.u32 %v5453_v49, 7 }
 0x766   : > { %7990 = vmatmul.mubr.msk.bf16.vlgmr.msra.gmra.mrb[148].mxu0 %vm5098_vm2, %v11490_v54 }
 0x767   : > { %5897 = vmatpush1.bf16.msra.mxu0 %v7981_v55  ;;  %5928 = vmatprep.mubr.bf16.mxu0 %v11676_v18 }
 0x768   : > { %5937 = vmatprep.subr.bf16.mxu0 %v7984_v38 }
 0x76e   : > { %7991 = vmatmul.mubr.msk.bf16.vlgmr.msra.gmra.mrb[152].mxu0 %vm5098_vm2, %v11490_v54 }
 0x76f   : > { %5938 = vmatpush1.bf16.msra.mxu0 %v7983_v20  ;;  %5969 = vmatprep.mubr.bf16.mxu0 %v11676_v18  ;;  %v8028_v20 = vcombine.high %v6650_v63, %v6658_v29 }
 0x770   : > { %6198 = vmatprep.subr.bf16.mxu0 %v7994_v22  ;;  %v5452_v22 = vunpack.c.0.s8 %v5451_v31 }
 0x772   : > { %v11548_v9 = vsub.s32 %v5452_v22, %v5454_v17 }
 0x776   : > { %7992 = vmatmul.mubr.msk.bf16.vlgmr.msra.gmra.mrb[156].mxu0 %vm5098_vm2, %v11490_v54  ;;  %v6649_v54 = vld [vmem:[#allocation3 + $0x1a0] sm:$0xff] }
 0x777   : > { %6199 = vmatpush1.bf16.msra.mxu0 %v7993_v39  ;;  %6230 = vmatprep.mubr.bf16.mxu0 %v11676_v18  ;;  %v8026_v41 = vcombine.high %v6649_v54, %v6657_v12  ;;  %v8025_v30 = vcombine.low %v6649_v54, %v6657_v12 }
 0x778   : > { %6239 = vmatprep.subr.bf16.mxu0 %v7996_v58  ;;  %v6651_v58 = vld [vmem:[#allocation3 + $0x1b0] sm:$0xff] }
 0x779   : > { %v8030_v21 = vcombine.high %v6651_v58, %v6659_v53 }
 0x77e   : > { %8009 = vmatmul.mubr.msk.bf16.vlgmr.msra.gmra.mrb[160].mxu0 %vm5098_vm2, %v6114_v2 }
 0x77f   : > { %6240 = vmatpush1.bf16.msra.mxu0 %v7995_v27  ;;  %6271 = vmatprep.mubr.bf16.mxu0 %v11676_v18 }
 0x780   : > { %6280 = vmatprep.subr.bf16.mxu0 %v7998_v1  ;;  %v8027_v1 = vcombine.low %v6650_v63, %v6658_v29 }
 0x786   : > { %8010 = vmatmul.mubr.msk.bf16.vlgmr.msra.gmra.mrb[164].mxu0 %vm5098_vm2, %v6114_v2 }
 0x787   : > { %6281 = vmatpush1.bf16.msra.mxu0 %v7997_v52  ;;  %6312 = vmatprep.mubr.bf16.mxu0 %v11676_v18 }
 0x788   : > { %6321 = vmatprep.subr.bf16.mxu0 %v8000_v44 }
 0x78e   : > { %8011 = vmatmul.mubr.msk.bf16.vlgmr.msra.gmra.mrb[168].mxu0 %vm5098_vm2, %v6114_v2 }
 0x78f   : > { %6322 = vmatpush1.bf16.msra.mxu0 %v7999_v11  ;;  %6353 = vmatprep.mubr.bf16.mxu0 %v11676_v18  ;;  %v6652_v11 = vld [vmem:[#allocation3 + $0x1b8] sm:$0xff] }
 0x790   : > { %6362 = vmatprep.subr.bf16.mxu0 %v8002_v43  ;;  %v6660_v43 = vld [vmem:[#allocation3 + $0x1f8] sm:$0xff] }
 0x791   : > { %v8032_v10 = vcombine.high %v6652_v11, %v6660_v43 }
 0x796   : > { %8012 = vmatmul.mubr.msk.bf16.vlgmr.msra.gmra.mrb[172].mxu0 %vm5098_vm2, %v6114_v2 }
 0x797   : > { %6363 = vmatpush1.bf16.msra.mxu0 %v8001_v24  ;;  %6394 = vmatprep.mubr.bf16.mxu0 %v11676_v18 }
 0x798   : > { %6403 = vmatprep.subr.bf16.mxu0 %v8004_v40  ;;  %v8029_v40 = vcombine.low %v6651_v58, %v6659_v53 }
 0x79e   : > { %8013 = vmatmul.mubr.msk.bf16.vlgmr.msra.gmra.mrb[176].mxu0 %vm5098_vm2, %v6114_v2 }
 0x79f   : > { %6404 = vmatpush1.bf16.msra.mxu0 %v8003_v61  ;;  %6435 = vmatprep.mubr.bf16.mxu0 %v11676_v18 }
 0x7a0   : > { %6444 = vmatprep.subr.bf16.mxu0 %v8006_v33 }
 0x7a6   : > { %8014 = vmatmul.mubr.msk.bf16.vlgmr.msra.gmra.mrb[180].mxu0 %vm5098_vm2, %v6114_v2 }
 0x7a7   : > { %6445 = vmatpush1.bf16.msra.mxu0 %v8005_v45  ;;  %6476 = vmatprep.mubr.bf16.mxu0 %v11676_v18  ;;  %v8031_v45 = vcombine.low %v6652_v11, %v6660_v43 }
 0x7a8   : > { %6485 = vmatprep.subr.bf16.mxu0 %v8008_v34 }
 0x7ae   : > { %8015 = vmatmul.mubr.msk.bf16.vlgmr.msra.gmra.mrb[184].mxu0 %vm5098_vm2, %v6114_v2 }
 0x7af   : > { %6486 = vmatpush1.bf16.msra.mxu0 %v8007_v16  ;;  %6517 = vmatprep.mubr.bf16.mxu0 %v11676_v18 }
 0x7b0   : > { %6745 = vmatprep.subr.bf16.mxu0 %v8018_v57 }
 0x7b6   : > { %8016 = vmatmul.mubr.msk.bf16.vlgmr.msra.gmra.mrb[188].mxu0 %vm5098_vm2, %v6114_v2 }
 0x7b7   : > { %6746 = vmatpush1.bf16.msra.mxu0 %v8017_v8  ;;  %6777 = vmatprep.mubr.bf16.mxu0 %v11676_v18 }
 0x7b8   : > { %6786 = vmatprep.subr.bf16.mxu0 %v8020_v46 }
 0x7be   : > { %8033 = vmatmul.mubr.msk.bf16.vlgmr.msra.gmra.mrb[192].mxu0 %vm5098_vm2, %v11534_v14 }
 0x7bf   : > { %6787 = vmatpush1.bf16.msra.mxu0 %v8019_v47  ;;  %6818 = vmatprep.mubr.bf16.mxu0 %v11676_v18 }
 0x7c0   : > { %6827 = vmatprep.subr.bf16.mxu0 %v8022_v13 }
 0x7c6   : > { %8034 = vmatmul.mubr.msk.bf16.vlgmr.msra.gmra.mrb[196].mxu0 %vm5098_vm2, %v11534_v14 }
 0x7c7   : > { %6828 = vmatpush1.bf16.msra.mxu0 %v8021_v62  ;;  %6859 = vmatprep.mubr.bf16.mxu0 %v11676_v18 }
 0x7c8   : > { %6868 = vmatprep.subr.bf16.mxu0 %v8024_v59 }
 0x7ce   : > { %8035 = vmatmul.mubr.msk.bf16.vlgmr.msra.gmra.mrb[200].mxu0 %vm5098_vm2, %v11534_v14 }
 0x7cf   : > { %6869 = vmatpush1.bf16.msra.mxu0 %v8023_v35  ;;  %6900 = vmatprep.mubr.bf16.mxu0 %v11676_v18 }
 0x7d0   : > { %6909 = vmatprep.subr.bf16.mxu0 %v8026_v41 }
 0x7d1   : > { %v5136_v56 = vpop.f32.mrb[96].mxu0 }
 0x7d2   : > { %v5138_v28 = vpop.f32.mrb[97].mxu0 }
 0x7d3   : > { %v5446_v55 = vcombine.low %v5136_v56, %v5138_v28  ;;  %v5140_v38 = vpop.f32.mrb[98].mxu0 }
 0x7d4   : > { %v5141_v19 = vpop.f32.mrb[99].mxu0 }
 0x7d5   : > { %v5456_v52 = vrot.slane %v5446_v55, %v11548_v9 }
 0x7d6   : > { %8036 = vmatmul.mubr.msk.bf16.vlgmr.msra.gmra.mrb[204].mxu0 %vm5098_vm2, %v11534_v14 }
 0x7d7   : > { %6910 = vmatpush1.bf16.msra.mxu0 %v8025_v30  ;;  %6941 = vmatprep.mubr.bf16.mxu0 %v11676_v18 }
 0x7d8   : > { %6950 = vmatprep.subr.bf16.mxu0 %v8028_v20 }
 0x7d9   : > { %v5177_v39 = vpop.f32.mrb[100].mxu0 }
 0x7da   : > { %v5179_v37 = vpop.f32.mrb[101].mxu0 }
 0x7db   : > { %v5447_v27 = vcombine.low %v5177_v39, %v5179_v37  ;;  %v5181_v2 = vpop.f32.mrb[102].mxu0 }
 0x7dc   : > { %v5182_v7 = vpop.f32.mrb[103].mxu0 }
 0x7dd   : > { %v5463_v44 = vrot.slane %v5447_v27, %v11548_v9 }
 0x7de   : > { %8037 = vmatmul.mubr.msk.bf16.vlgmr.msra.gmra.mrb[208].mxu0 %vm5098_vm2, %v11534_v14 }
 0x7df   : > { %v5478_v51 = vcombine.low %v5456_v52, %v5463_v44  ;;  %6951 = vmatpush1.bf16.msra.mxu0 %v8027_v1  ;;  %6982 = vmatprep.mubr.bf16.mxu0 %v11676_v18 }
 0x7e0   : > { %6991 = vmatprep.subr.bf16.mxu0 %v8030_v21 }
 0x7e1   : > { %v5218_v5 = vpop.f32.mrb[104].mxu0  ;;  %v11564_v57 = vrot.slane %v5478_v51, %v11548_v9 }
 0x7e2   : > { %v5220_v15 = vpop.f32.mrb[105].mxu0 }
 0x7e3   : > { %v5448_v50 = vcombine.low %v5218_v5, %v5220_v15  ;;  %v5222_v24 = vpop.f32.mrb[106].mxu0 }
 0x7e4   : > { %v5223_v60 = vpop.f32.mrb[107].mxu0 }
 0x7e5   : > { %v5470_v4 = vrot.slane %v5448_v50, %v11548_v9 }
 0x7e6   : > { %8038 = vmatmul.mubr.msk.bf16.vlgmr.msra.gmra.mrb[212].mxu0 %vm5098_vm2, %v11534_v14 }
 0x7e7   : > { %6992 = vmatpush1.bf16.msra.mxu0 %v8029_v40  ;;  %7023 = vmatprep.mubr.bf16.mxu0 %v11676_v18 }
 0x7e8   : > { %7032 = vmatprep.subr.bf16.mxu0 %v8032_v10 }
 0x7e9   : > { %v5259_v61 = vpop.f32.mrb[108].mxu0 }
 0x7ea   : > { %v5261_v33 = vpop.f32.mrb[109].mxu0 }
 0x7eb   : > { %v5449_v32 = vcombine.low %v5259_v61, %v5261_v33  ;;  %v5263_v23 = vpop.f32.mrb[110].mxu0 }
 0x7ec   : > { %v5264_v34 = vpop.f32.mrb[111].mxu0 }
 0x7ed   : > { %v5477_v42 = vrot.slane %v5449_v32, %v11548_v9 }
 0x7ee   : > { %8039 = vmatmul.mubr.msk.bf16.vlgmr.msra.gmra.mrb[216].mxu0 %vm5098_vm2, %v11534_v14 }
 0x7ef   : > { %v5479_v16 = vcombine.low %v5470_v4, %v5477_v42  ;;  %7033 = vmatpush1.bf16.msra.mxu0 %v8031_v45  ;;  %7064 = vmatprep.mubr.bf16.mxu0 %v11676_v18  ;;  %v5000_v45 = vld [vmem:[%s11640_s6] sm:$0xff] }
 0x7f1   : > { %v11567_v36 = vrot.slane %v5479_v16, %v11548_v9  ;;  %v5300_v6 = vpop.f32.mrb[112].mxu0 }
 0x7f2   : > { %v5302_v8 = vpop.f32.mrb[113].mxu0 }
 0x7f3   : > { %v5494_v46 = vcombine.low %v11564_v57, %v11567_v36  ;;  %v5495_v48 = vcombine.low %v5300_v6, %v5302_v8  ;;  %v5304_v26 = vpop.f32.mrb[114].mxu0 }
 0x7f4   : > { %v5305_v47 = vpop.f32.mrb[115].mxu0 }
 0x7f5   : > { %v5505_v59 = vrot.slane %v5495_v48, %v11548_v9  ;;  %v5546_v57 = vadd.f32 %v5494_v46, %v5000_v45 }
 0x7f6   : > { %8040 = vmatmul.mubr.msk.bf16.vlgmr.msra.gmra.mrb[220].mxu0 %vm5098_vm2, %v11534_v14 }
 0x7f9   : > { %v5341_v13 = vpop.f32.mrb[116].mxu0 }
 0x7fa   : > { %v5343_v3 = vpop.f32.mrb[117].mxu0 }
 0x7fb   : > { %v5496_v18 = vcombine.low %v5341_v13, %v5343_v3  ;;  %v5345_v0 = vpop.f32.mrb[118].mxu0 }
 0x7fc   : > { %v5346_v62 = vpop.f32.mrb[119].mxu0 }
 0x7fd   : > { %v5512_v54 = vrot.slane %v5496_v18, %v11548_v9 }
 0x7ff   : > { %v5527_v12 = vcombine.low %v5505_v59, %v5512_v54 }
 0x801   : > { %v5382_v35 = vpop.f32.mrb[120].mxu0  ;;  %v11578_v19 = vrot.slane %v5527_v12, %v11548_v9 }
 0x802   : > { %v5384_v41 = vpop.f32.mrb[121].mxu0 }
 0x803   : > { %v5497_v56 = vcombine.low %v5382_v35, %v5384_v41  ;;  %v5386_v25 = vpop.f32.mrb[122].mxu0 }
 0x804   : > { %v5387_v31 = vpop.f32.mrb[123].mxu0 }
 0x805   : > { %v5519_v55 = vrot.slane %v5497_v56, %v11548_v9 }
 0x809   : > { %v5423_v49 = vpop.f32.mrb[124].mxu0 }
 0x80a   : > { %v5425_v63 = vpop.f32.mrb[125].mxu0 }
 0x80b   : > { %v5498_v29 = vcombine.low %v5423_v49, %v5425_v63  ;;  %v5427_v28 = vpop.f32.mrb[126].mxu0 }
 0x80c   : > { %v5428_v14 = vpop.f32.mrb[127].mxu0 }
 0x80d   : > { %v5526_v38 = vrot.slane %v5498_v29, %v11548_v9 }
 0x80f   : > { %v5528_v30 = vcombine.low %v5519_v55, %v5526_v38  ;;  %v5001_v38 = vld [vmem:[%s11640_s6 + $0x8] sm:$0xff] }
 0x811   : > { %v11581_v20 = vrot.slane %v5528_v30, %v11548_v9  ;;  %v5684_v22 = vpop.f32.mrb[128].mxu0 }
 0x812   : > { %v5686_v17 = vpop.f32.mrb[129].mxu0 }
 0x813   : > { %v5543_v39 = vcombine.low %v11578_v19, %v11581_v20  ;;  %v5994_v58 = vcombine.low %v5684_v22, %v5686_v17  ;;  %v5688_v53 = vpop.f32.mrb[130].mxu0 }
 0x814   : > { %v5689_v37 = vpop.f32.mrb[131].mxu0 }
 0x815   : > { %v6004_v52 = vrot.slane %v5994_v58, %v11548_v9  ;;  %v5547_v17 = vadd.f32 %v5543_v39, %v5001_v38 }
 0x819   : > { %v5725_v27 = vpop.f32.mrb[132].mxu0 }
 0x81a   : > { %v5727_v2 = vpop.f32.mrb[133].mxu0 }
 0x81b   : > { %v5995_v1 = vcombine.low %v5725_v27, %v5727_v2  ;;  %v5729_v7 = vpop.f32.mrb[134].mxu0 }
 0x81c   : > { %v5730_v21 = vpop.f32.mrb[135].mxu0 }
 0x81d   : > { %v6011_v44 = vrot.slane %v5995_v1, %v11548_v9 }
 0x81f   : > { %v6026_v51 = vcombine.low %v6004_v52, %v6011_v44 }
 0x821   : > { %v5766_v5 = vpop.f32.mrb[136].mxu0  ;;  %v6034_v34 = vrot.slane %v6026_v51, %v11548_v9 }
 0x822   : > { %v5768_v11 = vpop.f32.mrb[137].mxu0 }
 0x823   : > { %v5996_v43 = vcombine.low %v5766_v5, %v5768_v11  ;;  %v5770_v15 = vpop.f32.mrb[138].mxu0 }
 0x824   : > { %v5771_v50 = vpop.f32.mrb[139].mxu0 }
 0x825   : > { %v6018_v33 = vrot.slane %v5996_v43, %v11548_v9 }
 0x829   : > { %v5807_v24 = vpop.f32.mrb[140].mxu0 }
 0x82a   : > { %v5809_v40 = vpop.f32.mrb[141].mxu0 }
 0x82b   : > { %v5997_v60 = vcombine.low %v5807_v24, %v5809_v40  ;;  %v5811_v10 = vpop.f32.mrb[142].mxu0 }
 0x82c   : > { %v5812_v61 = vpop.f32.mrb[143].mxu0 }
 0x82d   : > { %v6025_v32 = vrot.slane %v5997_v60, %v11548_v9 }
 0x82f   : > { %v6027_v23 = vcombine.low %v6018_v33, %v6025_v32 }
 0x831   : > { %v6041_v4 = vrot.slane %v6027_v23, %v11548_v9  ;;  %v5848_v42 = vpop.f32.mrb[144].mxu0 }
 0x832   : > { %v5850_v16 = vpop.f32.mrb[145].mxu0 }
 0x833   : > { %v6042_v36 = vcombine.low %v6034_v34, %v6041_v4  ;;  %v6043_v6 = vcombine.low %v5848_v42, %v5850_v16  ;;  %v5852_v8 = vpop.f32.mrb[146].mxu0 }
 0x834   : > { %v5853_v48 = vpop.f32.mrb[147].mxu0 }
 0x835   : > { %v6094_v26 = vadd.f32 %v6042_v36, %v5546_v57  ;;  %v6053_v62 = vrot.slane %v6043_v6, %v11548_v9 }
 0x839   : > { %v5889_v47 = vpop.f32.mrb[148].mxu0 }
 0x83a   : > { %v5891_v13 = vpop.f32.mrb[149].mxu0 }
 0x83b   : > { %v6044_v3 = vcombine.low %v5889_v47, %v5891_v13  ;;  %v5893_v18 = vpop.f32.mrb[150].mxu0 }
 0x83c   : > { %v5894_v0 = vpop.f32.mrb[151].mxu0 }
 0x83d   : > { %v6060_v59 = vrot.slane %v6044_v3, %v11548_v9 }
 0x83f   : > { %v6075_v54 = vcombine.low %v6053_v62, %v6060_v59 }
 0x841   : > { %v5930_v12 = vpop.f32.mrb[152].mxu0  ;;  %v6083_v30 = vrot.slane %v6075_v54, %v11548_v9 }
 0x842   : > { %v5932_v35 = vpop.f32.mrb[153].mxu0 }
 0x843   : > { %v6045_v41 = vcombine.low %v5930_v12, %v5932_v35  ;;  %v5934_v56 = vpop.f32.mrb[154].mxu0 }
 0x844   : > { %v5935_v46 = vpop.f32.mrb[155].mxu0 }
 0x845   : > { %v6067_v28 = vrot.slane %v6045_v41, %v11548_v9 }
 0x849   : > { %v5971_v25 = vpop.f32.mrb[156].mxu0 }
 0x84a   : > { %v5973_v31 = vpop.f32.mrb[157].mxu0 }
 0x84b   : > { %v6046_v49 = vcombine.low %v5971_v25, %v5973_v31  ;;  %v5975_v63 = vpop.f32.mrb[158].mxu0 }
 0x84c   : > { %v5976_v29 = vpop.f32.mrb[159].mxu0 }
 0x84d   : > { %v6074_v14 = vrot.slane %v6046_v49, %v11548_v9 }
 0x84f   : > { %v6076_v55 = vcombine.low %v6067_v28, %v6074_v14 }
 0x851   : > { %v6090_v19 = vrot.slane %v6076_v55, %v11548_v9  ;;  %v6232_v20 = vpop.f32.mrb[160].mxu0 }
 0x852   : > { %v6234_v22 = vpop.f32.mrb[161].mxu0 }
 0x853   : > { %v6091_v58 = vcombine.low %v6083_v30, %v6090_v19  ;;  %v6542_v53 = vcombine.low %v6232_v20, %v6234_v22  ;;  %v6236_v37 = vpop.f32.mrb[162].mxu0 }
 0x854   : > { %v6237_v27 = vpop.f32.mrb[163].mxu0 }
 0x855   : > { %v6095_v2 = vadd.f32 %v6091_v58, %v5547_v17  ;;  %v6552_v51 = vrot.slane %v6542_v53, %v11548_v9 }
 0x859   : > { %v6273_v1 = vpop.f32.mrb[164].mxu0 }
 0x85a   : > { %v6275_v7 = vpop.f32.mrb[165].mxu0 }
 0x85b   : > { %v6543_v21 = vcombine.low %v6273_v1, %v6275_v7  ;;  %v6277_v52 = vpop.f32.mrb[166].mxu0 }
 0x85c   : > { %v6278_v44 = vpop.f32.mrb[167].mxu0 }
 0x85d   : > { %v6559_v5 = vrot.slane %v6543_v21, %v11548_v9 }
 0x85f   : > { %v6574_v11 = vcombine.low %v6552_v51, %v6559_v5 }
 0x861   : > { %v6314_v43 = vpop.f32.mrb[168].mxu0  ;;  %v6582_v34 = vrot.slane %v6574_v11, %v11548_v9 }
 0x862   : > { %v6316_v15 = vpop.f32.mrb[169].mxu0 }
 0x863   : > { %v6544_v50 = vcombine.low %v6314_v43, %v6316_v15  ;;  %v6318_v24 = vpop.f32.mrb[170].mxu0 }
 0x864   : > { %v6319_v39 = vpop.f32.mrb[171].mxu0 }
 0x865   : > { %v6566_v32 = vrot.slane %v6544_v50, %v11548_v9 }
 0x869   : > { %v6355_v40 = vpop.f32.mrb[172].mxu0 }
 0x86a   : > { %v6357_v60 = vpop.f32.mrb[173].mxu0 }
 0x86b   : > { %v6545_v10 = vcombine.low %v6355_v40, %v6357_v60  ;;  %v6359_v61 = vpop.f32.mrb[174].mxu0 }
 0x86c   : > { %v6360_v33 = vpop.f32.mrb[175].mxu0 }
 0x86d   : > { %v6573_v23 = vrot.slane %v6545_v10, %v11548_v9 }
 0x86f   : > { %v6575_v45 = vcombine.low %v6566_v32, %v6573_v23 }
 0x871   : > { %v6589_v4 = vrot.slane %v6575_v45, %v11548_v9  ;;  %v6396_v42 = vpop.f32.mrb[176].mxu0 }
 0x872   : > { %v6398_v16 = vpop.f32.mrb[177].mxu0 }
 0x873   : > { %v6590_v57 = vcombine.low %v6582_v34, %v6589_v4  ;;  %v6591_v36 = vcombine.low %v6396_v42, %v6398_v16  ;;  %v6400_v6 = vpop.f32.mrb[178].mxu0 }
 0x874   : > { %v6401_v8 = vpop.f32.mrb[179].mxu0 }
 0x875   : > { %v6642_v48 = vadd.f32 %v6590_v57, %v6094_v26  ;;  %v6601_v62 = vrot.slane %v6591_v36, %v11548_v9 }
 0x879   : > { %v6437_v47 = vpop.f32.mrb[180].mxu0 }
 0x87a   : > { %v6439_v13 = vpop.f32.mrb[181].mxu0 }
 0x87b   : > { %v6592_v3 = vcombine.low %v6437_v47, %v6439_v13  ;;  %v6441_v18 = vpop.f32.mrb[182].mxu0 }
 0x87c   : > { %v6442_v0 = vpop.f32.mrb[183].mxu0 }
 0x87d   : > { %v6608_v59 = vrot.slane %v6592_v3, %v11548_v9 }
 0x87f   : > { %v6623_v54 = vcombine.low %v6601_v62, %v6608_v59 }
 0x881   : > { %v6478_v12 = vpop.f32.mrb[184].mxu0  ;;  %v6631_v55 = vrot.slane %v6623_v54, %v11548_v9 }
 0x882   : > { %v6480_v35 = vpop.f32.mrb[185].mxu0 }
 0x883   : > { %v6593_v41 = vcombine.low %v6478_v12, %v6480_v35  ;;  %v6482_v56 = vpop.f32.mrb[186].mxu0 }
 0x884   : > { %v6483_v46 = vpop.f32.mrb[187].mxu0 }
 0x885   : > { %v6615_v29 = vrot.slane %v6593_v41, %v11548_v9 }
 0x889   : > { %v6519_v25 = vpop.f32.mrb[188].mxu0 }
 0x88a   : > { %v6521_v31 = vpop.f32.mrb[189].mxu0 }
 0x88b   : > { %v6594_v49 = vcombine.low %v6519_v25, %v6521_v31  ;;  %v6523_v63 = vpop.f32.mrb[190].mxu0 }
 0x88c   : > { %v6524_v26 = vpop.f32.mrb[191].mxu0 }
 0x88d   : > { %v6622_v28 = vrot.slane %v6594_v49, %v11548_v9 }
 0x88f   : > { %v6624_v14 = vcombine.low %v6615_v29, %v6622_v28 }
 0x891   : > { %v6638_v38 = vrot.slane %v6624_v14, %v11548_v9  ;;  %v6779_v30 = vpop.f32.mrb[192].mxu0 }
 0x892   : > { %v6781_v19 = vpop.f32.mrb[193].mxu0 }
 0x893   : > { %v6639_v20 = vcombine.low %v6631_v55, %v6638_v38  ;;  %v7089_v22 = vcombine.low %v6779_v30, %v6781_v19  ;;  %v6783_v17 = vpop.f32.mrb[194].mxu0 }
 0x894   : > { %v6784_v58 = vpop.f32.mrb[195].mxu0 }
 0x895   : > { %v6643_v53 = vadd.f32 %v6639_v20, %v6095_v2  ;;  %v7099_v52 = vrot.slane %v7089_v22, %v11548_v9 }
 0x899   : > { %v6820_v37 = vpop.f32.mrb[196].mxu0 }
 0x89a   : > { %v6822_v27 = vpop.f32.mrb[197].mxu0 }
 0x89b   : > { %v7090_v1 = vcombine.low %v6820_v37, %v6822_v27  ;;  %v6824_v7 = vpop.f32.mrb[198].mxu0 }
 0x89c   : > { %v6825_v21 = vpop.f32.mrb[199].mxu0 }
 0x89d   : > { %v7106_v44 = vrot.slane %v7090_v1, %v11548_v9 }
 0x89f   : > { %v7121_v51 = vcombine.low %v7099_v52, %v7106_v44 }
 0x8a1   : > { %v6861_v5 = vpop.f32.mrb[200].mxu0  ;;  %v7129_v32 = vrot.slane %v7121_v51, %v11548_v9 }
 0x8a2   : > { %v6863_v11 = vpop.f32.mrb[201].mxu0 }
 0x8a3   : > { %v7091_v43 = vcombine.low %v6861_v5, %v6863_v11  ;;  %v6865_v15 = vpop.f32.mrb[202].mxu0 }
 0x8a4   : > { %v6866_v50 = vpop.f32.mrb[203].mxu0 }
 0x8a5   : > { %v7113_v10 = vrot.slane %v7091_v43, %v11548_v9 }
 0x8a9   : > { %v6902_v24 = vpop.f32.mrb[204].mxu0 }
 0x8aa   : > { %v6904_v39 = vpop.f32.mrb[205].mxu0 }
 0x8ab   : > { %v7092_v40 = vcombine.low %v6902_v24, %v6904_v39  ;;  %v6906_v2 = vpop.f32.mrb[206].mxu0 }
 0x8ac   : > { %v6907_v60 = vpop.f32.mrb[207].mxu0 }
 0x8ad   : > { %v7120_v61 = vrot.slane %v7092_v40, %v11548_v9 }
 0x8af   : > { %v7122_v33 = vcombine.low %v7113_v10, %v7120_v61 }
 0x8b1   : > { %v7136_v23 = vrot.slane %v7122_v33, %v11548_v9  ;;  %v6943_v45 = vpop.f32.mrb[208].mxu0 }
 0x8b2   : > { %v6945_v34 = vpop.f32.mrb[209].mxu0 }
 0x8b3   : > { %v7137_v4 = vcombine.low %v7129_v32, %v7136_v23  ;;  %v7138_v42 = vcombine.low %v6943_v45, %v6945_v34  ;;  %v6947_v16 = vpop.f32.mrb[210].mxu0 }
 0x8b4   : > { %v6948_v57 = vpop.f32.mrb[211].mxu0 }
 0x8b5   : > { %v7189_v36 = vadd.f32 %v7137_v4, %v6642_v48  ;;  %v7148_v18 = vrot.slane %v7138_v42, %v11548_v9 }
 0x8b7   : > { %7191 = vst [vmem:[%s291_s26] sm:$0xff] %v7189_v36 }
 0x8b9   : > { %v6984_v6 = vpop.f32.mrb[212].mxu0 }
 0x8ba   : > { %v6986_v8 = vpop.f32.mrb[213].mxu0 }
 0x8bb   : > { %v7139_v47 = vcombine.low %v6984_v6, %v6986_v8  ;;  %v6988_v13 = vpop.f32.mrb[214].mxu0 }
 0x8bc   : > { %v6989_v3 = vpop.f32.mrb[215].mxu0 }
 0x8bd   : > { %v7155_v0 = vrot.slane %v7139_v47, %v11548_v9 }
 0x8bf   : > { %v7170_v62 = vcombine.low %v7148_v18, %v7155_v0 }
 0x8c1   : > { %v7025_v59 = vpop.f32.mrb[216].mxu0  ;;  %v7178_v29 = vrot.slane %v7170_v62, %v11548_v9 }
 0x8c2   : > { %v7027_v54 = vpop.f32.mrb[217].mxu0 }
 0x8c3   : > { %v7140_v12 = vcombine.low %v7025_v59, %v7027_v54  ;;  %v7029_v35 = vpop.f32.mrb[218].mxu0 }
 0x8c4   : > { %v7030_v41 = vpop.f32.mrb[219].mxu0 }
 0x8c5   : > { %v7162_v49 = vrot.slane %v7140_v12, %v11548_v9 }
 0x8c9   : > { %v7066_v56 = vpop.f32.mrb[220].mxu0 }
 0x8ca   : > { %v7068_v46 = vpop.f32.mrb[221].mxu0 }
 0x8cb   : > { %v7141_v25 = vcombine.low %v7066_v56, %v7068_v46  ;;  %v7070_v48 = vpop.f32.mrb[222].mxu0 }
 0x8cc   : > { %v7071_v31 = vpop.f32.mrb[223].mxu0 }
 0x8cd   : > { %v7169_v63 = vrot.slane %v7141_v25, %v11548_v9 }
 0x8cf   : > { %v7171_v26 = vcombine.low %v7162_v49, %v7169_v63 }
 0x8d1   : > { %v7185_v28 = vrot.slane %v7171_v26, %v11548_v9 }
 0x8d3   : > { %v7186_v14 = vcombine.low %v7178_v29, %v7185_v28 }
 0x8d5   : > { %v7190_v55 = vadd.f32 %v7186_v14, %v6643_v53 }
 0x8d7   : > { %7192 = vst [vmem:[%s291_s26 + $0x8] sm:$0xff] %v7190_v55 }
 0x8d8 PF: > { %s18_s24 = sadd.s32 1, %s9781_s24  }
 0x8d9   : > { %p15_p3 = scmp.ge.s32.totalorder %s18_s24, 4  }
 0x8db   :  { %17 = sbr.rel (!%p15_p3) target bundleno = 1 (0x1), region = 110 }
 0x8e2   :  { %7212 = vsyncpa [#allocation4], 1 }
 0x8e3   :  { %7214 = vsyncpa [#allocation4 + $0x1], 1 }

</bundles_post_ra>
